<compile_context>
chip_gen: v6e
topology: v6e:2x2x1
jax: 0.10.0
libtpu: 0.0.40
codegen_flags: <defaults>
</compile_context>

<pallas_src>
import math

import jax
import jax.numpy as jnp
from jax import lax
from jax.experimental import pallas as pl
from jax.experimental.pallas import tpu as pltpu


def round_up(n, m):
    return ((n + m - 1) // m) * m


def _largest_divisor(n, candidates):
    for c in candidates:
        if n % c == 0:
            return c
    return 1


def _vmem_limit(nbytes):
    # Size the scoped VMEM limit from the actual footprint with headroom, clamped.
    return int(min(max(2 * nbytes + (4 << 20), 32 << 20), 128 << 20))


# --------------------------------------------------------------------------------------
# Kernel 1: 2-layer LSTM recurrence over one batch group (time loop inside the kernel).
# --------------------------------------------------------------------------------------
def make_lstm_kernel(T, Bg, Hp):
    Hg = 4 * Hp
    uf = _largest_divisor(T, (8, 4, 2, 1))   # partial unroll for LLO scheduler visibility

    def kernel(x_ref, wih1_ref, whh1_ref, b1_ref, wih2_ref, whh2_ref, b2_ref,
               h2all_ref, xproj_ref, h1, h2, c1, c2):
        # ---- Phase 1: hoisted time-independent input projection, b1 folded in --------
        xproj_ref[...] = (jnp.dot(x_ref[...], wih1_ref[...],
                                  preferred_element_type=jnp.float32)
                          + b1_ref[...]).astype(jnp.bfloat16)

        # ---- init recurrent state (h kept bf16; c kept f32) ---------------------------
        h1[...] = jnp.zeros_like(h1)
        h2[...] = jnp.zeros_like(h2)
        c1[...] = jnp.zeros_like(c1)
        c2[...] = jnp.zeros_like(c2)

        # Hoist the bias broadcast out of the serial loop (broadcast_in_dim is not CSE'd).
        b2b = jnp.broadcast_to(b2_ref[...], (Bg, Hg))

        def gates_to_hc(g, c_prev):
            # PyTorch gate order [i, f, g, o]; each gate block is Hp (multiple of 128)
            # lanes wide, so these slices are lane-tile aligned.
            i_g = jax.nn.sigmoid(g[:, 0:Hp])
            f_g = jax.nn.sigmoid(g[:, Hp:2 * Hp])
            g_g = jnp.tanh(g[:, 2 * Hp:3 * Hp])
            o_g = jax.nn.sigmoid(g[:, 3 * Hp:4 * Hp])
            c_new = f_g * c_prev + i_g * g_g
            h_new = o_g * jnp.tanh(c_new)
            return h_new, c_new

        # ---- Phase 2: the sequential recurrence (only part that must be serial) -------
        def step(t, carry):
            off = pl.multiple_of(t * Bg, Bg)

            # Layer-2 hidden contribution depends only on t-1: issue it first so it
            # overlaps layer-1's matmul + EUP chain (Wih2/Whh2 un-fused on purpose).
            g2h = jnp.dot(h2[...], whh2_ref[...], preferred_element_type=jnp.float32)

            # Layer 1: input projection (+bias) precomputed; only h1 @ Whh1 here.
            g1 = (xproj_ref[pl.ds(off, Bg), :].astype(jnp.float32)
                  + jnp.dot(h1[...], whh1_ref[...], preferred_element_type=jnp.float32))
            h1_new, c1_new = gates_to_hc(g1, c1[...])
            c1[...] = c1_new
            h1_bf = h1_new.astype(jnp.bfloat16)
            h1[...] = h1_bf

            # TODO(synk): inter-layer dropout(p=0.1) is training-mode only; this is the
            # inference forward pass, so it is omitted.

            # Layer 2: add the h1(t) contribution on top of the already-issued g2h.
            g2 = g2h + jnp.dot(h1_bf, wih2_ref[...],
                               preferred_element_type=jnp.float32) + b2b
            h2_new, c2_new = gates_to_hc(g2, c2[...])
            c2[...] = c2_new
            h2_bf = h2_new.astype(jnp.bfloat16)
            h2[...] = h2_bf
            h2all_ref[pl.ds(off, Bg), :] = h2_bf
            return carry

        lax.fori_loop(0, T, step, None, unroll=uf)

    return kernel


# --------------------------------------------------------------------------------------
# Kernel 2: tiled vocabulary head + fused online log-softmax / NLL across vocab tiles.
# --------------------------------------------------------------------------------------
def make_head_kernel(TR, TV, V):
    def kernel(h2_ref, w_ref, b_ref, lab_ref, logits_ref, nll_ref,
               m_sc, l_sc, tgt_sc):
        j = pl.program_id(1)

        @pl.when(j == 0)
        def _():
            m_sc[...] = jnp.full_like(m_sc, -jnp.inf)
            l_sc[...] = jnp.zeros_like(l_sc)
            tgt_sc[...] = jnp.zeros_like(tgt_sc)

        logits = (jnp.dot(h2_ref[...], w_ref[...],
                          preferred_element_type=jnp.float32) + b_ref[...])
        logits_ref[...] = logits        # lane-dense (TR, TV) f32 store

        # Online log-softmax statistics over the real (unpadded) vocab columns.
        col = lax.broadcasted_iota(jnp.int32, (TR, TV), 1) + j * TV
        masked = jnp.where(col < V, logits, -jnp.inf)
        m_new = jnp.maximum(m_sc[...], masked.max(axis=-1, keepdims=True))
        alpha = jnp.exp(m_sc[...] - m_new)
        l_sc[...] = alpha * l_sc[...] + jnp.exp(masked - m_new).sum(axis=-1, keepdims=True)
        m_sc[...] = m_new

        # Logit at the label position (labels are valid class indices < V).
        sel = col == lab_ref[...]
        tgt_sc[...] += jnp.sum(jnp.where(sel, logits, 0.0), axis=-1, keepdims=True)

        @pl.when(j == pl.num_programs(1) - 1)
        def _():
            nll_ref[...] = m_sc[...] + jnp.log(l_sc[...]) - tgt_sc[...]

    return kernel


# --------------------------------------------------------------------------------------
# Parameters
# --------------------------------------------------------------------------------------
def init_params(key, vocab_size, embed_size, hidden_size):
    """PyTorch-layout parameters with PyTorch-style init (separate b_ih / b_hh)."""
    ks = jax.random.split(key, 12)
    H, E, V = hidden_size, embed_size, vocab_size
    stdv = 1.0 / math.sqrt(H)

    def u(k, shape):
        return jax.random.uniform(k, shape, jnp.float32, -stdv, stdv)

    return {
        "embedding": jax.random.normal(ks[0], (V, E), jnp.float32),
        "w_ih_l0": u(ks[1], (4 * H, E)),
        "w_hh_l0": u(ks[2], (4 * H, H)),
        "b_ih_l0": u(ks[3], (4 * H,)),
        "b_hh_l0": u(ks[4], (4 * H,)),
        "w_ih_l1": u(ks[5], (4 * H, H)),
        "w_hh_l1": u(ks[6], (4 * H, H)),
        "b_ih_l1": u(ks[7], (4 * H,)),
        "b_hh_l1": u(ks[8], (4 * H,)),
        "head_w": u(ks[9], (V, H)),
        "head_b": u(ks[10], (V,)),
    }


def prepare_kernel_params(params):
    """Pre-transpose, gate-wise zero-pad to lane-aligned sizes, cast matmul weights to bf16.

    Zero padding is placed so padded hidden lanes stay exactly zero through the
    recurrence (padded pre-activations are 0 -> g=tanh(0)=0 -> c_pad,h_pad stay 0) and
    padded weight rows are zero, so the padded computation matches the unpadded one
    (up to bf16 rounding).
    """
    V, E = params["embedding"].shape
    H = params["w_hh_l0"].shape[1]
    Ep, Hp, Vp = round_up(E, 128), round_up(H, 128), round_up(V, 128)

    def pad_gates_w(w_t, rows, rows_p):
        w4 = w_t.reshape(rows, 4, H)
        w4 = jnp.pad(w4, ((0, rows_p - rows), (0, 0), (0, Hp - H)))
        return w4.reshape(rows_p, 4 * Hp)

    def pad_gates_b(b):
        b4 = jnp.pad(b.reshape(4, H), ((0, 0), (0, Hp - H)))
        return b4.reshape(1, 4 * Hp)

    wih1 = pad_gates_w(params["w_ih_l0"].T, E, Ep).astype(jnp.bfloat16)
    whh1 = pad_gates_w(params["w_hh_l0"].T, H, Hp).astype(jnp.bfloat16)
    b1 = pad_gates_b(params["b_ih_l0"] + params["b_hh_l0"])
    wih2 = pad_gates_w(params["w_ih_l1"].T, H, Hp).astype(jnp.bfloat16)
    whh2 = pad_gates_w(params["w_hh_l1"].T, H, Hp).astype(jnp.bfloat16)
    b2 = pad_gates_b(params["b_ih_l1"] + params["b_hh_l1"])
    whead = jnp.pad(params["head_w"].T, ((0, Hp - H), (0, Vp - V))).astype(jnp.bfloat16)
    bhead = jnp.pad(params["head_b"], (0, Vp - V)).reshape(1, Vp)

    return {
        "embedding": params["embedding"],
        "wih1": wih1, "whh1": whh1, "b1": b1,
        "wih2": wih2, "whh2": whh2, "b2": b2,
        "whead": whead, "bhead": bhead,
        "dims": {"V": V, "E": E, "H": H, "Ep": Ep, "Hp": Hp, "Vp": Vp},
    }


# --------------------------------------------------------------------------------------
# Forward pass
# --------------------------------------------------------------------------------------
def custom_rnn_forward(input_ids, kparams, labels=None):
    """input_ids: (B, T) int32.  Returns {'loss', 'logits'} like the PyTorch module."""
    d = kparams["dims"]
    V, Ep, Hp, Vp = d["V"], d["Ep"], d["Hp"], d["Vp"]
    B, T = input_ids.shape

    # Batch grouping: a 'parallel' grid axis over groups (fills both TCs on v7x,
    # bounds per-group VMEM for larger batches).
    Bg = round_up(B, 8) if B <= 64 else 64
    Bp = round_up(B, Bg)
    G = Bp // Bg

    # Embedding gather (plain-JAX glue); group/time-major layout; zero-pad to aligned sizes.
    x = jnp.take(kparams["embedding"], input_ids, axis=0)             # (B, T, E)
    x = jnp.pad(x, ((0, Bp - B), (0, 0), (0, Ep - d["E"])))           # (Bp, T, Ep)
    x = jnp.transpose(x.reshape(G, Bg, T, Ep), (0, 2, 1, 3))          # (G, T, Bg, Ep)
    x = x.reshape(G, T * Bg, Ep).astype(jnp.bfloat16)

    # ---------------- Kernel 1: the recurrence ----------------
    rec_need = (2 * T * Bg * Ep * 2                      # x block (double-buffered)
                + 2 * (Ep + 3 * Hp) * 4 * Hp * 2         # weights
                + 4 * 4 * Hp * 4                         # biases
                + 2 * T * Bg * Hp * 2                    # h2 output block
                + T * Bg * 4 * Hp * 2                    # xproj scratch (bf16)
                + 2 * Bg * Hp * 2 + 2 * Bg * Hp * 4)     # h / c state

    h2all = pl.pallas_call(
        make_lstm_kernel(T, Bg, Hp),
        out_shape=jax.ShapeDtypeStruct((G, T * Bg, Hp), jnp.bfloat16),
        grid=(G,),
        in_specs=[
            pl.BlockSpec((None, T * Bg, Ep), lambda g: (g, 0, 0)),
            pl.BlockSpec((Ep, 4 * Hp), lambda g: (0, 0)),       # wih1
            pl.BlockSpec((Hp, 4 * Hp), lambda g: (0, 0)),       # whh1
            pl.BlockSpec((1, 4 * Hp), lambda g: (0, 0)),        # b1 (folded into xproj)
            pl.BlockSpec((Hp, 4 * Hp), lambda g: (0, 0)),       # wih2
            pl.BlockSpec((Hp, 4 * Hp), lambda g: (0, 0)),       # whh2
            pl.BlockSpec((1, 4 * Hp), lambda g: (0, 0)),        # b2
        ],
        out_specs=pl.BlockSpec((None, T * Bg, Hp), lambda g: (g, 0, 0)),
        scratch_shapes=[
            pltpu.VMEM((T * Bg, 4 * Hp), jnp.bfloat16),   # hoisted input projection (bf16)
            pltpu.VMEM((Bg, Hp), jnp.bfloat16),           # h1 (bf16 MXU LHS)
            pltpu.VMEM((Bg, Hp), jnp.bfloat16),           # h2
            pltpu.VMEM((Bg, Hp), jnp.float32),            # c1
            pltpu.VMEM((Bg, Hp), jnp.float32),            # c2
        ],
        compiler_params=pltpu.CompilerParams(
            dimension_semantics=("parallel",),
            vmem_limit_bytes=_vmem_limit(rec_need)),
    )(x, kparams["wih1"], kparams["whh1"], kparams["b1"],
      kparams["wih2"], kparams["whh2"], kparams["b2"])

    # ---------------- Kernel 2: tiled head + fused CE ----------------
    N = G * T * Bg
    TR = _largest_divisor(N, (256, 128, 64, 32, 16, 8))
    TV = _largest_divisor(Vp, (512, 256, 128))

    h2_flat = h2all.reshape(N, Hp)
    if labels is not None:
        lab = jnp.pad(labels.astype(jnp.int32), ((0, Bp - B), (0, 0)))   # (Bp, T)
        lab = jnp.transpose(lab.reshape(G, Bg, T), (0, 2, 1)).reshape(N, 1)
    else:
        lab = jnp.zeros((N, 1), jnp.int32)

    head_need = (2 * (TR * Hp * 2 + Hp * TV * 2 + TV * 4 + TR * 4)
                 + 2 * (TR * TV * 4 + TR * 4) + 3 * TR * 4)

    logits_flat, nll_flat = pl.pallas_call(
        make_head_kernel(TR, TV, V),
        out_shape=(jax.ShapeDtypeStruct((N, Vp), jnp.float32),
                   jax.ShapeDtypeStruct((N, 1), jnp.float32)),
        grid=(N // TR, Vp // TV),
        in_specs=[
            pl.BlockSpec((TR, Hp), lambda i, j: (i, 0)),     # h2 rows
            pl.BlockSpec((Hp, TV), lambda i, j: (0, j)),     # head weight, streamed by tile
            pl.BlockSpec((1, TV), lambda i, j: (0, j)),      # head bias
            pl.BlockSpec((TR, 1), lambda i, j: (i, 0)),      # labels
        ],
        out_specs=(
            pl.BlockSpec((TR, TV), lambda i, j: (i, j)),     # logits
            pl.BlockSpec((TR, 1), lambda i, j: (i, 0)),      # per-row NLL
        ),
        scratch_shapes=[pltpu.VMEM((TR, 1), jnp.float32),    # running max
                        pltpu.VMEM((TR, 1), jnp.float32),    # running sum-exp
                        pltpu.VMEM((TR, 1), jnp.float32)],   # target logit
        compiler_params=pltpu.CompilerParams(
            dimension_semantics=("parallel", "arbitrary"),
            vmem_limit_bytes=_vmem_limit(head_need)),
    )(h2_flat, kparams["whead"], kparams["bhead"], lab)

    # Un-pad / re-layout to (B, T, V) batch_first.
    logits = logits_flat.reshape(G, T, Bg, Vp)
    logits = jnp.transpose(logits, (0, 2, 1, 3)).reshape(Bp, T, Vp)[:B, :, :V]

    loss = None
    if labels is not None:
        nll = jnp.transpose(nll_flat.reshape(G, T, Bg), (0, 2, 1)).reshape(Bp, T)[:B]
        # TODO(synk): no ignore_index handling (matches default nn.CrossEntropyLoss
        # with all-valid labels).
        loss = jnp.mean(nll)

    return {"loss": loss, "logits": logits}


# --------------------------------------------------------------------------------------
# Pure-JAX reference (f32), for a tolerance check of the bf16 kernel path.
# --------------------------------------------------------------------------------------
def reference_forward(params, input_ids, labels=None):
    H = params["w_hh_l0"].shape[1]
    x = jnp.take(params["embedding"], input_ids, axis=0)   # (B, T, E)
    B = x.shape[0]

    def lstm_layer(x_seq, w_ih, w_hh, b_ih, b_hh):
        def step(carry, xt):
            h, c = carry
            g = xt @ w_ih.T + h @ w_hh.T + b_ih + b_hh
            i, f, gg, o = jnp.split(g, 4, axis=-1)
            c = jax.nn.sigmoid(f) * c + jax.nn.sigmoid(i) * jnp.tanh(gg)
            h = jax.nn.sigmoid(o) * jnp.tanh(c)
            return (h, c), h
        init = (jnp.zeros((B, H)), jnp.zeros((B, H)))
        _, hs = lax.scan(step, init, jnp.transpose(x_seq, (1, 0, 2)))
        return jnp.transpose(hs, (1, 0, 2))

    h1 = lstm_layer(x, params["w_ih_l0"], params["w_hh_l0"],
                    params["b_ih_l0"], params["b_hh_l0"])
    h2 = lstm_layer(h1, params["w_ih_l1"], params["w_hh_l1"],
                    params["b_ih_l1"], params["b_hh_l1"])
    logits = h2 @ params["head_w"].T + params["head_b"]
    loss = None
    if labels is not None:
        logp = jax.nn.log_softmax(logits, axis=-1)
        nll = -jnp.take_along_axis(logp, labels[..., None], axis=-1)[..., 0]
        loss = jnp.mean(nll)
    return {"loss": loss, "logits": logits}


if __name__ == "__main__":
    vocab_size, embed_size, hidden_size = 50, 32, 32
    B, T = 2, 8

    key = jax.random.PRNGKey(0)
    k_param, k_ids, k_lab = jax.random.split(key, 3)

    params = init_params(k_param, vocab_size, embed_size, hidden_size)
    kparams = prepare_kernel_params(params)
    input_ids = jax.random.randint(k_ids, (B, T), 0, vocab_size, dtype=jnp.int32)
    labels = jax.random.randint(k_lab, (B, T), 0, vocab_size, dtype=jnp.int32)

    out = custom_rnn_forward(input_ids, kparams, labels=labels)
    jax.block_until_ready(out["logits"])
    jax.block_until_ready(out["loss"])

    assert out["logits"].shape == (B, T, vocab_size)
    assert out["loss"].shape == ()
    assert bool(jnp.isfinite(out["loss"]))

    # Tolerance check vs f32 reference (kernel path uses bf16 weights/activations).
    ref = reference_forward(params, input_ids, labels=labels)
    max_abs = float(jnp.max(jnp.abs(out["logits"] - ref["logits"])))
    loss_abs = float(jnp.abs(out["loss"] - ref["loss"]))
    assert max_abs < 5e-2, f"logit mismatch {max_abs}"
    assert loss_abs < 2e-2, f"loss mismatch {loss_abs}"

    print("KERNEL_OK")
</pallas_src>

<mosaic_0001>
module attributes {stable_mosaic.version = 11 : i64} {
  func.func @kernel(%arg0: i32, %arg1: memref<1x64x128xbf16, #tpu.memory_space<vmem>>, %arg2: memref<128x512xbf16, #tpu.memory_space<vmem>>, %arg3: memref<128x512xbf16, #tpu.memory_space<vmem>>, %arg4: memref<1x512xf32, #tpu.memory_space<vmem>>, %arg5: memref<128x512xbf16, #tpu.memory_space<vmem>>, %arg6: memref<128x512xbf16, #tpu.memory_space<vmem>>, %arg7: memref<1x512xf32, #tpu.memory_space<vmem>>, %arg8: memref<1x64x128xbf16, #tpu.memory_space<vmem>>, %arg9: memref<64x512xbf16, #tpu.memory_space<vmem>>, %arg10: memref<8x128xbf16, #tpu.memory_space<vmem>>, %arg11: memref<8x128xbf16, #tpu.memory_space<vmem>>, %arg12: memref<8x128xf32, #tpu.memory_space<vmem>>, %arg13: memref<8x128xf32, #tpu.memory_space<vmem>>) attributes {dimension_semantics = [#tpu.dimension_semantics<parallel>], iteration_bounds = array<i64: 1>, scalar_prefetch = 0 : i64, scratch_operands = 5 : i64, tpu.core_type = #tpu.core_type<tc>, window_params = [{transform_indices = @transform_0, window_bounds = array<i64: 1, 64, 128>}, {pipeline_mode = #tpu.pipeline_mode<synchronous>, transform_indices = @transform_1, window_bounds = array<i64: 128, 512>}, {pipeline_mode = #tpu.pipeline_mode<synchronous>, transform_indices = @transform_2, window_bounds = array<i64: 128, 512>}, {pipeline_mode = #tpu.pipeline_mode<synchronous>, transform_indices = @transform_3, window_bounds = array<i64: 1, 512>}, {pipeline_mode = #tpu.pipeline_mode<synchronous>, transform_indices = @transform_4, window_bounds = array<i64: 128, 512>}, {pipeline_mode = #tpu.pipeline_mode<synchronous>, transform_indices = @transform_5, window_bounds = array<i64: 128, 512>}, {pipeline_mode = #tpu.pipeline_mode<synchronous>, transform_indices = @transform_6, window_bounds = array<i64: 1, 512>}, {transform_indices = @transform_7, window_bounds = array<i64: 1, 64, 128>}]} {
    %c0 = arith.constant 0 : index
    %c0_0 = arith.constant 0 : index
    %c0_1 = arith.constant 0 : index
    %0 = vector.load %arg1[%c0, %c0_0, %c0_1] : memref<1x64x128xbf16, #tpu.memory_space<vmem>>, vector<1x64x128xbf16>
    %1 = vector.shape_cast %0 : vector<1x64x128xbf16> to vector<64x128xbf16>
    %c0_2 = arith.constant 0 : index
    %c0_3 = arith.constant 0 : index
    %2 = vector.load %arg2[%c0_2, %c0_3] : memref<128x512xbf16, #tpu.memory_space<vmem>>, vector<128x512xbf16>
    %cst = arith.constant dense<0.000000e+00> : vector<64x512xf32>
    %3 = tpu.matmul %1, %2, %cst {dimension_numbers = #tpu.dot_dimension_numbers<[1], [0], [0], [1], [0, 0, 1, 1], [], []>} : vector<64x128xbf16>, vector<128x512xbf16>, vector<64x512xf32> -> vector<64x512xf32>
    %c0_4 = arith.constant 0 : index
    %c0_5 = arith.constant 0 : index
    %4 = vector.load %arg4[%c0_4, %c0_5] : memref<1x512xf32, #tpu.memory_space<vmem>>, vector<1x512xf32>
    %5 = vector.broadcast %4 : vector<1x512xf32> to vector<64x512xf32>
    %6 = arith.addf %3, %5 : vector<64x512xf32>
    %7 = arith.truncf %6 : vector<64x512xf32> to vector<64x512xbf16>
    %c0_6 = arith.constant 0 : index
    %c0_7 = arith.constant 0 : index
    %8 = vector.load %arg9[%c0_6, %c0_7] : memref<64x512xbf16, #tpu.memory_space<vmem>>, vector<64x512xbf16>
    tpu.vector_store %arg9[%c0_6, %c0_7], %7 {strides = array<i32>} : memref<64x512xbf16, #tpu.memory_space<vmem>>, vector<64x512xbf16>,
    %cst_8 = arith.constant 0.000000e+00 : bf16
    %9 = vector.broadcast %cst_8 : bf16 to vector<8x128xbf16>
    %c0_9 = arith.constant 0 : index
    %c0_10 = arith.constant 0 : index
    %10 = vector.load %arg10[%c0_9, %c0_10] : memref<8x128xbf16, #tpu.memory_space<vmem>>, vector<8x128xbf16>
    tpu.vector_store %arg10[%c0_9, %c0_10], %9 {strides = array<i32>} : memref<8x128xbf16, #tpu.memory_space<vmem>>, vector<8x128xbf16>,
    %cst_11 = arith.constant 0.000000e+00 : bf16
    %11 = vector.broadcast %cst_11 : bf16 to vector<8x128xbf16>
    %c0_12 = arith.constant 0 : index
    %c0_13 = arith.constant 0 : index
    %12 = vector.load %arg11[%c0_12, %c0_13] : memref<8x128xbf16, #tpu.memory_space<vmem>>, vector<8x128xbf16>
    tpu.vector_store %arg11[%c0_12, %c0_13], %11 {strides = array<i32>} : memref<8x128xbf16, #tpu.memory_space<vmem>>, vector<8x128xbf16>,
    %cst_14 = arith.constant 0.000000e+00 : f32
    %13 = vector.broadcast %cst_14 : f32 to vector<8x128xf32>
    %c0_15 = arith.constant 0 : index
    %c0_16 = arith.constant 0 : index
    %14 = vector.load %arg12[%c0_15, %c0_16] : memref<8x128xf32, #tpu.memory_space<vmem>>, vector<8x128xf32>
    tpu.vector_store %arg12[%c0_15, %c0_16], %13 {strides = array<i32>} : memref<8x128xf32, #tpu.memory_space<vmem>>, vector<8x128xf32>,
    %cst_17 = arith.constant 0.000000e+00 : f32
    %15 = vector.broadcast %cst_17 : f32 to vector<8x128xf32>
    %c0_18 = arith.constant 0 : index
    %c0_19 = arith.constant 0 : index
    %16 = vector.load %arg13[%c0_18, %c0_19] : memref<8x128xf32, #tpu.memory_space<vmem>>, vector<8x128xf32>
    tpu.vector_store %arg13[%c0_18, %c0_19], %15 {strides = array<i32>} : memref<8x128xf32, #tpu.memory_space<vmem>>, vector<8x128xf32>,
    %c0_20 = arith.constant 0 : index
    %c0_21 = arith.constant 0 : index
    %17 = vector.load %arg7[%c0_20, %c0_21] : memref<1x512xf32, #tpu.memory_space<vmem>>, vector<1x512xf32>
    %18 = vector.shape_cast %17 : vector<1x512xf32> to vector<1x512xf32>
    %19 = vector.broadcast %18 : vector<1x512xf32> to vector<8x512xf32>
    %c0_i32 = arith.constant 0 : i32
    %c8_i32 = arith.constant 8 : i32
    %20 = arith.muli %c0_i32, %c8_i32 : i32
    %21 = tpu.assume_multiple %20, 8 : i32
    %c0_22 = arith.constant 0 : index
    %c0_23 = arith.constant 0 : index
    %22 = vector.load %arg11[%c0_22, %c0_23] : memref<8x128xbf16, #tpu.memory_space<vmem>>, vector<8x128xbf16>
    %c0_24 = arith.constant 0 : index
    %c0_25 = arith.constant 0 : index
    %23 = vector.load %arg6[%c0_24, %c0_25] : memref<128x512xbf16, #tpu.memory_space<vmem>>, vector<128x512xbf16>
    %cst_26 = arith.constant dense<0.000000e+00> : vector<8x512xf32>
    %24 = tpu.matmul %22, %23, %cst_26 {dimension_numbers = #tpu.dot_dimension_numbers<[1], [0], [0], [1], [0, 0, 1, 1], [], []>} : vector<8x128xbf16>, vector<128x512xbf16>, vector<8x512xf32> -> vector<8x512xf32>
    %25 = arith.index_cast %21 : i32 to index
    %c0_27 = arith.constant 0 : index
    %26 = vector.load %arg9[%25, %c0_27] : memref<64x512xbf16, #tpu.memory_space<vmem>>, vector<8x512xbf16>
    %27 = arith.extf %26 : vector<8x512xbf16> to vector<8x512xf32>
    %c0_28 = arith.constant 0 : index
    %c0_29 = arith.constant 0 : index
    %28 = vector.load %arg10[%c0_28, %c0_29] : memref<8x128xbf16, #tpu.memory_space<vmem>>, vector<8x128xbf16>
    %c0_30 = arith.constant 0 : index
    %c0_31 = arith.constant 0 : index
    %29 = vector.load %arg3[%c0_30, %c0_31] : memref<128x512xbf16, #tpu.memory_space<vmem>>, vector<128x512xbf16>
    %cst_32 = arith.constant dense<0.000000e+00> : vector<8x512xf32>
    %30 = tpu.matmul %28, %29, %cst_32 {dimension_numbers = #tpu.dot_dimension_numbers<[1], [0], [0], [1], [0, 0, 1, 1], [], []>} : vector<8x128xbf16>, vector<128x512xbf16>, vector<8x512xf32> -> vector<8x512xf32>
    %31 = arith.addf %27, %30 : vector<8x512xf32>
    %c0_33 = arith.constant 0 : index
    %c0_34 = arith.constant 0 : index
    %32 = vector.load %arg12[%c0_33, %c0_34] : memref<8x128xf32, #tpu.memory_space<vmem>>, vector<8x128xf32>
    %33 = vector.extract_strided_slice %31 {offsets = [0, 0], sizes = [8, 128], strides = [1, 1]} : vector<8x512xf32> to vector<8x128xf32>
    %34 = arith.negf %33 : vector<8x128xf32>
    %35 = math.exp %34 : vector<8x128xf32>
    %cst_35 = arith.constant 1.000000e+00 : f32
    %36 = vector.broadcast %cst_35 : f32 to vector<8x128xf32>
    %37 = arith.addf %36, %35 : vector<8x128xf32>
    %38 = arith.divf %36, %37 : vector<8x128xf32>
    %39 = vector.extract_strided_slice %31 {offsets = [0, 128], sizes = [8, 128], strides = [1, 1]} : vector<8x512xf32> to vector<8x128xf32>
    %40 = arith.negf %39 : vector<8x128xf32>
    %41 = math.exp %40 : vector<8x128xf32>
    %cst_36 = arith.constant 1.000000e+00 : f32
    %42 = vector.broadcast %cst_36 : f32 to vector<8x128xf32>
    %43 = arith.addf %42, %41 : vector<8x128xf32>
    %44 = arith.divf %42, %43 : vector<8x128xf32>
    %45 = vector.extract_strided_slice %31 {offsets = [0, 256], sizes = [8, 128], strides = [1, 1]} : vector<8x512xf32> to vector<8x128xf32>
    %46 = math.tanh %45 : vector<8x128xf32>
    %47 = vector.extract_strided_slice %31 {offsets = [0, 384], sizes = [8, 128], strides = [1, 1]} : vector<8x512xf32> to vector<8x128xf32>
    %48 = arith.negf %47 : vector<8x128xf32>
    %49 = math.exp %48 : vector<8x128xf32>
    %cst_37 = arith.constant 1.000000e+00 : f32
    %50 = vector.broadcast %cst_37 : f32 to vector<8x128xf32>
    %51 = arith.addf %50, %49 : vector<8x128xf32>
    %52 = arith.divf %50, %51 : vector<8x128xf32>
    %53 = arith.mulf %44, %32 : vector<8x128xf32>
    %54 = arith.mulf %38, %46 : vector<8x128xf32>
    %55 = arith.addf %53, %54 : vector<8x128xf32>
    %56 = math.tanh %55 : vector<8x128xf32>
    %57 = arith.mulf %52, %56 : vector<8x128xf32>
    %c0_38 = arith.constant 0 : index
    %c0_39 = arith.constant 0 : index
    %58 = vector.load %arg12[%c0_38, %c0_39] : memref<8x128xf32, #tpu.memory_space<vmem>>, vector<8x128xf32>
    tpu.vector_store %arg12[%c0_38, %c0_39], %55 {strides = array<i32>} : memref<8x128xf32, #tpu.memory_space<vmem>>, vector<8x128xf32>,
    %59 = arith.truncf %57 : vector<8x128xf32> to vector<8x128xbf16>
    %c0_40 = arith.constant 0 : index
    %c0_41 = arith.constant 0 : index
    %60 = vector.load %arg10[%c0_40, %c0_41] : memref<8x128xbf16, #tpu.memory_space<vmem>>, vector<8x128xbf16>
    tpu.vector_store %arg10[%c0_40, %c0_41], %59 {strides = array<i32>} : memref<8x128xbf16, #tpu.memory_space<vmem>>, vector<8x128xbf16>,
    %c0_42 = arith.constant 0 : index
    %c0_43 = arith.constant 0 : index
    %61 = vector.load %arg5[%c0_42, %c0_43] : memref<128x512xbf16, #tpu.memory_space<vmem>>, vector<128x512xbf16>
    %cst_44 = arith.constant dense<0.000000e+00> : vector<8x512xf32>
    %62 = tpu.matmul %59, %61, %cst_44 {dimension_numbers = #tpu.dot_dimension_numbers<[1], [0], [0], [1], [0, 0, 1, 1], [], []>} : vector<8x128xbf16>, vector<128x512xbf16>, vector<8x512xf32> -> vector<8x512xf32>
    %63 = arith.addf %24, %62 : vector<8x512xf32>
    %64 = arith.addf %63, %19 : vector<8x512xf32>
    %c0_45 = arith.constant 0 : index
    %c0_46 = arith.constant 0 : index
    %65 = vector.load %arg13[%c0_45, %c0_46] : memref<8x128xf32, #tpu.memory_space<vmem>>, vector<8x128xf32>
    %66 = vector.extract_strided_slice %64 {offsets = [0, 0], sizes = [8, 128], strides = [1, 1]} : vector<8x512xf32> to vector<8x128xf32>
    %67 = arith.negf %66 : vector<8x128xf32>
    %68 = math.exp %67 : vector<8x128xf32>
    %cst_47 = arith.constant 1.000000e+00 : f32
    %69 = vector.broadcast %cst_47 : f32 to vector<8x128xf32>
    %70 = arith.addf %69, %68 : vector<8x128xf32>
    %71 = arith.divf %69, %70 : vector<8x128xf32>
    %72 = vector.extract_strided_slice %64 {offsets = [0, 128], sizes = [8, 128], strides = [1, 1]} : vector<8x512xf32> to vector<8x128xf32>
    %73 = arith.negf %72 : vector<8x128xf32>
    %74 = math.exp %73 : vector<8x128xf32>
    %cst_48 = arith.constant 1.000000e+00 : f32
    %75 = vector.broadcast %cst_48 : f32 to vector<8x128xf32>
    %76 = arith.addf %75, %74 : vector<8x128xf32>
    %77 = arith.divf %75, %76 : vector<8x128xf32>
    %78 = vector.extract_strided_slice %64 {offsets = [0, 256], sizes = [8, 128], strides = [1, 1]} : vector<8x512xf32> to vector<8x128xf32>
    %79 = math.tanh %78 : vector<8x128xf32>
    %80 = vector.extract_strided_slice %64 {offsets = [0, 384], sizes = [8, 128], strides = [1, 1]} : vector<8x512xf32> to vector<8x128xf32>
    %81 = arith.negf %80 : vector<8x128xf32>
    %82 = math.exp %81 : vector<8x128xf32>
    %cst_49 = arith.constant 1.000000e+00 : f32
    %83 = vector.broadcast %cst_49 : f32 to vector<8x128xf32>
    %84 = arith.addf %83, %82 : vector<8x128xf32>
    %85 = arith.divf %83, %84 : vector<8x128xf32>
    %86 = arith.mulf %77, %65 : vector<8x128xf32>
    %87 = arith.mulf %71, %79 : vector<8x128xf32>
    %88 = arith.addf %86, %87 : vector<8x128xf32>
    %89 = math.tanh %88 : vector<8x128xf32>
    %90 = arith.mulf %85, %89 : vector<8x128xf32>
    %c0_50 = arith.constant 0 : index
    %c0_51 = arith.constant 0 : index
    %91 = vector.load %arg13[%c0_50, %c0_51] : memref<8x128xf32, #tpu.memory_space<vmem>>, vector<8x128xf32>
    tpu.vector_store %arg13[%c0_50, %c0_51], %88 {strides = array<i32>} : memref<8x128xf32, #tpu.memory_space<vmem>>, vector<8x128xf32>,
    %92 = arith.truncf %90 : vector<8x128xf32> to vector<8x128xbf16>
    %c0_52 = arith.constant 0 : index
    %c0_53 = arith.constant 0 : index
    %93 = vector.load %arg11[%c0_52, %c0_53] : memref<8x128xbf16, #tpu.memory_space<vmem>>, vector<8x128xbf16>
    tpu.vector_store %arg11[%c0_52, %c0_53], %92 {strides = array<i32>} : memref<8x128xbf16, #tpu.memory_space<vmem>>, vector<8x128xbf16>,
    %c0_54 = arith.constant 0 : index
    %94 = arith.index_cast %21 : i32 to index
    %c0_55 = arith.constant 0 : index
    %95 = vector.load %arg8[%c0_54, %94, %c0_55] : memref<1x64x128xbf16, #tpu.memory_space<vmem>>, vector<1x8x128xbf16>
    %96 = vector.shape_cast %95 : vector<1x8x128xbf16> to vector<8x128xbf16>
    %97 = vector.shape_cast %92 : vector<8x128xbf16> to vector<1x8x128xbf16>
    tpu.vector_store %arg8[%c0_54, %94, %c0_55], %97 {strides = array<i32>} : memref<1x64x128xbf16, #tpu.memory_space<vmem>>, vector<1x8x128xbf16>,
    %c1_i32 = arith.constant 1 : i32
    %c8_i32_56 = arith.constant 8 : i32
    %98 = arith.muli %c1_i32, %c8_i32_56 : i32
    %99 = tpu.assume_multiple %98, 8 : i32
    %c0_57 = arith.constant 0 : index
    %c0_58 = arith.constant 0 : index
    %100 = vector.load %arg11[%c0_57, %c0_58] : memref<8x128xbf16, #tpu.memory_space<vmem>>, vector<8x128xbf16>
    %c0_59 = arith.constant 0 : index
    %c0_60 = arith.constant 0 : index
    %101 = vector.load %arg6[%c0_59, %c0_60] : memref<128x512xbf16, #tpu.memory_space<vmem>>, vector<128x512xbf16>
    %cst_61 = arith.constant dense<0.000000e+00> : vector<8x512xf32>
    %102 = tpu.matmul %100, %101, %cst_61 {dimension_numbers = #tpu.dot_dimension_numbers<[1], [0], [0], [1], [0, 0, 1, 1], [], []>} : vector<8x128xbf16>, vector<128x512xbf16>, vector<8x512xf32> -> vector<8x512xf32>
    %103 = arith.index_cast %99 : i32 to index
    %c0_62 = arith.constant 0 : index
    %104 = vector.load %arg9[%103, %c0_62] : memref<64x512xbf16, #tpu.memory_space<vmem>>, vector<8x512xbf16>
    %105 = arith.extf %104 : vector<8x512xbf16> to vector<8x512xf32>
    %c0_63 = arith.constant 0 : index
    %c0_64 = arith.constant 0 : index
    %106 = vector.load %arg10[%c0_63, %c0_64] : memref<8x128xbf16, #tpu.memory_space<vmem>>, vector<8x128xbf16>
    %c0_65 = arith.constant 0 : index
    %c0_66 = arith.constant 0 : index
    %107 = vector.load %arg3[%c0_65, %c0_66] : memref<128x512xbf16, #tpu.memory_space<vmem>>, vector<128x512xbf16>
    %cst_67 = arith.constant dense<0.000000e+00> : vector<8x512xf32>
    %108 = tpu.matmul %106, %107, %cst_67 {dimension_numbers = #tpu.dot_dimension_numbers<[1], [0], [0], [1], [0, 0, 1, 1], [], []>} : vector<8x128xbf16>, vector<128x512xbf16>, vector<8x512xf32> -> vector<8x512xf32>
    %109 = arith.addf %105, %108 : vector<8x512xf32>
    %c0_68 = arith.constant 0 : index
    %c0_69 = arith.constant 0 : index
    %110 = vector.load %arg12[%c0_68, %c0_69] : memref<8x128xf32, #tpu.memory_space<vmem>>, vector<8x128xf32>
    %111 = vector.extract_strided_slice %109 {offsets = [0, 0], sizes = [8, 128], strides = [1, 1]} : vector<8x512xf32> to vector<8x128xf32>
    %112 = arith.negf %111 : vector<8x128xf32>
    %113 = math.exp %112 : vector<8x128xf32>
    %cst_70 = arith.constant 1.000000e+00 : f32
    %114 = vector.broadcast %cst_70 : f32 to vector<8x128xf32>
    %115 = arith.addf %114, %113 : vector<8x128xf32>
    %116 = arith.divf %114, %115 : vector<8x128xf32>
    %117 = vector.extract_strided_slice %109 {offsets = [0, 128], sizes = [8, 128], strides = [1, 1]} : vector<8x512xf32> to vector<8x128xf32>
    %118 = arith.negf %117 : vector<8x128xf32>
    %119 = math.exp %118 : vector<8x128xf32>
    %cst_71 = arith.constant 1.000000e+00 : f32
    %120 = vector.broadcast %cst_71 : f32 to vector<8x128xf32>
    %121 = arith.addf %120, %119 : vector<8x128xf32>
    %122 = arith.divf %120, %121 : vector<8x128xf32>
    %123 = vector.extract_strided_slice %109 {offsets = [0, 256], sizes = [8, 128], strides = [1, 1]} : vector<8x512xf32> to vector<8x128xf32>
    %124 = math.tanh %123 : vector<8x128xf32>
    %125 = vector.extract_strided_slice %109 {offsets = [0, 384], sizes = [8, 128], strides = [1, 1]} : vector<8x512xf32> to vector<8x128xf32>
    %126 = arith.negf %125 : vector<8x128xf32>
    %127 = math.exp %126 : vector<8x128xf32>
    %cst_72 = arith.constant 1.000000e+00 : f32
    %128 = vector.broadcast %cst_72 : f32 to vector<8x128xf32>
    %129 = arith.addf %128, %127 : vector<8x128xf32>
    %130 = arith.divf %128, %129 : vector<8x128xf32>
    %131 = arith.mulf %122, %110 : vector<8x128xf32>
    %132 = arith.mulf %116, %124 : vector<8x128xf32>
    %133 = arith.addf %131, %132 : vector<8x128xf32>
    %134 = math.tanh %133 : vector<8x128xf32>
    %135 = arith.mulf %130, %134 : vector<8x128xf32>
    %c0_73 = arith.constant 0 : index
    %c0_74 = arith.constant 0 : index
    %136 = vector.load %arg12[%c0_73, %c0_74] : memref<8x128xf32, #tpu.memory_space<vmem>>, vector<8x128xf32>
    tpu.vector_store %arg12[%c0_73, %c0_74], %133 {strides = array<i32>} : memref<8x128xf32, #tpu.memory_space<vmem>>, vector<8x128xf32>,
    %137 = arith.truncf %135 : vector<8x128xf32> to vector<8x128xbf16>
    %c0_75 = arith.constant 0 : index
    %c0_76 = arith.constant 0 : index
    %138 = vector.load %arg10[%c0_75, %c0_76] : memref<8x128xbf16, #tpu.memory_space<vmem>>, vector<8x128xbf16>
    tpu.vector_store %arg10[%c0_75, %c0_76], %137 {strides = array<i32>} : memref<8x128xbf16, #tpu.memory_space<vmem>>, vector<8x128xbf16>,
    %c0_77 = arith.constant 0 : index
    %c0_78 = arith.constant 0 : index
    %139 = vector.load %arg5[%c0_77, %c0_78] : memref<128x512xbf16, #tpu.memory_space<vmem>>, vector<128x512xbf16>
    %cst_79 = arith.constant dense<0.000000e+00> : vector<8x512xf32>
    %140 = tpu.matmul %137, %139, %cst_79 {dimension_numbers = #tpu.dot_dimension_numbers<[1], [0], [0], [1], [0, 0, 1, 1], [], []>} : vector<8x128xbf16>, vector<128x512xbf16>, vector<8x512xf32> -> vector<8x512xf32>
    %141 = arith.addf %102, %140 : vector<8x512xf32>
    %142 = arith.addf %141, %19 : vector<8x512xf32>
    %c0_80 = arith.constant 0 : index
    %c0_81 = arith.constant 0 : index
    %143 = vector.load %arg13[%c0_80, %c0_81] : memref<8x128xf32, #tpu.memory_space<vmem>>, vector<8x128xf32>
    %144 = vector.extract_strided_slice %142 {offsets = [0, 0], sizes = [8, 128], strides = [1, 1]} : vector<8x512xf32> to vector<8x128xf32>
    %145 = arith.negf %144 : vector<8x128xf32>
    %146 = math.exp %145 : vector<8x128xf32>
    %cst_82 = arith.constant 1.000000e+00 : f32
    %147 = vector.broadcast %cst_82 : f32 to vector<8x128xf32>
    %148 = arith.addf %147, %146 : vector<8x128xf32>
    %149 = arith.divf %147, %148 : vector<8x128xf32>
    %150 = vector.extract_strided_slice %142 {offsets = [0, 128], sizes = [8, 128], strides = [1, 1]} : vector<8x512xf32> to vector<8x128xf32>
    %151 = arith.negf %150 : vector<8x128xf32>
    %152 = math.exp %151 : vector<8x128xf32>
    %cst_83 = arith.constant 1.000000e+00 : f32
    %153 = vector.broadcast %cst_83 : f32 to vector<8x128xf32>
    %154 = arith.addf %153, %152 : vector<8x128xf32>
    %155 = arith.divf %153, %154 : vector<8x128xf32>
    %156 = vector.extract_strided_slice %142 {offsets = [0, 256], sizes = [8, 128], strides = [1, 1]} : vector<8x512xf32> to vector<8x128xf32>
    %157 = math.tanh %156 : vector<8x128xf32>
    %158 = vector.extract_strided_slice %142 {offsets = [0, 384], sizes = [8, 128], strides = [1, 1]} : vector<8x512xf32> to vector<8x128xf32>
    %159 = arith.negf %158 : vector<8x128xf32>
    %160 = math.exp %159 : vector<8x128xf32>
    %cst_84 = arith.constant 1.000000e+00 : f32
    %161 = vector.broadcast %cst_84 : f32 to vector<8x128xf32>
    %162 = arith.addf %161, %160 : vector<8x128xf32>
    %163 = arith.divf %161, %162 : vector<8x128xf32>
    %164 = arith.mulf %155, %143 : vector<8x128xf32>
    %165 = arith.mulf %149, %157 : vector<8x128xf32>
    %166 = arith.addf %164, %165 : vector<8x128xf32>
    %167 = math.tanh %166 : vector<8x128xf32>
    %168 = arith.mulf %163, %167 : vector<8x128xf32>
    %c0_85 = arith.constant 0 : index
    %c0_86 = arith.constant 0 : index
    %169 = vector.load %arg13[%c0_85, %c0_86] : memref<8x128xf32, #tpu.memory_space<vmem>>, vector<8x128xf32>
    tpu.vector_store %arg13[%c0_85, %c0_86], %166 {strides = array<i32>} : memref<8x128xf32, #tpu.memory_space<vmem>>, vector<8x128xf32>,
    %170 = arith.truncf %168 : vector<8x128xf32> to vector<8x128xbf16>
    %c0_87 = arith.constant 0 : index
    %c0_88 = arith.constant 0 : index
    %171 = vector.load %arg11[%c0_87, %c0_88] : memref<8x128xbf16, #tpu.memory_space<vmem>>, vector<8x128xbf16>
    tpu.vector_store %arg11[%c0_87, %c0_88], %170 {strides = array<i32>} : memref<8x128xbf16, #tpu.memory_space<vmem>>, vector<8x128xbf16>,
    %c0_89 = arith.constant 0 : index
    %172 = arith.index_cast %99 : i32 to index
    %c0_90 = arith.constant 0 : index
    %173 = vector.load %arg8[%c0_89, %172, %c0_90] : memref<1x64x128xbf16, #tpu.memory_space<vmem>>, vector<1x8x128xbf16>
    %174 = vector.shape_cast %173 : vector<1x8x128xbf16> to vector<8x128xbf16>
    %175 = vector.shape_cast %170 : vector<8x128xbf16> to vector<1x8x128xbf16>
    tpu.vector_store %arg8[%c0_89, %172, %c0_90], %175 {strides = array<i32>} : memref<1x64x128xbf16, #tpu.memory_space<vmem>>, vector<1x8x128xbf16>,
    %c2_i32 = arith.constant 2 : i32
    %c8_i32_91 = arith.constant 8 : i32
    %176 = arith.muli %c2_i32, %c8_i32_91 : i32
    %177 = tpu.assume_multiple %176, 8 : i32
    %c0_92 = arith.constant 0 : index
    %c0_93 = arith.constant 0 : index
    %178 = vector.load %arg11[%c0_92, %c0_93] : memref<8x128xbf16, #tpu.memory_space<vmem>>, vector<8x128xbf16>
    %c0_94 = arith.constant 0 : index
    %c0_95 = arith.constant 0 : index
    %179 = vector.load %arg6[%c0_94, %c0_95] : memref<128x512xbf16, #tpu.memory_space<vmem>>, vector<128x512xbf16>
    %cst_96 = arith.constant dense<0.000000e+00> : vector<8x512xf32>
    %180 = tpu.matmul %178, %179, %cst_96 {dimension_numbers = #tpu.dot_dimension_numbers<[1], [0], [0], [1], [0, 0, 1, 1], [], []>} : vector<8x128xbf16>, vector<128x512xbf16>, vector<8x512xf32> -> vector<8x512xf32>
    %181 = arith.index_cast %177 : i32 to index
    %c0_97 = arith.constant 0 : index
    %182 = vector.load %arg9[%181, %c0_97] : memref<64x512xbf16, #tpu.memory_space<vmem>>, vector<8x512xbf16>
    %183 = arith.extf %182 : vector<8x512xbf16> to vector<8x512xf32>
    %c0_98 = arith.constant 0 : index
    %c0_99 = arith.constant 0 : index
    %184 = vector.load %arg10[%c0_98, %c0_99] : memref<8x128xbf16, #tpu.memory_space<vmem>>, vector<8x128xbf16>
    %c0_100 = arith.constant 0 : index
    %c0_101 = arith.constant 0 : index
    %185 = vector.load %arg3[%c0_100, %c0_101] : memref<128x512xbf16, #tpu.memory_space<vmem>>, vector<128x512xbf16>
    %cst_102 = arith.constant dense<0.000000e+00> : vector<8x512xf32>
    %186 = tpu.matmul %184, %185, %cst_102 {dimension_numbers = #tpu.dot_dimension_numbers<[1], [0], [0], [1], [0, 0, 1, 1], [], []>} : vector<8x128xbf16>, vector<128x512xbf16>, vector<8x512xf32> -> vector<8x512xf32>
    %187 = arith.addf %183, %186 : vector<8x512xf32>
    %c0_103 = arith.constant 0 : index
    %c0_104 = arith.constant 0 : index
    %188 = vector.load %arg12[%c0_103, %c0_104] : memref<8x128xf32, #tpu.memory_space<vmem>>, vector<8x128xf32>
    %189 = vector.extract_strided_slice %187 {offsets = [0, 0], sizes = [8, 128], strides = [1, 1]} : vector<8x512xf32> to vector<8x128xf32>
    %190 = arith.negf %189 : vector<8x128xf32>
    %191 = math.exp %190 : vector<8x128xf32>
    %cst_105 = arith.constant 1.000000e+00 : f32
    %192 = vector.broadcast %cst_105 : f32 to vector<8x128xf32>
    %193 = arith.addf %192, %191 : vector<8x128xf32>
    %194 = arith.divf %192, %193 : vector<8x128xf32>
    %195 = vector.extract_strided_slice %187 {offsets = [0, 128], sizes = [8, 128], strides = [1, 1]} : vector<8x512xf32> to vector<8x128xf32>
    %196 = arith.negf %195 : vector<8x128xf32>
    %197 = math.exp %196 : vector<8x128xf32>
    %cst_106 = arith.constant 1.000000e+00 : f32
    %198 = vector.broadcast %cst_106 : f32 to vector<8x128xf32>
    %199 = arith.addf %198, %197 : vector<8x128xf32>
    %200 = arith.divf %198, %199 : vector<8x128xf32>
    %201 = vector.extract_strided_slice %187 {offsets = [0, 256], sizes = [8, 128], strides = [1, 1]} : vector<8x512xf32> to vector<8x128xf32>
    %202 = math.tanh %201 : vector<8x128xf32>
    %203 = vector.extract_strided_slice %187 {offsets = [0, 384], sizes = [8, 128], strides = [1, 1]} : vector<8x512xf32> to vector<8x128xf32>
    %204 = arith.negf %203 : vector<8x128xf32>
    %205 = math.exp %204 : vector<8x128xf32>
    %cst_107 = arith.constant 1.000000e+00 : f32
    %206 = vector.broadcast %cst_107 : f32 to vector<8x128xf32>
    %207 = arith.addf %206, %205 : vector<8x128xf32>
    %208 = arith.divf %206, %207 : vector<8x128xf32>
    %209 = arith.mulf %200, %188 : vector<8x128xf32>
    %210 = arith.mulf %194, %202 : vector<8x128xf32>
    %211 = arith.addf %209, %210 : vector<8x128xf32>
    %212 = math.tanh %211 : vector<8x128xf32>
    %213 = arith.mulf %208, %212 : vector<8x128xf32>
    %c0_108 = arith.constant 0 : index
    %c0_109 = arith.constant 0 : index
    %214 = vector.load %arg12[%c0_108, %c0_109] : memref<8x128xf32, #tpu.memory_space<vmem>>, vector<8x128xf32>
    tpu.vector_store %arg12[%c0_108, %c0_109], %211 {strides = array<i32>} : memref<8x128xf32, #tpu.memory_space<vmem>>, vector<8x128xf32>,
    %215 = arith.truncf %213 : vector<8x128xf32> to vector<8x128xbf16>
    %c0_110 = arith.constant 0 : index
    %c0_111 = arith.constant 0 : index
    %216 = vector.load %arg10[%c0_110, %c0_111] : memref<8x128xbf16, #tpu.memory_space<vmem>>, vector<8x128xbf16>
    tpu.vector_store %arg10[%c0_110, %c0_111], %215 {strides = array<i32>} : memref<8x128xbf16, #tpu.memory_space<vmem>>, vector<8x128xbf16>,
    %c0_112 = arith.constant 0 : index
    %c0_113 = arith.constant 0 : index
    %217 = vector.load %arg5[%c0_112, %c0_113] : memref<128x512xbf16, #tpu.memory_space<vmem>>, vector<128x512xbf16>
    %cst_114 = arith.constant dense<0.000000e+00> : vector<8x512xf32>
    %218 = tpu.matmul %215, %217, %cst_114 {dimension_numbers = #tpu.dot_dimension_numbers<[1], [0], [0], [1], [0, 0, 1, 1], [], []>} : vector<8x128xbf16>, vector<128x512xbf16>, vector<8x512xf32> -> vector<8x512xf32>
    %219 = arith.addf %180, %218 : vector<8x512xf32>
    %220 = arith.addf %219, %19 : vector<8x512xf32>
    %c0_115 = arith.constant 0 : index
    %c0_116 = arith.constant 0 : index
    %221 = vector.load %arg13[%c0_115, %c0_116] : memref<8x128xf32, #tpu.memory_space<vmem>>, vector<8x128xf32>
    %222 = vector.extract_strided_slice %220 {offsets = [0, 0], sizes = [8, 128], strides = [1, 1]} : vector<8x512xf32> to vector<8x128xf32>
    %223 = arith.negf %222 : vector<8x128xf32>
    %224 = math.exp %223 : vector<8x128xf32>
    %cst_117 = arith.constant 1.000000e+00 : f32
    %225 = vector.broadcast %cst_117 : f32 to vector<8x128xf32>
    %226 = arith.addf %225, %224 : vector<8x128xf32>
    %227 = arith.divf %225, %226 : vector<8x128xf32>
    %228 = vector.extract_strided_slice %220 {offsets = [0, 128], sizes = [8, 128], strides = [1, 1]} : vector<8x512xf32> to vector<8x128xf32>
    %229 = arith.negf %228 : vector<8x128xf32>
    %230 = math.exp %229 : vector<8x128xf32>
    %cst_118 = arith.constant 1.000000e+00 : f32
    %231 = vector.broadcast %cst_118 : f32 to vector<8x128xf32>
    %232 = arith.addf %231, %230 : vector<8x128xf32>
    %233 = arith.divf %231, %232 : vector<8x128xf32>
    %234 = vector.extract_strided_slice %220 {offsets = [0, 256], sizes = [8, 128], strides = [1, 1]} : vector<8x512xf32> to vector<8x128xf32>
    %235 = math.tanh %234 : vector<8x128xf32>
    %236 = vector.extract_strided_slice %220 {offsets = [0, 384], sizes = [8, 128], strides = [1, 1]} : vector<8x512xf32> to vector<8x128xf32>
    %237 = arith.negf %236 : vector<8x128xf32>
    %238 = math.exp %237 : vector<8x128xf32>
    %cst_119 = arith.constant 1.000000e+00 : f32
    %239 = vector.broadcast %cst_119 : f32 to vector<8x128xf32>
    %240 = arith.addf %239, %238 : vector<8x128xf32>
    %241 = arith.divf %239, %240 : vector<8x128xf32>
    %242 = arith.mulf %233, %221 : vector<8x128xf32>
    %243 = arith.mulf %227, %235 : vector<8x128xf32>
    %244 = arith.addf %242, %243 : vector<8x128xf32>
    %245 = math.tanh %244 : vector<8x128xf32>
    %246 = arith.mulf %241, %245 : vector<8x128xf32>
    %c0_120 = arith.constant 0 : index
    %c0_121 = arith.constant 0 : index
    %247 = vector.load %arg13[%c0_120, %c0_121] : memref<8x128xf32, #tpu.memory_space<vmem>>, vector<8x128xf32>
    tpu.vector_store %arg13[%c0_120, %c0_121], %244 {strides = array<i32>} : memref<8x128xf32, #tpu.memory_space<vmem>>, vector<8x128xf32>,
    %248 = arith.truncf %246 : vector<8x128xf32> to vector<8x128xbf16>
    %c0_122 = arith.constant 0 : index
    %c0_123 = arith.constant 0 : index
    %249 = vector.load %arg11[%c0_122, %c0_123] : memref<8x128xbf16, #tpu.memory_space<vmem>>, vector<8x128xbf16>
    tpu.vector_store %arg11[%c0_122, %c0_123], %248 {strides = array<i32>} : memref<8x128xbf16, #tpu.memory_space<vmem>>, vector<8x128xbf16>,
    %c0_124 = arith.constant 0 : index
    %250 = arith.index_cast %177 : i32 to index
    %c0_125 = arith.constant 0 : index
    %251 = vector.load %arg8[%c0_124, %250, %c0_125] : memref<1x64x128xbf16, #tpu.memory_space<vmem>>, vector<1x8x128xbf16>
    %252 = vector.shape_cast %251 : vector<1x8x128xbf16> to vector<8x128xbf16>
    %253 = vector.shape_cast %248 : vector<8x128xbf16> to vector<1x8x128xbf16>
    tpu.vector_store %arg8[%c0_124, %250, %c0_125], %253 {strides = array<i32>} : memref<1x64x128xbf16, #tpu.memory_space<vmem>>, vector<1x8x128xbf16>,
    %c3_i32 = arith.constant 3 : i32
    %c8_i32_126 = arith.constant 8 : i32
    %254 = arith.muli %c3_i32, %c8_i32_126 : i32
    %255 = tpu.assume_multiple %254, 8 : i32
    %c0_127 = arith.constant 0 : index
    %c0_128 = arith.constant 0 : index
    %256 = vector.load %arg11[%c0_127, %c0_128] : memref<8x128xbf16, #tpu.memory_space<vmem>>, vector<8x128xbf16>
    %c0_129 = arith.constant 0 : index
    %c0_130 = arith.constant 0 : index
    %257 = vector.load %arg6[%c0_129, %c0_130] : memref<128x512xbf16, #tpu.memory_space<vmem>>, vector<128x512xbf16>
    %cst_131 = arith.constant dense<0.000000e+00> : vector<8x512xf32>
    %258 = tpu.matmul %256, %257, %cst_131 {dimension_numbers = #tpu.dot_dimension_numbers<[1], [0], [0], [1], [0, 0, 1, 1], [], []>} : vector<8x128xbf16>, vector<128x512xbf16>, vector<8x512xf32> -> vector<8x512xf32>
    %259 = arith.index_cast %255 : i32 to index
    %c0_132 = arith.constant 0 : index
    %260 = vector.load %arg9[%259, %c0_132] : memref<64x512xbf16, #tpu.memory_space<vmem>>, vector<8x512xbf16>
    %261 = arith.extf %260 : vector<8x512xbf16> to vector<8x512xf32>
    %c0_133 = arith.constant 0 : index
    %c0_134 = arith.constant 0 : index
    %262 = vector.load %arg10[%c0_133, %c0_134] : memref<8x128xbf16, #tpu.memory_space<vmem>>, vector<8x128xbf16>
    %c0_135 = arith.constant 0 : index
    %c0_136 = arith.constant 0 : index
    %263 = vector.load %arg3[%c0_135, %c0_136] : memref<128x512xbf16, #tpu.memory_space<vmem>>, vector<128x512xbf16>
    %cst_137 = arith.constant dense<0.000000e+00> : vector<8x512xf32>
    %264 = tpu.matmul %262, %263, %cst_137 {dimension_numbers = #tpu.dot_dimension_numbers<[1], [0], [0], [1], [0, 0, 1, 1], [], []>} : vector<8x128xbf16>, vector<128x512xbf16>, vector<8x512xf32> -> vector<8x512xf32>
    %265 = arith.addf %261, %264 : vector<8x512xf32>
    %c0_138 = arith.constant 0 : index
    %c0_139 = arith.constant 0 : index
    %266 = vector.load %arg12[%c0_138, %c0_139] : memref<8x128xf32, #tpu.memory_space<vmem>>, vector<8x128xf32>
    %267 = vector.extract_strided_slice %265 {offsets = [0, 0], sizes = [8, 128], strides = [1, 1]} : vector<8x512xf32> to vector<8x128xf32>
    %268 = arith.negf %267 : vector<8x128xf32>
    %269 = math.exp %268 : vector<8x128xf32>
    %cst_140 = arith.constant 1.000000e+00 : f32
    %270 = vector.broadcast %cst_140 : f32 to vector<8x128xf32>
    %271 = arith.addf %270, %269 : vector<8x128xf32>
    %272 = arith.divf %270, %271 : vector<8x128xf32>
    %273 = vector.extract_strided_slice %265 {offsets = [0, 128], sizes = [8, 128], strides = [1, 1]} : vector<8x512xf32> to vector<8x128xf32>
    %274 = arith.negf %273 : vector<8x128xf32>
    %275 = math.exp %274 : vector<8x128xf32>
    %cst_141 = arith.constant 1.000000e+00 : f32
    %276 = vector.broadcast %cst_141 : f32 to vector<8x128xf32>
    %277 = arith.addf %276, %275 : vector<8x128xf32>
    %278 = arith.divf %276, %277 : vector<8x128xf32>
    %279 = vector.extract_strided_slice %265 {offsets = [0, 256], sizes = [8, 128], strides = [1, 1]} : vector<8x512xf32> to vector<8x128xf32>
    %280 = math.tanh %279 : vector<8x128xf32>
    %281 = vector.extract_strided_slice %265 {offsets = [0, 384], sizes = [8, 128], strides = [1, 1]} : vector<8x512xf32> to vector<8x128xf32>
    %282 = arith.negf %281 : vector<8x128xf32>
    %283 = math.exp %282 : vector<8x128xf32>
    %cst_142 = arith.constant 1.000000e+00 : f32
    %284 = vector.broadcast %cst_142 : f32 to vector<8x128xf32>
    %285 = arith.addf %284, %283 : vector<8x128xf32>
    %286 = arith.divf %284, %285 : vector<8x128xf32>
    %287 = arith.mulf %278, %266 : vector<8x128xf32>
    %288 = arith.mulf %272, %280 : vector<8x128xf32>
    %289 = arith.addf %287, %288 : vector<8x128xf32>
    %290 = math.tanh %289 : vector<8x128xf32>
    %291 = arith.mulf %286, %290 : vector<8x128xf32>
    %c0_143 = arith.constant 0 : index
    %c0_144 = arith.constant 0 : index
    %292 = vector.load %arg12[%c0_143, %c0_144] : memref<8x128xf32, #tpu.memory_space<vmem>>, vector<8x128xf32>
    tpu.vector_store %arg12[%c0_143, %c0_144], %289 {strides = array<i32>} : memref<8x128xf32, #tpu.memory_space<vmem>>, vector<8x128xf32>,
    %293 = arith.truncf %291 : vector<8x128xf32> to vector<8x128xbf16>
    %c0_145 = arith.constant 0 : index
    %c0_146 = arith.constant 0 : index
    %294 = vector.load %arg10[%c0_145, %c0_146] : memref<8x128xbf16, #tpu.memory_space<vmem>>, vector<8x128xbf16>
    tpu.vector_store %arg10[%c0_145, %c0_146], %293 {strides = array<i32>} : memref<8x128xbf16, #tpu.memory_space<vmem>>, vector<8x128xbf16>,
    %c0_147 = arith.constant 0 : index
    %c0_148 = arith.constant 0 : index
    %295 = vector.load %arg5[%c0_147, %c0_148] : memref<128x512xbf16, #tpu.memory_space<vmem>>, vector<128x512xbf16>
    %cst_149 = arith.constant dense<0.000000e+00> : vector<8x512xf32>
    %296 = tpu.matmul %293, %295, %cst_149 {dimension_numbers = #tpu.dot_dimension_numbers<[1], [0], [0], [1], [0, 0, 1, 1], [], []>} : vector<8x128xbf16>, vector<128x512xbf16>, vector<8x512xf32> -> vector<8x512xf32>
    %297 = arith.addf %258, %296 : vector<8x512xf32>
    %298 = arith.addf %297, %19 : vector<8x512xf32>
    %c0_150 = arith.constant 0 : index
    %c0_151 = arith.constant 0 : index
    %299 = vector.load %arg13[%c0_150, %c0_151] : memref<8x128xf32, #tpu.memory_space<vmem>>, vector<8x128xf32>
    %300 = vector.extract_strided_slice %298 {offsets = [0, 0], sizes = [8, 128], strides = [1, 1]} : vector<8x512xf32> to vector<8x128xf32>
    %301 = arith.negf %300 : vector<8x128xf32>
    %302 = math.exp %301 : vector<8x128xf32>
    %cst_152 = arith.constant 1.000000e+00 : f32
    %303 = vector.broadcast %cst_152 : f32 to vector<8x128xf32>
    %304 = arith.addf %303, %302 : vector<8x128xf32>
    %305 = arith.divf %303, %304 : vector<8x128xf32>
    %306 = vector.extract_strided_slice %298 {offsets = [0, 128], sizes = [8, 128], strides = [1, 1]} : vector<8x512xf32> to vector<8x128xf32>
    %307 = arith.negf %306 : vector<8x128xf32>
    %308 = math.exp %307 : vector<8x128xf32>
    %cst_153 = arith.constant 1.000000e+00 : f32
    %309 = vector.broadcast %cst_153 : f32 to vector<8x128xf32>
    %310 = arith.addf %309, %308 : vector<8x128xf32>
    %311 = arith.divf %309, %310 : vector<8x128xf32>
    %312 = vector.extract_strided_slice %298 {offsets = [0, 256], sizes = [8, 128], strides = [1, 1]} : vector<8x512xf32> to vector<8x128xf32>
    %313 = math.tanh %312 : vector<8x128xf32>
    %314 = vector.extract_strided_slice %298 {offsets = [0, 384], sizes = [8, 128], strides = [1, 1]} : vector<8x512xf32> to vector<8x128xf32>
    %315 = arith.negf %314 : vector<8x128xf32>
    %316 = math.exp %315 : vector<8x128xf32>
    %cst_154 = arith.constant 1.000000e+00 : f32
    %317 = vector.broadcast %cst_154 : f32 to vector<8x128xf32>
    %318 = arith.addf %317, %316 : vector<8x128xf32>
    %319 = arith.divf %317, %318 : vector<8x128xf32>
    %320 = arith.mulf %311, %299 : vector<8x128xf32>
    %321 = arith.mulf %305, %313 : vector<8x128xf32>
    %322 = arith.addf %320, %321 : vector<8x128xf32>
    %323 = math.tanh %322 : vector<8x128xf32>
    %324 = arith.mulf %319, %323 : vector<8x128xf32>
    %c0_155 = arith.constant 0 : index
    %c0_156 = arith.constant 0 : index
    %325 = vector.load %arg13[%c0_155, %c0_156] : memref<8x128xf32, #tpu.memory_space<vmem>>, vector<8x128xf32>
    tpu.vector_store %arg13[%c0_155, %c0_156], %322 {strides = array<i32>} : memref<8x128xf32, #tpu.memory_space<vmem>>, vector<8x128xf32>,
    %326 = arith.truncf %324 : vector<8x128xf32> to vector<8x128xbf16>
    %c0_157 = arith.constant 0 : index
    %c0_158 = arith.constant 0 : index
    %327 = vector.load %arg11[%c0_157, %c0_158] : memref<8x128xbf16, #tpu.memory_space<vmem>>, vector<8x128xbf16>
    tpu.vector_store %arg11[%c0_157, %c0_158], %326 {strides = array<i32>} : memref<8x128xbf16, #tpu.memory_space<vmem>>, vector<8x128xbf16>,
    %c0_159 = arith.constant 0 : index
    %328 = arith.index_cast %255 : i32 to index
    %c0_160 = arith.constant 0 : index
    %329 = vector.load %arg8[%c0_159, %328, %c0_160] : memref<1x64x128xbf16, #tpu.memory_space<vmem>>, vector<1x8x128xbf16>
    %330 = vector.shape_cast %329 : vector<1x8x128xbf16> to vector<8x128xbf16>
    %331 = vector.shape_cast %326 : vector<8x128xbf16> to vector<1x8x128xbf16>
    tpu.vector_store %arg8[%c0_159, %328, %c0_160], %331 {strides = array<i32>} : memref<1x64x128xbf16, #tpu.memory_space<vmem>>, vector<1x8x128xbf16>,
    %c4_i32 = arith.constant 4 : i32
    %c8_i32_161 = arith.constant 8 : i32
    %332 = arith.muli %c4_i32, %c8_i32_161 : i32
    %333 = tpu.assume_multiple %332, 8 : i32
    %c0_162 = arith.constant 0 : index
    %c0_163 = arith.constant 0 : index
    %334 = vector.load %arg11[%c0_162, %c0_163] : memref<8x128xbf16, #tpu.memory_space<vmem>>, vector<8x128xbf16>
    %c0_164 = arith.constant 0 : index
    %c0_165 = arith.constant 0 : index
    %335 = vector.load %arg6[%c0_164, %c0_165] : memref<128x512xbf16, #tpu.memory_space<vmem>>, vector<128x512xbf16>
    %cst_166 = arith.constant dense<0.000000e+00> : vector<8x512xf32>
    %336 = tpu.matmul %334, %335, %cst_166 {dimension_numbers = #tpu.dot_dimension_numbers<[1], [0], [0], [1], [0, 0, 1, 1], [], []>} : vector<8x128xbf16>, vector<128x512xbf16>, vector<8x512xf32> -> vector<8x512xf32>
    %337 = arith.index_cast %333 : i32 to index
    %c0_167 = arith.constant 0 : index
    %338 = vector.load %arg9[%337, %c0_167] : memref<64x512xbf16, #tpu.memory_space<vmem>>, vector<8x512xbf16>
    %339 = arith.extf %338 : vector<8x512xbf16> to vector<8x512xf32>
    %c0_168 = arith.constant 0 : index
    %c0_169 = arith.constant 0 : index
    %340 = vector.load %arg10[%c0_168, %c0_169] : memref<8x128xbf16, #tpu.memory_space<vmem>>, vector<8x128xbf16>
    %c0_170 = arith.constant 0 : index
    %c0_171 = arith.constant 0 : index
    %341 = vector.load %arg3[%c0_170, %c0_171] : memref<128x512xbf16, #tpu.memory_space<vmem>>, vector<128x512xbf16>
    %cst_172 = arith.constant dense<0.000000e+00> : vector<8x512xf32>
    %342 = tpu.matmul %340, %341, %cst_172 {dimension_numbers = #tpu.dot_dimension_numbers<[1], [0], [0], [1], [0, 0, 1, 1], [], []>} : vector<8x128xbf16>, vector<128x512xbf16>, vector<8x512xf32> -> vector<8x512xf32>
    %343 = arith.addf %339, %342 : vector<8x512xf32>
    %c0_173 = arith.constant 0 : index
    %c0_174 = arith.constant 0 : index
    %344 = vector.load %arg12[%c0_173, %c0_174] : memref<8x128xf32, #tpu.memory_space<vmem>>, vector<8x128xf32>
    %345 = vector.extract_strided_slice %343 {offsets = [0, 0], sizes = [8, 128], strides = [1, 1]} : vector<8x512xf32> to vector<8x128xf32>
    %346 = arith.negf %345 : vector<8x128xf32>
    %347 = math.exp %346 : vector<8x128xf32>
    %cst_175 = arith.constant 1.000000e+00 : f32
    %348 = vector.broadcast %cst_175 : f32 to vector<8x128xf32>
    %349 = arith.addf %348, %347 : vector<8x128xf32>
    %350 = arith.divf %348, %349 : vector<8x128xf32>
    %351 = vector.extract_strided_slice %343 {offsets = [0, 128], sizes = [8, 128], strides = [1, 1]} : vector<8x512xf32> to vector<8x128xf32>
    %352 = arith.negf %351 : vector<8x128xf32>
    %353 = math.exp %352 : vector<8x128xf32>
    %cst_176 = arith.constant 1.000000e+00 : f32
    %354 = vector.broadcast %cst_176 : f32 to vector<8x128xf32>
    %355 = arith.addf %354, %353 : vector<8x128xf32>
    %356 = arith.divf %354, %355 : vector<8x128xf32>
    %357 = vector.extract_strided_slice %343 {offsets = [0, 256], sizes = [8, 128], strides = [1, 1]} : vector<8x512xf32> to vector<8x128xf32>
    %358 = math.tanh %357 : vector<8x128xf32>
    %359 = vector.extract_strided_slice %343 {offsets = [0, 384], sizes = [8, 128], strides = [1, 1]} : vector<8x512xf32> to vector<8x128xf32>
    %360 = arith.negf %359 : vector<8x128xf32>
    %361 = math.exp %360 : vector<8x128xf32>
    %cst_177 = arith.constant 1.000000e+00 : f32
    %362 = vector.broadcast %cst_177 : f32 to vector<8x128xf32>
    %363 = arith.addf %362, %361 : vector<8x128xf32>
    %364 = arith.divf %362, %363 : vector<8x128xf32>
    %365 = arith.mulf %356, %344 : vector<8x128xf32>
    %366 = arith.mulf %350, %358 : vector<8x128xf32>
    %367 = arith.addf %365, %366 : vector<8x128xf32>
    %368 = math.tanh %367 : vector<8x128xf32>
    %369 = arith.mulf %364, %368 : vector<8x128xf32>
    %c0_178 = arith.constant 0 : index
    %c0_179 = arith.constant 0 : index
    %370 = vector.load %arg12[%c0_178, %c0_179] : memref<8x128xf32, #tpu.memory_space<vmem>>, vector<8x128xf32>
    tpu.vector_store %arg12[%c0_178, %c0_179], %367 {strides = array<i32>} : memref<8x128xf32, #tpu.memory_space<vmem>>, vector<8x128xf32>,
    %371 = arith.truncf %369 : vector<8x128xf32> to vector<8x128xbf16>
    %c0_180 = arith.constant 0 : index
    %c0_181 = arith.constant 0 : index
    %372 = vector.load %arg10[%c0_180, %c0_181] : memref<8x128xbf16, #tpu.memory_space<vmem>>, vector<8x128xbf16>
    tpu.vector_store %arg10[%c0_180, %c0_181], %371 {strides = array<i32>} : memref<8x128xbf16, #tpu.memory_space<vmem>>, vector<8x128xbf16>,
    %c0_182 = arith.constant 0 : index
    %c0_183 = arith.constant 0 : index
    %373 = vector.load %arg5[%c0_182, %c0_183] : memref<128x512xbf16, #tpu.memory_space<vmem>>, vector<128x512xbf16>
    %cst_184 = arith.constant dense<0.000000e+00> : vector<8x512xf32>
    %374 = tpu.matmul %371, %373, %cst_184 {dimension_numbers = #tpu.dot_dimension_numbers<[1], [0], [0], [1], [0, 0, 1, 1], [], []>} : vector<8x128xbf16>, vector<128x512xbf16>, vector<8x512xf32> -> vector<8x512xf32>
    %375 = arith.addf %336, %374 : vector<8x512xf32>
    %376 = arith.addf %375, %19 : vector<8x512xf32>
    %c0_185 = arith.constant 0 : index
    %c0_186 = arith.constant 0 : index
    %377 = vector.load %arg13[%c0_185, %c0_186] : memref<8x128xf32, #tpu.memory_space<vmem>>, vector<8x128xf32>
    %378 = vector.extract_strided_slice %376 {offsets = [0, 0], sizes = [8, 128], strides = [1, 1]} : vector<8x512xf32> to vector<8x128xf32>
    %379 = arith.negf %378 : vector<8x128xf32>
    %380 = math.exp %379 : vector<8x128xf32>
    %cst_187 = arith.constant 1.000000e+00 : f32
    %381 = vector.broadcast %cst_187 : f32 to vector<8x128xf32>
    %382 = arith.addf %381, %380 : vector<8x128xf32>
    %383 = arith.divf %381, %382 : vector<8x128xf32>
    %384 = vector.extract_strided_slice %376 {offsets = [0, 128], sizes = [8, 128], strides = [1, 1]} : vector<8x512xf32> to vector<8x128xf32>
    %385 = arith.negf %384 : vector<8x128xf32>
    %386 = math.exp %385 : vector<8x128xf32>
    %cst_188 = arith.constant 1.000000e+00 : f32
    %387 = vector.broadcast %cst_188 : f32 to vector<8x128xf32>
    %388 = arith.addf %387, %386 : vector<8x128xf32>
    %389 = arith.divf %387, %388 : vector<8x128xf32>
    %390 = vector.extract_strided_slice %376 {offsets = [0, 256], sizes = [8, 128], strides = [1, 1]} : vector<8x512xf32> to vector<8x128xf32>
    %391 = math.tanh %390 : vector<8x128xf32>
    %392 = vector.extract_strided_slice %376 {offsets = [0, 384], sizes = [8, 128], strides = [1, 1]} : vector<8x512xf32> to vector<8x128xf32>
    %393 = arith.negf %392 : vector<8x128xf32>
    %394 = math.exp %393 : vector<8x128xf32>
    %cst_189 = arith.constant 1.000000e+00 : f32
    %395 = vector.broadcast %cst_189 : f32 to vector<8x128xf32>
    %396 = arith.addf %395, %394 : vector<8x128xf32>
    %397 = arith.divf %395, %396 : vector<8x128xf32>
    %398 = arith.mulf %389, %377 : vector<8x128xf32>
    %399 = arith.mulf %383, %391 : vector<8x128xf32>
    %400 = arith.addf %398, %399 : vector<8x128xf32>
    %401 = math.tanh %400 : vector<8x128xf32>
    %402 = arith.mulf %397, %401 : vector<8x128xf32>
    %c0_190 = arith.constant 0 : index
    %c0_191 = arith.constant 0 : index
    %403 = vector.load %arg13[%c0_190, %c0_191] : memref<8x128xf32, #tpu.memory_space<vmem>>, vector<8x128xf32>
    tpu.vector_store %arg13[%c0_190, %c0_191], %400 {strides = array<i32>} : memref<8x128xf32, #tpu.memory_space<vmem>>, vector<8x128xf32>,
    %404 = arith.truncf %402 : vector<8x128xf32> to vector<8x128xbf16>
    %c0_192 = arith.constant 0 : index
    %c0_193 = arith.constant 0 : index
    %405 = vector.load %arg11[%c0_192, %c0_193] : memref<8x128xbf16, #tpu.memory_space<vmem>>, vector<8x128xbf16>
    tpu.vector_store %arg11[%c0_192, %c0_193], %404 {strides = array<i32>} : memref<8x128xbf16, #tpu.memory_space<vmem>>, vector<8x128xbf16>,
    %c0_194 = arith.constant 0 : index
    %406 = arith.index_cast %333 : i32 to index
    %c0_195 = arith.constant 0 : index
    %407 = vector.load %arg8[%c0_194, %406, %c0_195] : memref<1x64x128xbf16, #tpu.memory_space<vmem>>, vector<1x8x128xbf16>
    %408 = vector.shape_cast %407 : vector<1x8x128xbf16> to vector<8x128xbf16>
    %409 = vector.shape_cast %404 : vector<8x128xbf16> to vector<1x8x128xbf16>
    tpu.vector_store %arg8[%c0_194, %406, %c0_195], %409 {strides = array<i32>} : memref<1x64x128xbf16, #tpu.memory_space<vmem>>, vector<1x8x128xbf16>,
    %c5_i32 = arith.constant 5 : i32
    %c8_i32_196 = arith.constant 8 : i32
    %410 = arith.muli %c5_i32, %c8_i32_196 : i32
    %411 = tpu.assume_multiple %410, 8 : i32
    %c0_197 = arith.constant 0 : index
    %c0_198 = arith.constant 0 : index
    %412 = vector.load %arg11[%c0_197, %c0_198] : memref<8x128xbf16, #tpu.memory_space<vmem>>, vector<8x128xbf16>
    %c0_199 = arith.constant 0 : index
    %c0_200 = arith.constant 0 : index
    %413 = vector.load %arg6[%c0_199, %c0_200] : memref<128x512xbf16, #tpu.memory_space<vmem>>, vector<128x512xbf16>
    %cst_201 = arith.constant dense<0.000000e+00> : vector<8x512xf32>
    %414 = tpu.matmul %412, %413, %cst_201 {dimension_numbers = #tpu.dot_dimension_numbers<[1], [0], [0], [1], [0, 0, 1, 1], [], []>} : vector<8x128xbf16>, vector<128x512xbf16>, vector<8x512xf32> -> vector<8x512xf32>
    %415 = arith.index_cast %411 : i32 to index
    %c0_202 = arith.constant 0 : index
    %416 = vector.load %arg9[%415, %c0_202] : memref<64x512xbf16, #tpu.memory_space<vmem>>, vector<8x512xbf16>
    %417 = arith.extf %416 : vector<8x512xbf16> to vector<8x512xf32>
    %c0_203 = arith.constant 0 : index
    %c0_204 = arith.constant 0 : index
    %418 = vector.load %arg10[%c0_203, %c0_204] : memref<8x128xbf16, #tpu.memory_space<vmem>>, vector<8x128xbf16>
    %c0_205 = arith.constant 0 : index
    %c0_206 = arith.constant 0 : index
    %419 = vector.load %arg3[%c0_205, %c0_206] : memref<128x512xbf16, #tpu.memory_space<vmem>>, vector<128x512xbf16>
    %cst_207 = arith.constant dense<0.000000e+00> : vector<8x512xf32>
    %420 = tpu.matmul %418, %419, %cst_207 {dimension_numbers = #tpu.dot_dimension_numbers<[1], [0], [0], [1], [0, 0, 1, 1], [], []>} : vector<8x128xbf16>, vector<128x512xbf16>, vector<8x512xf32> -> vector<8x512xf32>
    %421 = arith.addf %417, %420 : vector<8x512xf32>
    %c0_208 = arith.constant 0 : index
    %c0_209 = arith.constant 0 : index
    %422 = vector.load %arg12[%c0_208, %c0_209] : memref<8x128xf32, #tpu.memory_space<vmem>>, vector<8x128xf32>
    %423 = vector.extract_strided_slice %421 {offsets = [0, 0], sizes = [8, 128], strides = [1, 1]} : vector<8x512xf32> to vector<8x128xf32>
    %424 = arith.negf %423 : vector<8x128xf32>
    %425 = math.exp %424 : vector<8x128xf32>
    %cst_210 = arith.constant 1.000000e+00 : f32
    %426 = vector.broadcast %cst_210 : f32 to vector<8x128xf32>
    %427 = arith.addf %426, %425 : vector<8x128xf32>
    %428 = arith.divf %426, %427 : vector<8x128xf32>
    %429 = vector.extract_strided_slice %421 {offsets = [0, 128], sizes = [8, 128], strides = [1, 1]} : vector<8x512xf32> to vector<8x128xf32>
    %430 = arith.negf %429 : vector<8x128xf32>
    %431 = math.exp %430 : vector<8x128xf32>
    %cst_211 = arith.constant 1.000000e+00 : f32
    %432 = vector.broadcast %cst_211 : f32 to vector<8x128xf32>
    %433 = arith.addf %432, %431 : vector<8x128xf32>
    %434 = arith.divf %432, %433 : vector<8x128xf32>
    %435 = vector.extract_strided_slice %421 {offsets = [0, 256], sizes = [8, 128], strides = [1, 1]} : vector<8x512xf32> to vector<8x128xf32>
    %436 = math.tanh %435 : vector<8x128xf32>
    %437 = vector.extract_strided_slice %421 {offsets = [0, 384], sizes = [8, 128], strides = [1, 1]} : vector<8x512xf32> to vector<8x128xf32>
    %438 = arith.negf %437 : vector<8x128xf32>
    %439 = math.exp %438 : vector<8x128xf32>
    %cst_212 = arith.constant 1.000000e+00 : f32
    %440 = vector.broadcast %cst_212 : f32 to vector<8x128xf32>
    %441 = arith.addf %440, %439 : vector<8x128xf32>
    %442 = arith.divf %440, %441 : vector<8x128xf32>
    %443 = arith.mulf %434, %422 : vector<8x128xf32>
    %444 = arith.mulf %428, %436 : vector<8x128xf32>
    %445 = arith.addf %443, %444 : vector<8x128xf32>
    %446 = math.tanh %445 : vector<8x128xf32>
    %447 = arith.mulf %442, %446 : vector<8x128xf32>
    %c0_213 = arith.constant 0 : index
    %c0_214 = arith.constant 0 : index
    %448 = vector.load %arg12[%c0_213, %c0_214] : memref<8x128xf32, #tpu.memory_space<vmem>>, vector<8x128xf32>
    tpu.vector_store %arg12[%c0_213, %c0_214], %445 {strides = array<i32>} : memref<8x128xf32, #tpu.memory_space<vmem>>, vector<8x128xf32>,
    %449 = arith.truncf %447 : vector<8x128xf32> to vector<8x128xbf16>
    %c0_215 = arith.constant 0 : index
    %c0_216 = arith.constant 0 : index
    %450 = vector.load %arg10[%c0_215, %c0_216] : memref<8x128xbf16, #tpu.memory_space<vmem>>, vector<8x128xbf16>
    tpu.vector_store %arg10[%c0_215, %c0_216], %449 {strides = array<i32>} : memref<8x128xbf16, #tpu.memory_space<vmem>>, vector<8x128xbf16>,
    %c0_217 = arith.constant 0 : index
    %c0_218 = arith.constant 0 : index
    %451 = vector.load %arg5[%c0_217, %c0_218] : memref<128x512xbf16, #tpu.memory_space<vmem>>, vector<128x512xbf16>
    %cst_219 = arith.constant dense<0.000000e+00> : vector<8x512xf32>
    %452 = tpu.matmul %449, %451, %cst_219 {dimension_numbers = #tpu.dot_dimension_numbers<[1], [0], [0], [1], [0, 0, 1, 1], [], []>} : vector<8x128xbf16>, vector<128x512xbf16>, vector<8x512xf32> -> vector<8x512xf32>
    %453 = arith.addf %414, %452 : vector<8x512xf32>
    %454 = arith.addf %453, %19 : vector<8x512xf32>
    %c0_220 = arith.constant 0 : index
    %c0_221 = arith.constant 0 : index
    %455 = vector.load %arg13[%c0_220, %c0_221] : memref<8x128xf32, #tpu.memory_space<vmem>>, vector<8x128xf32>
    %456 = vector.extract_strided_slice %454 {offsets = [0, 0], sizes = [8, 128], strides = [1, 1]} : vector<8x512xf32> to vector<8x128xf32>
    %457 = arith.negf %456 : vector<8x128xf32>
    %458 = math.exp %457 : vector<8x128xf32>
    %cst_222 = arith.constant 1.000000e+00 : f32
    %459 = vector.broadcast %cst_222 : f32 to vector<8x128xf32>
    %460 = arith.addf %459, %458 : vector<8x128xf32>
    %461 = arith.divf %459, %460 : vector<8x128xf32>
    %462 = vector.extract_strided_slice %454 {offsets = [0, 128], sizes = [8, 128], strides = [1, 1]} : vector<8x512xf32> to vector<8x128xf32>
    %463 = arith.negf %462 : vector<8x128xf32>
    %464 = math.exp %463 : vector<8x128xf32>
    %cst_223 = arith.constant 1.000000e+00 : f32
    %465 = vector.broadcast %cst_223 : f32 to vector<8x128xf32>
    %466 = arith.addf %465, %464 : vector<8x128xf32>
    %467 = arith.divf %465, %466 : vector<8x128xf32>
    %468 = vector.extract_strided_slice %454 {offsets = [0, 256], sizes = [8, 128], strides = [1, 1]} : vector<8x512xf32> to vector<8x128xf32>
    %469 = math.tanh %468 : vector<8x128xf32>
    %470 = vector.extract_strided_slice %454 {offsets = [0, 384], sizes = [8, 128], strides = [1, 1]} : vector<8x512xf32> to vector<8x128xf32>
    %471 = arith.negf %470 : vector<8x128xf32>
    %472 = math.exp %471 : vector<8x128xf32>
    %cst_224 = arith.constant 1.000000e+00 : f32
    %473 = vector.broadcast %cst_224 : f32 to vector<8x128xf32>
    %474 = arith.addf %473, %472 : vector<8x128xf32>
    %475 = arith.divf %473, %474 : vector<8x128xf32>
    %476 = arith.mulf %467, %455 : vector<8x128xf32>
    %477 = arith.mulf %461, %469 : vector<8x128xf32>
    %478 = arith.addf %476, %477 : vector<8x128xf32>
    %479 = math.tanh %478 : vector<8x128xf32>
    %480 = arith.mulf %475, %479 : vector<8x128xf32>
    %c0_225 = arith.constant 0 : index
    %c0_226 = arith.constant 0 : index
    %481 = vector.load %arg13[%c0_225, %c0_226] : memref<8x128xf32, #tpu.memory_space<vmem>>, vector<8x128xf32>
    tpu.vector_store %arg13[%c0_225, %c0_226], %478 {strides = array<i32>} : memref<8x128xf32, #tpu.memory_space<vmem>>, vector<8x128xf32>,
    %482 = arith.truncf %480 : vector<8x128xf32> to vector<8x128xbf16>
    %c0_227 = arith.constant 0 : index
    %c0_228 = arith.constant 0 : index
    %483 = vector.load %arg11[%c0_227, %c0_228] : memref<8x128xbf16, #tpu.memory_space<vmem>>, vector<8x128xbf16>
    tpu.vector_store %arg11[%c0_227, %c0_228], %482 {strides = array<i32>} : memref<8x128xbf16, #tpu.memory_space<vmem>>, vector<8x128xbf16>,
    %c0_229 = arith.constant 0 : index
    %484 = arith.index_cast %411 : i32 to index
    %c0_230 = arith.constant 0 : index
    %485 = vector.load %arg8[%c0_229, %484, %c0_230] : memref<1x64x128xbf16, #tpu.memory_space<vmem>>, vector<1x8x128xbf16>
    %486 = vector.shape_cast %485 : vector<1x8x128xbf16> to vector<8x128xbf16>
    %487 = vector.shape_cast %482 : vector<8x128xbf16> to vector<1x8x128xbf16>
    tpu.vector_store %arg8[%c0_229, %484, %c0_230], %487 {strides = array<i32>} : memref<1x64x128xbf16, #tpu.memory_space<vmem>>, vector<1x8x128xbf16>,
    %c6_i32 = arith.constant 6 : i32
    %c8_i32_231 = arith.constant 8 : i32
    %488 = arith.muli %c6_i32, %c8_i32_231 : i32
    %489 = tpu.assume_multiple %488, 8 : i32
    %c0_232 = arith.constant 0 : index
    %c0_233 = arith.constant 0 : index
    %490 = vector.load %arg11[%c0_232, %c0_233] : memref<8x128xbf16, #tpu.memory_space<vmem>>, vector<8x128xbf16>
    %c0_234 = arith.constant 0 : index
    %c0_235 = arith.constant 0 : index
    %491 = vector.load %arg6[%c0_234, %c0_235] : memref<128x512xbf16, #tpu.memory_space<vmem>>, vector<128x512xbf16>
    %cst_236 = arith.constant dense<0.000000e+00> : vector<8x512xf32>
    %492 = tpu.matmul %490, %491, %cst_236 {dimension_numbers = #tpu.dot_dimension_numbers<[1], [0], [0], [1], [0, 0, 1, 1], [], []>} : vector<8x128xbf16>, vector<128x512xbf16>, vector<8x512xf32> -> vector<8x512xf32>
    %493 = arith.index_cast %489 : i32 to index
    %c0_237 = arith.constant 0 : index
    %494 = vector.load %arg9[%493, %c0_237] : memref<64x512xbf16, #tpu.memory_space<vmem>>, vector<8x512xbf16>
    %495 = arith.extf %494 : vector<8x512xbf16> to vector<8x512xf32>
    %c0_238 = arith.constant 0 : index
    %c0_239 = arith.constant 0 : index
    %496 = vector.load %arg10[%c0_238, %c0_239] : memref<8x128xbf16, #tpu.memory_space<vmem>>, vector<8x128xbf16>
    %c0_240 = arith.constant 0 : index
    %c0_241 = arith.constant 0 : index
    %497 = vector.load %arg3[%c0_240, %c0_241] : memref<128x512xbf16, #tpu.memory_space<vmem>>, vector<128x512xbf16>
    %cst_242 = arith.constant dense<0.000000e+00> : vector<8x512xf32>
    %498 = tpu.matmul %496, %497, %cst_242 {dimension_numbers = #tpu.dot_dimension_numbers<[1], [0], [0], [1], [0, 0, 1, 1], [], []>} : vector<8x128xbf16>, vector<128x512xbf16>, vector<8x512xf32> -> vector<8x512xf32>
    %499 = arith.addf %495, %498 : vector<8x512xf32>
    %c0_243 = arith.constant 0 : index
    %c0_244 = arith.constant 0 : index
    %500 = vector.load %arg12[%c0_243, %c0_244] : memref<8x128xf32, #tpu.memory_space<vmem>>, vector<8x128xf32>
    %501 = vector.extract_strided_slice %499 {offsets = [0, 0], sizes = [8, 128], strides = [1, 1]} : vector<8x512xf32> to vector<8x128xf32>
    %502 = arith.negf %501 : vector<8x128xf32>
    %503 = math.exp %502 : vector<8x128xf32>
    %cst_245 = arith.constant 1.000000e+00 : f32
    %504 = vector.broadcast %cst_245 : f32 to vector<8x128xf32>
    %505 = arith.addf %504, %503 : vector<8x128xf32>
    %506 = arith.divf %504, %505 : vector<8x128xf32>
    %507 = vector.extract_strided_slice %499 {offsets = [0, 128], sizes = [8, 128], strides = [1, 1]} : vector<8x512xf32> to vector<8x128xf32>
    %508 = arith.negf %507 : vector<8x128xf32>
    %509 = math.exp %508 : vector<8x128xf32>
    %cst_246 = arith.constant 1.000000e+00 : f32
    %510 = vector.broadcast %cst_246 : f32 to vector<8x128xf32>
    %511 = arith.addf %510, %509 : vector<8x128xf32>
    %512 = arith.divf %510, %511 : vector<8x128xf32>
    %513 = vector.extract_strided_slice %499 {offsets = [0, 256], sizes = [8, 128], strides = [1, 1]} : vector<8x512xf32> to vector<8x128xf32>
    %514 = math.tanh %513 : vector<8x128xf32>
    %515 = vector.extract_strided_slice %499 {offsets = [0, 384], sizes = [8, 128], strides = [1, 1]} : vector<8x512xf32> to vector<8x128xf32>
    %516 = arith.negf %515 : vector<8x128xf32>
    %517 = math.exp %516 : vector<8x128xf32>
    %cst_247 = arith.constant 1.000000e+00 : f32
    %518 = vector.broadcast %cst_247 : f32 to vector<8x128xf32>
    %519 = arith.addf %518, %517 : vector<8x128xf32>
    %520 = arith.divf %518, %519 : vector<8x128xf32>
    %521 = arith.mulf %512, %500 : vector<8x128xf32>
    %522 = arith.mulf %506, %514 : vector<8x128xf32>
    %523 = arith.addf %521, %522 : vector<8x128xf32>
    %524 = math.tanh %523 : vector<8x128xf32>
    %525 = arith.mulf %520, %524 : vector<8x128xf32>
    %c0_248 = arith.constant 0 : index
    %c0_249 = arith.constant 0 : index
    %526 = vector.load %arg12[%c0_248, %c0_249] : memref<8x128xf32, #tpu.memory_space<vmem>>, vector<8x128xf32>
    tpu.vector_store %arg12[%c0_248, %c0_249], %523 {strides = array<i32>} : memref<8x128xf32, #tpu.memory_space<vmem>>, vector<8x128xf32>,
    %527 = arith.truncf %525 : vector<8x128xf32> to vector<8x128xbf16>
    %c0_250 = arith.constant 0 : index
    %c0_251 = arith.constant 0 : index
    %528 = vector.load %arg10[%c0_250, %c0_251] : memref<8x128xbf16, #tpu.memory_space<vmem>>, vector<8x128xbf16>
    tpu.vector_store %arg10[%c0_250, %c0_251], %527 {strides = array<i32>} : memref<8x128xbf16, #tpu.memory_space<vmem>>, vector<8x128xbf16>,
    %c0_252 = arith.constant 0 : index
    %c0_253 = arith.constant 0 : index
    %529 = vector.load %arg5[%c0_252, %c0_253] : memref<128x512xbf16, #tpu.memory_space<vmem>>, vector<128x512xbf16>
    %cst_254 = arith.constant dense<0.000000e+00> : vector<8x512xf32>
    %530 = tpu.matmul %527, %529, %cst_254 {dimension_numbers = #tpu.dot_dimension_numbers<[1], [0], [0], [1], [0, 0, 1, 1], [], []>} : vector<8x128xbf16>, vector<128x512xbf16>, vector<8x512xf32> -> vector<8x512xf32>
    %531 = arith.addf %492, %530 : vector<8x512xf32>
    %532 = arith.addf %531, %19 : vector<8x512xf32>
    %c0_255 = arith.constant 0 : index
    %c0_256 = arith.constant 0 : index
    %533 = vector.load %arg13[%c0_255, %c0_256] : memref<8x128xf32, #tpu.memory_space<vmem>>, vector<8x128xf32>
    %534 = vector.extract_strided_slice %532 {offsets = [0, 0], sizes = [8, 128], strides = [1, 1]} : vector<8x512xf32> to vector<8x128xf32>
    %535 = arith.negf %534 : vector<8x128xf32>
    %536 = math.exp %535 : vector<8x128xf32>
    %cst_257 = arith.constant 1.000000e+00 : f32
    %537 = vector.broadcast %cst_257 : f32 to vector<8x128xf32>
    %538 = arith.addf %537, %536 : vector<8x128xf32>
    %539 = arith.divf %537, %538 : vector<8x128xf32>
    %540 = vector.extract_strided_slice %532 {offsets = [0, 128], sizes = [8, 128], strides = [1, 1]} : vector<8x512xf32> to vector<8x128xf32>
    %541 = arith.negf %540 : vector<8x128xf32>
    %542 = math.exp %541 : vector<8x128xf32>
    %cst_258 = arith.constant 1.000000e+00 : f32
    %543 = vector.broadcast %cst_258 : f32 to vector<8x128xf32>
    %544 = arith.addf %543, %542 : vector<8x128xf32>
    %545 = arith.divf %543, %544 : vector<8x128xf32>
    %546 = vector.extract_strided_slice %532 {offsets = [0, 256], sizes = [8, 128], strides = [1, 1]} : vector<8x512xf32> to vector<8x128xf32>
    %547 = math.tanh %546 : vector<8x128xf32>
    %548 = vector.extract_strided_slice %532 {offsets = [0, 384], sizes = [8, 128], strides = [1, 1]} : vector<8x512xf32> to vector<8x128xf32>
    %549 = arith.negf %548 : vector<8x128xf32>
    %550 = math.exp %549 : vector<8x128xf32>
    %cst_259 = arith.constant 1.000000e+00 : f32
    %551 = vector.broadcast %cst_259 : f32 to vector<8x128xf32>
    %552 = arith.addf %551, %550 : vector<8x128xf32>
    %553 = arith.divf %551, %552 : vector<8x128xf32>
    %554 = arith.mulf %545, %533 : vector<8x128xf32>
    %555 = arith.mulf %539, %547 : vector<8x128xf32>
    %556 = arith.addf %554, %555 : vector<8x128xf32>
    %557 = math.tanh %556 : vector<8x128xf32>
    %558 = arith.mulf %553, %557 : vector<8x128xf32>
    %c0_260 = arith.constant 0 : index
    %c0_261 = arith.constant 0 : index
    %559 = vector.load %arg13[%c0_260, %c0_261] : memref<8x128xf32, #tpu.memory_space<vmem>>, vector<8x128xf32>
    tpu.vector_store %arg13[%c0_260, %c0_261], %556 {strides = array<i32>} : memref<8x128xf32, #tpu.memory_space<vmem>>, vector<8x128xf32>,
    %560 = arith.truncf %558 : vector<8x128xf32> to vector<8x128xbf16>
    %c0_262 = arith.constant 0 : index
    %c0_263 = arith.constant 0 : index
    %561 = vector.load %arg11[%c0_262, %c0_263] : memref<8x128xbf16, #tpu.memory_space<vmem>>, vector<8x128xbf16>
    tpu.vector_store %arg11[%c0_262, %c0_263], %560 {strides = array<i32>} : memref<8x128xbf16, #tpu.memory_space<vmem>>, vector<8x128xbf16>,
    %c0_264 = arith.constant 0 : index
    %562 = arith.index_cast %489 : i32 to index
    %c0_265 = arith.constant 0 : index
    %563 = vector.load %arg8[%c0_264, %562, %c0_265] : memref<1x64x128xbf16, #tpu.memory_space<vmem>>, vector<1x8x128xbf16>
    %564 = vector.shape_cast %563 : vector<1x8x128xbf16> to vector<8x128xbf16>
    %565 = vector.shape_cast %560 : vector<8x128xbf16> to vector<1x8x128xbf16>
    tpu.vector_store %arg8[%c0_264, %562, %c0_265], %565 {strides = array<i32>} : memref<1x64x128xbf16, #tpu.memory_space<vmem>>, vector<1x8x128xbf16>,
    %c7_i32 = arith.constant 7 : i32
    %c8_i32_266 = arith.constant 8 : i32
    %566 = arith.muli %c7_i32, %c8_i32_266 : i32
    %567 = tpu.assume_multiple %566, 8 : i32
    %c0_267 = arith.constant 0 : index
    %c0_268 = arith.constant 0 : index
    %568 = vector.load %arg11[%c0_267, %c0_268] : memref<8x128xbf16, #tpu.memory_space<vmem>>, vector<8x128xbf16>
    %c0_269 = arith.constant 0 : index
    %c0_270 = arith.constant 0 : index
    %569 = vector.load %arg6[%c0_269, %c0_270] : memref<128x512xbf16, #tpu.memory_space<vmem>>, vector<128x512xbf16>
    %cst_271 = arith.constant dense<0.000000e+00> : vector<8x512xf32>
    %570 = tpu.matmul %568, %569, %cst_271 {dimension_numbers = #tpu.dot_dimension_numbers<[1], [0], [0], [1], [0, 0, 1, 1], [], []>} : vector<8x128xbf16>, vector<128x512xbf16>, vector<8x512xf32> -> vector<8x512xf32>
    %571 = arith.index_cast %567 : i32 to index
    %c0_272 = arith.constant 0 : index
    %572 = vector.load %arg9[%571, %c0_272] : memref<64x512xbf16, #tpu.memory_space<vmem>>, vector<8x512xbf16>
    %573 = arith.extf %572 : vector<8x512xbf16> to vector<8x512xf32>
    %c0_273 = arith.constant 0 : index
    %c0_274 = arith.constant 0 : index
    %574 = vector.load %arg10[%c0_273, %c0_274] : memref<8x128xbf16, #tpu.memory_space<vmem>>, vector<8x128xbf16>
    %c0_275 = arith.constant 0 : index
    %c0_276 = arith.constant 0 : index
    %575 = vector.load %arg3[%c0_275, %c0_276] : memref<128x512xbf16, #tpu.memory_space<vmem>>, vector<128x512xbf16>
    %cst_277 = arith.constant dense<0.000000e+00> : vector<8x512xf32>
    %576 = tpu.matmul %574, %575, %cst_277 {dimension_numbers = #tpu.dot_dimension_numbers<[1], [0], [0], [1], [0, 0, 1, 1], [], []>} : vector<8x128xbf16>, vector<128x512xbf16>, vector<8x512xf32> -> vector<8x512xf32>
    %577 = arith.addf %573, %576 : vector<8x512xf32>
    %c0_278 = arith.constant 0 : index
    %c0_279 = arith.constant 0 : index
    %578 = vector.load %arg12[%c0_278, %c0_279] : memref<8x128xf32, #tpu.memory_space<vmem>>, vector<8x128xf32>
    %579 = vector.extract_strided_slice %577 {offsets = [0, 0], sizes = [8, 128], strides = [1, 1]} : vector<8x512xf32> to vector<8x128xf32>
    %580 = arith.negf %579 : vector<8x128xf32>
    %581 = math.exp %580 : vector<8x128xf32>
    %cst_280 = arith.constant 1.000000e+00 : f32
    %582 = vector.broadcast %cst_280 : f32 to vector<8x128xf32>
    %583 = arith.addf %582, %581 : vector<8x128xf32>
    %584 = arith.divf %582, %583 : vector<8x128xf32>
    %585 = vector.extract_strided_slice %577 {offsets = [0, 128], sizes = [8, 128], strides = [1, 1]} : vector<8x512xf32> to vector<8x128xf32>
    %586 = arith.negf %585 : vector<8x128xf32>
    %587 = math.exp %586 : vector<8x128xf32>
    %cst_281 = arith.constant 1.000000e+00 : f32
    %588 = vector.broadcast %cst_281 : f32 to vector<8x128xf32>
    %589 = arith.addf %588, %587 : vector<8x128xf32>
    %590 = arith.divf %588, %589 : vector<8x128xf32>
    %591 = vector.extract_strided_slice %577 {offsets = [0, 256], sizes = [8, 128], strides = [1, 1]} : vector<8x512xf32> to vector<8x128xf32>
    %592 = math.tanh %591 : vector<8x128xf32>
    %593 = vector.extract_strided_slice %577 {offsets = [0, 384], sizes = [8, 128], strides = [1, 1]} : vector<8x512xf32> to vector<8x128xf32>
    %594 = arith.negf %593 : vector<8x128xf32>
    %595 = math.exp %594 : vector<8x128xf32>
    %cst_282 = arith.constant 1.000000e+00 : f32
    %596 = vector.broadcast %cst_282 : f32 to vector<8x128xf32>
    %597 = arith.addf %596, %595 : vector<8x128xf32>
    %598 = arith.divf %596, %597 : vector<8x128xf32>
    %599 = arith.mulf %590, %578 : vector<8x128xf32>
    %600 = arith.mulf %584, %592 : vector<8x128xf32>
    %601 = arith.addf %599, %600 : vector<8x128xf32>
    %602 = math.tanh %601 : vector<8x128xf32>
    %603 = arith.mulf %598, %602 : vector<8x128xf32>
    %c0_283 = arith.constant 0 : index
    %c0_284 = arith.constant 0 : index
    %604 = vector.load %arg12[%c0_283, %c0_284] : memref<8x128xf32, #tpu.memory_space<vmem>>, vector<8x128xf32>
    tpu.vector_store %arg12[%c0_283, %c0_284], %601 {strides = array<i32>} : memref<8x128xf32, #tpu.memory_space<vmem>>, vector<8x128xf32>,
    %605 = arith.truncf %603 : vector<8x128xf32> to vector<8x128xbf16>
    %c0_285 = arith.constant 0 : index
    %c0_286 = arith.constant 0 : index
    %606 = vector.load %arg10[%c0_285, %c0_286] : memref<8x128xbf16, #tpu.memory_space<vmem>>, vector<8x128xbf16>
    tpu.vector_store %arg10[%c0_285, %c0_286], %605 {strides = array<i32>} : memref<8x128xbf16, #tpu.memory_space<vmem>>, vector<8x128xbf16>,
    %c0_287 = arith.constant 0 : index
    %c0_288 = arith.constant 0 : index
    %607 = vector.load %arg5[%c0_287, %c0_288] : memref<128x512xbf16, #tpu.memory_space<vmem>>, vector<128x512xbf16>
    %cst_289 = arith.constant dense<0.000000e+00> : vector<8x512xf32>
    %608 = tpu.matmul %605, %607, %cst_289 {dimension_numbers = #tpu.dot_dimension_numbers<[1], [0], [0], [1], [0, 0, 1, 1], [], []>} : vector<8x128xbf16>, vector<128x512xbf16>, vector<8x512xf32> -> vector<8x512xf32>
    %609 = arith.addf %570, %608 : vector<8x512xf32>
    %610 = arith.addf %609, %19 : vector<8x512xf32>
    %c0_290 = arith.constant 0 : index
    %c0_291 = arith.constant 0 : index
    %611 = vector.load %arg13[%c0_290, %c0_291] : memref<8x128xf32, #tpu.memory_space<vmem>>, vector<8x128xf32>
    %612 = vector.extract_strided_slice %610 {offsets = [0, 0], sizes = [8, 128], strides = [1, 1]} : vector<8x512xf32> to vector<8x128xf32>
    %613 = arith.negf %612 : vector<8x128xf32>
    %614 = math.exp %613 : vector<8x128xf32>
    %cst_292 = arith.constant 1.000000e+00 : f32
    %615 = vector.broadcast %cst_292 : f32 to vector<8x128xf32>
    %616 = arith.addf %615, %614 : vector<8x128xf32>
    %617 = arith.divf %615, %616 : vector<8x128xf32>
    %618 = vector.extract_strided_slice %610 {offsets = [0, 128], sizes = [8, 128], strides = [1, 1]} : vector<8x512xf32> to vector<8x128xf32>
    %619 = arith.negf %618 : vector<8x128xf32>
    %620 = math.exp %619 : vector<8x128xf32>
    %cst_293 = arith.constant 1.000000e+00 : f32
    %621 = vector.broadcast %cst_293 : f32 to vector<8x128xf32>
    %622 = arith.addf %621, %620 : vector<8x128xf32>
    %623 = arith.divf %621, %622 : vector<8x128xf32>
    %624 = vector.extract_strided_slice %610 {offsets = [0, 256], sizes = [8, 128], strides = [1, 1]} : vector<8x512xf32> to vector<8x128xf32>
    %625 = math.tanh %624 : vector<8x128xf32>
    %626 = vector.extract_strided_slice %610 {offsets = [0, 384], sizes = [8, 128], strides = [1, 1]} : vector<8x512xf32> to vector<8x128xf32>
    %627 = arith.negf %626 : vector<8x128xf32>
    %628 = math.exp %627 : vector<8x128xf32>
    %cst_294 = arith.constant 1.000000e+00 : f32
    %629 = vector.broadcast %cst_294 : f32 to vector<8x128xf32>
    %630 = arith.addf %629, %628 : vector<8x128xf32>
    %631 = arith.divf %629, %630 : vector<8x128xf32>
    %632 = arith.mulf %623, %611 : vector<8x128xf32>
    %633 = arith.mulf %617, %625 : vector<8x128xf32>
    %634 = arith.addf %632, %633 : vector<8x128xf32>
    %635 = math.tanh %634 : vector<8x128xf32>
    %636 = arith.mulf %631, %635 : vector<8x128xf32>
    %c0_295 = arith.constant 0 : index
    %c0_296 = arith.constant 0 : index
    %637 = vector.load %arg13[%c0_295, %c0_296] : memref<8x128xf32, #tpu.memory_space<vmem>>, vector<8x128xf32>
    tpu.vector_store %arg13[%c0_295, %c0_296], %634 {strides = array<i32>} : memref<8x128xf32, #tpu.memory_space<vmem>>, vector<8x128xf32>,
    %638 = arith.truncf %636 : vector<8x128xf32> to vector<8x128xbf16>
    %c0_297 = arith.constant 0 : index
    %c0_298 = arith.constant 0 : index
    %639 = vector.load %arg11[%c0_297, %c0_298] : memref<8x128xbf16, #tpu.memory_space<vmem>>, vector<8x128xbf16>
    tpu.vector_store %arg11[%c0_297, %c0_298], %638 {strides = array<i32>} : memref<8x128xbf16, #tpu.memory_space<vmem>>, vector<8x128xbf16>,
    %c0_299 = arith.constant 0 : index
    %640 = arith.index_cast %567 : i32 to index
    %c0_300 = arith.constant 0 : index
    %641 = vector.load %arg8[%c0_299, %640, %c0_300] : memref<1x64x128xbf16, #tpu.memory_space<vmem>>, vector<1x8x128xbf16>
    %642 = vector.shape_cast %641 : vector<1x8x128xbf16> to vector<8x128xbf16>
    %643 = vector.shape_cast %638 : vector<8x128xbf16> to vector<1x8x128xbf16>
    tpu.vector_store %arg8[%c0_299, %640, %c0_300], %643 {strides = array<i32>} : memref<1x64x128xbf16, #tpu.memory_space<vmem>>, vector<1x8x128xbf16>,
    %c8_i32_301 = arith.constant 8 : i32
    return
  }
  func.func @transform_0(%arg0: i32) -> (i32, i32, i32) {
    %c0_i32 = arith.constant 0 : i32
    %c0_i32_0 = arith.constant 0 : i32
    %c0_i32_1 = arith.constant 0 : i32
    return %arg0, %c0_i32, %c0_i32_0 : i32, i32, i32
  }
  func.func @transform_1(%arg0: i32) -> (i32, i32) {
    %c0_i32 = arith.constant 0 : i32
    %c0_i32_0 = arith.constant 0 : i32
    %c0_i32_1 = arith.constant 0 : i32
    return %c0_i32, %c0_i32_0 : i32, i32
  }
  func.func @transform_2(%arg0: i32) -> (i32, i32) {
    %c0_i32 = arith.constant 0 : i32
    %c0_i32_0 = arith.constant 0 : i32
    %c0_i32_1 = arith.constant 0 : i32
    return %c0_i32, %c0_i32_0 : i32, i32
  }
  func.func @transform_3(%arg0: i32) -> (i32, i32) {
    %c0_i32 = arith.constant 0 : i32
    %c0_i32_0 = arith.constant 0 : i32
    %c0_i32_1 = arith.constant 0 : i32
    return %c0_i32, %c0_i32_0 : i32, i32
  }
  func.func @transform_4(%arg0: i32) -> (i32, i32) {
    %c0_i32 = arith.constant 0 : i32
    %c0_i32_0 = arith.constant 0 : i32
    %c0_i32_1 = arith.constant 0 : i32
    return %c0_i32, %c0_i32_0 : i32, i32
  }
  func.func @transform_5(%arg0: i32) -> (i32, i32) {
    %c0_i32 = arith.constant 0 : i32
    %c0_i32_0 = arith.constant 0 : i32
    %c0_i32_1 = arith.constant 0 : i32
    return %c0_i32, %c0_i32_0 : i32, i32
  }
  func.func @transform_6(%arg0: i32) -> (i32, i32) {
    %c0_i32 = arith.constant 0 : i32
    %c0_i32_0 = arith.constant 0 : i32
    %c0_i32_1 = arith.constant 0 : i32
    return %c0_i32, %c0_i32_0 : i32, i32
  }
  func.func @transform_7(%arg0: i32) -> (i32, i32, i32) {
    %c0_i32 = arith.constant 0 : i32
    %c0_i32_0 = arith.constant 0 : i32
    %c0_i32_1 = arith.constant 0 : i32
    return %arg0, %c0_i32, %c0_i32_0 : i32, i32, i32
  }
}

</mosaic_0001>

<bundles_post_ra>
// kernel: tpu_custom_call.1
= control target key start
LH: loop header
LB: loop body
LE: loop exit
PB: predicated region body
PF: predicated region fallthrough
CT: control target
= control target key end

     0   :  { %12 = vsyncpa [#allocation8], 0  ;;  %s11561_s0 = inlined_call_operand.hbm [shape: bf16[1,64,128], index: 0, kind: input, shape index: {}]   ;;  %s11562_s1 = inlined_call_operand.hbm [shape: bf16[128,512], index: 1, kind: input, shape index: {}]   ;;  %s11563_s2 = inlined_call_operand.hbm [shape: bf16[128,512], index: 2, kind: input, shape index: {}]   ;;  %s11564_s3 = inlined_call_operand.vmem [shape: f32[1,512], index: 3, kind: input, shape index: {}]   ;;  %s11565_s4 = inlined_call_operand.hbm [shape: bf16[128,512], index: 4, kind: input, shape index: {}]   ;;  %s11566_s5 = inlined_call_operand.hbm [shape: bf16[128,512], index: 5, kind: input, shape index: {}]   ;;  %s11567_s6 = inlined_call_operand.vmem [shape: f32[1,512], index: 6, kind: input, shape index: {}]   ;;  %s11568_s7 = inlined_call_operand.hbm [shape: bf16[1,64,128], index: 7, kind: output, shape index: {}]  }
   0x1   :  { %13 = vsyncpa [#allocation11], 0 }
   0x2   :  { %14 = vsyncpa [#allocation14], 0 }
   0x3   :  { %15 = vsyncpa [#allocation9], 0  ;;  %s9782_s24 = smov [#allocation10]  }
   0x4   :  { %s33_s25 = sshll.u32 %s9782_s24, 4  ;;  %s34_s25 = int_to_ptr.vmem [resolvable:$true] %s33_s25 }
   0x5   :  { %s9662_s26 = scalar_lea.vmem %s34_s25, 4096  ;;  %p9667_p1 = scmp.lt.s32.totalorder %s34_s25, %s34_s25 }
   0x6   :  { %p9663_p0 = scmp.ne.s32.totalorder %s34_s25, %s9662_s26  ;;  %p9668_p2 = scmp.lt.s32.totalorder %s9662_s26, %s9662_s26 }
   0x8   :  { %p9669_p3 = por %p9668_p2, %p9667_p1 }
   0xa   :  { %p9670_p4 = pnand %p9669_p3, %p9663_p0 }
   0xc   :  { %9673 = shalt.err (!%p9670_p4)
}
   0xd   :  { %s9783_s27 = smov 256   ;;  %s9784_s28 = smov 16  }
   0xe   :  { %39 = dma.hbm_to_vmem [thread:$0]  %s11562_s1, 4096, %s34_s25, [#allocation11], %s9783_s27, %s9783_s27, %s9784_s28  }
   0xf   :  { %s9785_s8 = smov [#allocation13]   ;;  %s9786_s10 = smov [#allocation7]  }
  0x10   :  { %s59_s9 = sshll.u32 %s9785_s8, 4  ;;  %s21_s11 = sshll.u32 %s9786_s10, 4  ;;  %s60_s9 = int_to_ptr.vmem [resolvable:$true] %s59_s9  ;;  %s22_s11 = int_to_ptr.vmem [resolvable:$true] %s21_s11 }
  0x11   :  { %s9682_s12 = scalar_lea.vmem %s60_s9, 4096  ;;  %p9687_p6 = scmp.lt.s32.totalorder %s60_s9, %s60_s9 }
  0x12   :  { %p9683_p5 = scmp.ne.s32.totalorder %s60_s9, %s9682_s12  ;;  %p9688_p7 = scmp.lt.s32.totalorder %s9682_s12, %s9682_s12 }
  0x14   :  { %p9689_p8 = por %p9688_p7, %p9687_p6 }
  0x16   :  { %p9690_p9 = pnand %p9689_p8, %p9683_p5 }
  0x18   :  { %9693 = shalt.err (!%p9690_p9)
}
  0x19   :  { %65 = dma.hbm_to_vmem [thread:$0]  %s11565_s4, 4096, %s60_s9, [#allocation14], %s9783_s27, %s9783_s27, %s9784_s28  }
  0x1a   :  { %s9702_s1 = scalar_lea.vmem %s22_s11, 512  ;;  %p9707_p11 = scmp.lt.s32.totalorder %s22_s11, %s22_s11 }
  0x1b   :  { %p9703_p10 = scmp.ne.s32.totalorder %s22_s11, %s9702_s1  ;;  %p9708_p12 = scmp.lt.s32.totalorder %s9702_s1, %s9702_s1 }
  0x1d   :  { %p9709_p13 = por %p9708_p12, %p9707_p11 }
  0x1f   :  { %p9710_p0 = pnand %p9709_p13, %p9703_p10 }
  0x21   :  { %9713 = shalt.err (!%p9710_p0)
}
  0x22   :  { %s9787_s15 = smov 64   ;;  %s9788_s16 = smov 4  }
  0x23   :  { %27 = dma.hbm_to_vmem [thread:$0]  %s11561_s0, 512, %s22_s11, [#allocation8], %s9787_s15, %s9787_s15, %s9788_s16  }
  0x24   :  { %s9789_s19 = smov [#allocation12]   ;;  %s9790_s4 = smov [#allocation15]  }
  0x25   :  { %s45_s20 = sshll.u32 %s9789_s19, 4  ;;  %s71_s21 = sshll.u32 %s9790_s4, 4  ;;  %s46_s20 = int_to_ptr.vmem [resolvable:$true] %s45_s20  ;;  %s72_s21 = int_to_ptr.vmem [resolvable:$true] %s71_s21 }
  0x26   :  { %s9722_s22 = scalar_lea.vmem %s46_s20, 4096  ;;  %p9727_p2 = scmp.lt.s32.totalorder %s46_s20, %s46_s20 }
  0x27   :  { %p9723_p1 = scmp.ne.s32.totalorder %s46_s20, %s9722_s22  ;;  %p9728_p3 = scmp.lt.s32.totalorder %s9722_s22, %s9722_s22 }
  0x29   :  { %p9729_p4 = por %p9728_p3, %p9727_p2 }
  0x2b   :  { %p9730_p5 = pnand %p9729_p4, %p9723_p1 }
  0x2d   :  { %9733 = shalt.err (!%p9730_p5)
}
  0x2e   :  { %51 = dma.hbm_to_vmem [thread:$0]  %s11563_s2, 4096, %s46_s20, [#allocation11], %s9783_s27, %s9783_s27, %s9784_s28  }
  0x2f   :  { %s9742_s0 = scalar_lea.vmem %s72_s21, 4096  ;;  %p9747_p7 = scmp.lt.s32.totalorder %s72_s21, %s72_s21 }
  0x30   :  { %p9743_p6 = scmp.ne.s32.totalorder %s72_s21, %s9742_s0  ;;  %p9748_p8 = scmp.lt.s32.totalorder %s9742_s0, %s9742_s0 }
  0x32   :  { %p9749_p9 = por %p9748_p8, %p9747_p7 }
  0x34   :  { %p9750_p10 = pnand %p9749_p9, %p9743_p6 }
  0x36   :  { %9753 = shalt.err (!%p9750_p10)
}
  0x37   :  { %77 = dma.hbm_to_vmem [thread:$0]  %s11566_s5, 4096, %s72_s21, [#allocation14], %s9783_s27, %s9783_s27, %s9784_s28  }
  0x38   :  { %9774 = dma.done.wait [#allocation8], 512  }
  0x39   :  { %9775 = vsyncadd [#allocation8], 4294966784 }
  0x3a   :  { %9776 = dma.done.wait [#allocation11], 8192  }
  0x3b   :  { %9777 = vsyncadd [#allocation11], 4294959104 }
  0x3c   :  { %9778 = dma.done.wait [#allocation14], 8192  }
  0x3d   :  { %9779 = vsyncadd [#allocation14], 4294959104  ;;  %v11573_v0 = vmov 0   ;;  %v8738_v1 = vld [vmem:[#allocation10 + $0xe4] ss:$16 sps:$4 sm:$0xff]   ;;  %v8799_v44 = vld [vmem:[#allocation7 + $0x8] sm:$0xff]  }
  0x3e   :  { %374 = vmatprep.mubr.bf16.mxu0 %v11573_v0  ;;  %600 = vst [vmem:[#allocation3] sm:$0xf] %v11573_v0  ;;  %601 = vst [vmem:[#allocation4] sm:$0xf] %v11573_v0  ;;  %447 = vmatprep.mubr.bf16.mxu1 %v11573_v0  ;;  %v8740_v2 = vld [vmem:[#allocation10 + $0xec] ss:$16 sps:$4 sm:$0xff]  }
  0x3f   :  { %342 = vmatprep.subr.bf16.mxu0 %v8738_v1  ;;  %v8742_v3 = vld [vmem:[#allocation10 + $0xe0] ss:$16 sps:$4 sm:$0xff]   ;;  %v8743_v4 = vld [vmem:[#allocation10 + $0xe8] ss:$16 sps:$4 sm:$0xff]   ;;  %415 = vmatprep.subr.bf16.mxu1 %v8740_v2  ;;  %v8744_v5 = vld [vmem:[#allocation10 + $0xc4] ss:$16 sps:$4 sm:$0xff]  }
  0x40   :  { %343 = vmatpush1.bf16.msra.mxu0 %v8742_v3  ;;  %416 = vmatpush1.bf16.msra.mxu1 %v8743_v4  ;;  %v8746_v6 = vld [vmem:[#allocation10 + $0xcc] ss:$16 sps:$4 sm:$0xff]   ;;  %v8748_v7 = vld [vmem:[#allocation10 + $0xc0] ss:$16 sps:$4 sm:$0xff]   ;;  %v8749_v8 = vld [vmem:[#allocation10 + $0xc8] ss:$16 sps:$4 sm:$0xff]  }
  0x41   :  { %344 = vmatprep.subr.bf16.mxu0 %v8744_v5  ;;  %417 = vmatprep.subr.bf16.mxu1 %v8746_v6  ;;  %v8750_v9 = vld [vmem:[#allocation10 + $0xa4] ss:$16 sps:$4 sm:$0xff]   ;;  %v8752_v10 = vld [vmem:[#allocation10 + $0xac] ss:$16 sps:$4 sm:$0xff]   ;;  %v8754_v11 = vld [vmem:[#allocation10 + $0xa0] ss:$16 sps:$4 sm:$0xff]  }
  0x42   :  { %v8755_v12 = vld [vmem:[#allocation10 + $0xa8] ss:$16 sps:$4 sm:$0xff]   ;;  %v8756_v13 = vld [vmem:[#allocation10 + $0x84] ss:$16 sps:$4 sm:$0xff]   ;;  %v8758_v14 = vld [vmem:[#allocation10 + $0x8c] ss:$16 sps:$4 sm:$0xff]  }
  0x43   :  { %v8760_v15 = vld [vmem:[#allocation10 + $0x80] ss:$16 sps:$4 sm:$0xff]   ;;  %v8761_v16 = vld [vmem:[#allocation10 + $0x88] ss:$16 sps:$4 sm:$0xff]   ;;  %v8762_v17 = vld [vmem:[#allocation10 + $0x64] ss:$16 sps:$4 sm:$0xff]  }
  0x44   :  { %345 = vmatpush1.bf16.msra.mxu0 %v8748_v7  ;;  %418 = vmatpush1.bf16.msra.mxu1 %v8749_v8  ;;  %v8764_v18 = vld [vmem:[#allocation10 + $0x6c] ss:$16 sps:$4 sm:$0xff]   ;;  %v8766_v19 = vld [vmem:[#allocation10 + $0x60] ss:$16 sps:$4 sm:$0xff]   ;;  %v8767_v20 = vld [vmem:[#allocation10 + $0x68] ss:$16 sps:$4 sm:$0xff]  }
  0x45   :  { %346 = vmatprep.subr.bf16.mxu0 %v8750_v9  ;;  %419 = vmatprep.subr.bf16.mxu1 %v8752_v10  ;;  %v8768_v21 = vld [vmem:[#allocation10 + $0x44] ss:$16 sps:$4 sm:$0xff]   ;;  %v8770_v22 = vld [vmem:[#allocation10 + $0x4c] ss:$16 sps:$4 sm:$0xff]   ;;  %v8772_v23 = vld [vmem:[#allocation10 + $0x40] ss:$16 sps:$4 sm:$0xff]  }
  0x46   :  { %v8773_v24 = vld [vmem:[#allocation10 + $0x48] ss:$16 sps:$4 sm:$0xff]   ;;  %v8774_v25 = vld [vmem:[#allocation10 + $0x24] ss:$16 sps:$4 sm:$0xff]   ;;  %v8776_v26 = vld [vmem:[#allocation10 + $0x2c] ss:$16 sps:$4 sm:$0xff]  }
  0x47   :  { %v8778_v27 = vld [vmem:[#allocation10 + $0x20] ss:$16 sps:$4 sm:$0xff]   ;;  %v8779_v28 = vld [vmem:[#allocation10 + $0x28] ss:$16 sps:$4 sm:$0xff]   ;;  %v8780_v29 = vld [vmem:[#allocation10 + $0x4] ss:$16 sps:$4 sm:$0xff]  }
  0x48   :  { %347 = vmatpush1.bf16.msra.mxu0 %v8754_v11  ;;  %420 = vmatpush1.bf16.msra.mxu1 %v8755_v12  ;;  %v8782_v30 = vld [vmem:[#allocation10 + $0xc] ss:$16 sps:$4 sm:$0xff]   ;;  %v8784_v31 = vld [vmem:[#allocation10] ss:$16 sps:$4 sm:$0xff]   ;;  %v8785_v32 = vld [vmem:[#allocation10 + $0x8] ss:$16 sps:$4 sm:$0xff]  }
  0x49   :  { %348 = vmatprep.subr.bf16.mxu0 %v8756_v13  ;;  %421 = vmatprep.subr.bf16.mxu1 %v8758_v14  ;;  %v8789_v33 = vld [vmem:[#allocation12 + $0xe4] ss:$16 sps:$4 sm:$0xff]   ;;  %v8792_v34 = vld [vmem:[#allocation12 + $0xec] ss:$16 sps:$4 sm:$0xff]   ;;  %v8787_v36 = vld [vmem:[#allocation12 + $0xe0] ss:$16 sps:$4 sm:$0xff]  }
  0x4a   :  { %v8786_v35 = vld [vmem:[#allocation7] sm:$0xff]   ;;  %v8790_v37 = vld [vmem:[#allocation12 + $0xe8] ss:$16 sps:$4 sm:$0xff]   ;;  %v8798_v39 = vld [vmem:[#allocation12 + $0xcc] ss:$16 sps:$4 sm:$0xff]  }
  0x4b   :  { %v8795_v38 = vld [vmem:[#allocation12 + $0xc4] ss:$16 sps:$4 sm:$0xff]   ;;  %v8793_v40 = vld [vmem:[#allocation12 + $0xc0] ss:$16 sps:$4 sm:$0xff]   ;;  %v8796_v41 = vld [vmem:[#allocation12 + $0xc8] ss:$16 sps:$4 sm:$0xff]  }
  0x4c   :  { %349 = vmatpush1.bf16.msra.mxu0 %v8760_v15  ;;  %422 = vmatpush1.bf16.msra.mxu1 %v8761_v16  ;;  %v8802_v42 = vld [vmem:[#allocation12 + $0xa4] ss:$16 sps:$4 sm:$0xff]   ;;  %v8805_v43 = vld [vmem:[#allocation12 + $0xac] ss:$16 sps:$4 sm:$0xff]   ;;  %v8800_v45 = vld [vmem:[#allocation12 + $0xa0] ss:$16 sps:$4 sm:$0xff]  }
  0x4d   :  { %350 = vmatprep.subr.bf16.mxu0 %v8762_v17  ;;  %423 = vmatprep.subr.bf16.mxu1 %v8764_v18  ;;  %v8803_v46 = vld [vmem:[#allocation12 + $0xa8] ss:$16 sps:$4 sm:$0xff]   ;;  %v8808_v47 = vld [vmem:[#allocation12 + $0x84] ss:$16 sps:$4 sm:$0xff]   ;;  %v8811_v48 = vld [vmem:[#allocation12 + $0x8c] ss:$16 sps:$4 sm:$0xff]  }
  0x4e   :  { %v8806_v49 = vld [vmem:[#allocation12 + $0x80] ss:$16 sps:$4 sm:$0xff]   ;;  %v8809_v50 = vld [vmem:[#allocation12 + $0x88] ss:$16 sps:$4 sm:$0xff]   ;;  %v8815_v51 = vld [vmem:[#allocation12 + $0x64] ss:$16 sps:$4 sm:$0xff]  }
  0x4f   :  { %v8818_v52 = vld [vmem:[#allocation12 + $0x6c] ss:$16 sps:$4 sm:$0xff]   ;;  %v8812_v53 = vld [vmem:[#allocation7 + $0x10] sm:$0xff]   ;;  %v8816_v55 = vld [vmem:[#allocation12 + $0x68] ss:$16 sps:$4 sm:$0xff]  }
  0x50   :  { %351 = vmatpush1.bf16.msra.mxu0 %v8766_v19  ;;  %424 = vmatpush1.bf16.msra.mxu1 %v8767_v20  ;;  %v8813_v54 = vld [vmem:[#allocation12 + $0x60] ss:$16 sps:$4 sm:$0xff]   ;;  %v8821_v56 = vld [vmem:[#allocation12 + $0x44] ss:$16 sps:$4 sm:$0xff]   ;;  %v8824_v57 = vld [vmem:[#allocation12 + $0x4c] ss:$16 sps:$4 sm:$0xff]  }
  0x51   :  { %352 = vmatprep.subr.bf16.mxu0 %v8768_v21  ;;  %425 = vmatprep.subr.bf16.mxu1 %v8770_v22  ;;  %v8819_v58 = vld [vmem:[#allocation12 + $0x40] ss:$16 sps:$4 sm:$0xff]   ;;  %v8822_v59 = vld [vmem:[#allocation12 + $0x48] ss:$16 sps:$4 sm:$0xff]   ;;  %v8828_v60 = vld [vmem:[#allocation12 + $0x24] ss:$16 sps:$4 sm:$0xff]  }
  0x52   :  { %v8831_v61 = vld [vmem:[#allocation12 + $0x2c] ss:$16 sps:$4 sm:$0xff]   ;;  %v8826_v63 = vld [vmem:[#allocation12 + $0x20] ss:$16 sps:$4 sm:$0xff]   ;;  %v8829_v1 = vld [vmem:[#allocation12 + $0x28] ss:$16 sps:$4 sm:$0xff]  }
  0x53   :  { %v8825_v62 = vld [vmem:[#allocation7 + $0x18] sm:$0xff]   ;;  %v8834_v2 = vld [vmem:[#allocation12 + $0x4] ss:$16 sps:$4 sm:$0xff]   ;;  %v8832_v4 = vld [vmem:[#allocation12] ss:$16 sps:$4 sm:$0xff]  }
  0x54   :  { %353 = vmatpush1.bf16.msra.mxu0 %v8772_v23  ;;  %426 = vmatpush1.bf16.msra.mxu1 %v8773_v24  ;;  %v8837_v3 = vld [vmem:[#allocation12 + $0xc] ss:$16 sps:$4 sm:$0xff]   ;;  %v8835_v5 = vld [vmem:[#allocation12 + $0x8] ss:$16 sps:$4 sm:$0xff]   ;;  %v9877_v7 = vld [vmem:[#allocation13 + $0xe4] ss:$16 sps:$4 sm:$0xff]  }
  0x55   :  { %354 = vmatprep.subr.bf16.mxu0 %v8774_v25  ;;  %427 = vmatprep.subr.bf16.mxu1 %v8776_v26  ;;  %v668_v6 = vld [vmem:[#allocation3] sm:$0xf]  ;;  %v9879_v8 = vld [vmem:[#allocation13 + $0xec] ss:$16 sps:$4 sm:$0xff]   ;;  %v9881_v9 = vld [vmem:[#allocation13 + $0xe0] ss:$16 sps:$4 sm:$0xff]  }
  0x56   :  { %v9883_v10 = vld [vmem:[#allocation13 + $0xe8] ss:$16 sps:$4 sm:$0xff]   ;;  %v9889_v11 = vld [vmem:[#allocation13 + $0xc4] ss:$16 sps:$4 sm:$0xff]   ;;  %v9891_v12 = vld [vmem:[#allocation13 + $0xcc] ss:$16 sps:$4 sm:$0xff]  }
  0x57   :  { %v9893_v13 = vld [vmem:[#allocation13 + $0xc0] ss:$16 sps:$4 sm:$0xff]   ;;  %v9895_v14 = vld [vmem:[#allocation13 + $0xc8] ss:$16 sps:$4 sm:$0xff]   ;;  %v9901_v15 = vld [vmem:[#allocation13 + $0xa4] ss:$16 sps:$4 sm:$0xff]  }
  0x58   :  { %355 = vmatpush1.bf16.msra.mxu0 %v8778_v27  ;;  %428 = vmatpush1.bf16.msra.mxu1 %v8779_v28  ;;  %v9903_v16 = vld [vmem:[#allocation13 + $0xac] ss:$16 sps:$4 sm:$0xff]   ;;  %v9905_v17 = vld [vmem:[#allocation13 + $0xa0] ss:$16 sps:$4 sm:$0xff]   ;;  %v9907_v18 = vld [vmem:[#allocation13 + $0xa8] ss:$16 sps:$4 sm:$0xff]  }
  0x59   :  { %356 = vmatprep.subr.bf16.mxu0 %v8780_v29  ;;  %429 = vmatprep.subr.bf16.mxu1 %v8782_v30  ;;  %v9913_v19 = vld [vmem:[#allocation13 + $0x84] ss:$16 sps:$4 sm:$0xff]   ;;  %v9915_v20 = vld [vmem:[#allocation13 + $0x8c] ss:$16 sps:$4 sm:$0xff]   ;;  %v9917_v21 = vld [vmem:[#allocation13 + $0x80] ss:$16 sps:$4 sm:$0xff]  }
  0x5a   :  { %v9919_v22 = vld [vmem:[#allocation13 + $0x88] ss:$16 sps:$4 sm:$0xff]   ;;  %v9925_v23 = vld [vmem:[#allocation13 + $0x60] ss:$16 sps:$4 sm:$0xff]   ;;  %v9927_v24 = vld [vmem:[#allocation13 + $0x64] ss:$16 sps:$4 sm:$0xff]  }
  0x5b   :  { %v9929_v25 = vld [vmem:[#allocation13 + $0x68] ss:$16 sps:$4 sm:$0xff]   ;;  %v9931_v26 = vld [vmem:[#allocation13 + $0x6c] ss:$16 sps:$4 sm:$0xff]   ;;  %v9933_v27 = vld [vmem:[#allocation13 + $0x44] ss:$16 sps:$4 sm:$0xff]  }
  0x5c   :  { %357 = vmatpush1.bf16.msra.mxu0 %v8784_v31  ;;  %430 = vmatpush1.bf16.msra.mxu1 %v8785_v32  ;;  %v9936_v28 = vld [vmem:[#allocation13 + $0x4c] ss:$16 sps:$4 sm:$0xff]   ;;  %v9940_v29 = vld [vmem:[#allocation13 + $0x40] ss:$16 sps:$4 sm:$0xff]   ;;  %v9944_v30 = vld [vmem:[#allocation13 + $0x48] ss:$16 sps:$4 sm:$0xff]  }
  0x5d   :  { %861 = vmatprep.subr.bf16.mxu0 %v8789_v33  ;;  %902 = vmatprep.subr.bf16.mxu1 %v8792_v34  ;;  %v9946_v31 = vld [vmem:[#allocation13 + $0x24] ss:$16 sps:$4 sm:$0xff]   ;;  %v9949_v32 = vld [vmem:[#allocation13 + $0x2c] ss:$16 sps:$4 sm:$0xff]   ;;  %v9952_v33 = vld [vmem:[#allocation13 + $0x20] ss:$16 sps:$4 sm:$0xff]  }
  0x5e   :  { %v9956_v34 = vld [vmem:[#allocation13 + $0x28] ss:$16 sps:$4 sm:$0xff]  }
  0x5f   :  { %375 = vmatmul.mubr.bf16.vlgmr.msra.gmra.mxu0 %v8786_v35  ;;  %448 = vmatmul.mubr.bf16.vlgmr.msra.gmra.mxu1 %v8786_v35  ;;  %v9958_v35 = vld [vmem:[#allocation13 + $0x4] ss:$16 sps:$4 sm:$0xff]  }
  0x60   :  { %862 = vmatpush1.bf16.msra.mxu0 %v8787_v36  ;;  %903 = vmatpush1.bf16.msra.mxu1 %v8790_v37  ;;  %v9961_v36 = vld [vmem:[#allocation13 + $0xc] ss:$16 sps:$4 sm:$0xff]   ;;  %v9964_v37 = vld [vmem:[#allocation13] ss:$16 sps:$4 sm:$0xff]  }
  0x61   :  { %863 = vmatprep.subr.bf16.mxu0 %v8795_v38  ;;  %904 = vmatprep.subr.bf16.mxu1 %v8798_v39  ;;  %v9968_v38 = vld [vmem:[#allocation13 + $0x8] ss:$16 sps:$4 sm:$0xff]   ;;  %v9970_v39 = vld [vmem:[#allocation15 + $0xe4] ss:$16 sps:$4 sm:$0xff]  }
  0x62   :  { %384 = vmatprep.mubr.bf16.mxu0 %v11573_v0  ;;  %457 = vmatprep.mubr.bf16.mxu1 %v11573_v0 }
  0x64   :  { %864 = vmatpush1.bf16.msra.mxu0 %v8793_v40  ;;  %905 = vmatpush1.bf16.msra.mxu1 %v8796_v41  ;;  %v9973_v40 = vld [vmem:[#allocation15 + $0xec] ss:$16 sps:$4 sm:$0xff]   ;;  %v138_v41 = vlaneseq }
  0x65   :  { %865 = vmatprep.subr.bf16.mxu0 %v8802_v42  ;;  %906 = vmatprep.subr.bf16.mxu1 %v8805_v43 }
  0x66   :  { %v9979_v42 = vshrl.u32 %v138_v41, 7 }
  0x67   :  { %385 = vmatmul.mubr.bf16.gmra.mxu0 %v8799_v44  ;;  %458 = vmatmul.mubr.bf16.gmra.mxu1 %v8799_v44 }
  0x68   :  { %866 = vmatpush1.bf16.msra.mxu0 %v8800_v45  ;;  %907 = vmatpush1.bf16.msra.mxu1 %v8803_v46  ;;  %v11569_v43 = vsub.s32 2, %v9979_v42  ;;  %v11572_v44 = vsub.s32 0, %v9979_v42  ;;  %v11570_v45 = vsub.s32 3, %v9979_v42  ;;  %v136_v46 = vld [vmem:[%s11564_s3] sm:$0xf] }
  0x69   :  { %867 = vmatprep.subr.bf16.mxu0 %v8808_v47  ;;  %908 = vmatprep.subr.bf16.mxu1 %v8811_v48 }
  0x6a   :  { %394 = vmatprep.mubr.bf16.mxu0 %v11573_v0  ;;  %467 = vmatprep.mubr.bf16.mxu1 %v11573_v0 }
  0x6c   :  { %868 = vmatpush1.bf16.msra.mxu0 %v8806_v49  ;;  %909 = vmatpush1.bf16.msra.mxu1 %v8809_v50  ;;  %v9991_v49 = vrot.slane %v136_v46, %v11569_v43  ;;  %v11571_v50 = vsub.s32 1, %v9979_v42 }
  0x6d   :  { %869 = vmatprep.subr.bf16.mxu0 %v8815_v51  ;;  %910 = vmatprep.subr.bf16.mxu1 %v8818_v52 }
  0x6f   :  { %395 = vmatmul.mubr.bf16.gmra.mxu0 %v8812_v53  ;;  %468 = vmatmul.mubr.bf16.gmra.mxu1 %v8812_v53  ;;  %v9998_v53 = vrot.slane %v136_v46, %v11572_v44 }
  0x70   :  { %870 = vmatpush1.bf16.msra.mxu0 %v8813_v54  ;;  %911 = vmatpush1.bf16.msra.mxu1 %v8816_v55  ;;  %v10002_v54 = vrot.slane %v136_v46, %v11570_v45 }
  0x71   :  { %871 = vmatprep.subr.bf16.mxu0 %v8821_v56  ;;  %912 = vmatprep.subr.bf16.mxu1 %v8824_v57  ;;  %v10006_v57 = vrot.slane %v136_v46, %v11571_v50 }
  0x72   :  { %404 = vmatprep.mubr.bf16.mxu0 %v11573_v0  ;;  %477 = vmatprep.mubr.bf16.mxu1 %v11573_v0 }
  0x74   :  { %872 = vmatpush1.bf16.msra.mxu0 %v8819_v58  ;;  %913 = vmatpush1.bf16.msra.mxu1 %v8822_v59 }
  0x75   :  { %873 = vmatprep.subr.bf16.mxu0 %v8828_v60  ;;  %914 = vmatprep.subr.bf16.mxu1 %v8831_v61 }
  0x77   :  { %405 = vmatmul.mubr.bf16.gmra.mxu0 %v8825_v62  ;;  %478 = vmatmul.mubr.bf16.gmra.mxu1 %v8825_v62 }
  0x78   :  { %874 = vmatpush1.bf16.msra.mxu0 %v8826_v63  ;;  %915 = vmatpush1.bf16.msra.mxu1 %v8829_v1 }
  0x79   :  { %875 = vmatprep.subr.bf16.mxu0 %v8834_v2  ;;  %916 = vmatprep.subr.bf16.mxu1 %v8837_v3 }
  0x7a   :  { %893 = vmatprep.mubr.bf16.mxu0 %v11573_v0  ;;  %934 = vmatprep.mubr.bf16.mxu1 %v11573_v0 }
  0x7c   :  { %876 = vmatpush1.bf16.msra.mxu0 %v8832_v4  ;;  %917 = vmatpush1.bf16.msra.mxu1 %v8835_v5 }
  0x7d   :  { %1167 = vmatprep.subr.bf16.mxu0 %v9877_v7  ;;  %1208 = vmatprep.subr.bf16.mxu1 %v9879_v8 }
  0x7f   :  { %894 = vmatmul.mubr.bf16.vlgmr.msra.gmra.mxu0 %v668_v6  ;;  %935 = vmatmul.mubr.bf16.vlgmr.msra.gmra.mxu1 %v668_v6 }
  0x80   :  { %1199 = vmatprep.mubr.bf16.mxu0 %v11573_v0  ;;  %1240 = vmatprep.mubr.bf16.mxu1 %v11573_v0 }
  0x81   :  { %1168 = vmatpush1.bf16.msra.mxu0 %v9881_v9  ;;  %1209 = vmatpush1.bf16.msra.mxu1 %v9883_v10 }
  0x82   :  { %1169 = vmatprep.subr.bf16.mxu0 %v9889_v11  ;;  %1210 = vmatprep.subr.bf16.mxu1 %v9891_v12 }
  0x85   :  { %1170 = vmatpush1.bf16.msra.mxu0 %v9893_v13  ;;  %1211 = vmatpush1.bf16.msra.mxu1 %v9895_v14 }
  0x86   :  { %1171 = vmatprep.subr.bf16.mxu0 %v9901_v15  ;;  %1212 = vmatprep.subr.bf16.mxu1 %v9903_v16 }
  0x89   :  { %1172 = vmatpush1.bf16.msra.mxu0 %v9905_v17  ;;  %1213 = vmatpush1.bf16.msra.mxu1 %v9907_v18 }
  0x8a   :  { %1173 = vmatprep.subr.bf16.mxu0 %v9913_v19  ;;  %1214 = vmatprep.subr.bf16.mxu1 %v9915_v20 }
  0x8d   :  { %1174 = vmatpush1.bf16.msra.mxu0 %v9917_v21  ;;  %1215 = vmatpush1.bf16.msra.mxu1 %v9919_v22 }
  0x8e   :  { %1175 = vmatprep.subr.bf16.mxu0 %v9927_v24  ;;  %1216 = vmatprep.subr.bf16.mxu1 %v9931_v26 }
  0x91   :  { %1176 = vmatpush1.bf16.msra.mxu0 %v9925_v23  ;;  %1217 = vmatpush1.bf16.msra.mxu1 %v9929_v25 }
  0x92   :  { %1177 = vmatprep.subr.bf16.mxu0 %v9933_v27  ;;  %1218 = vmatprep.subr.bf16.mxu1 %v9936_v28 }
  0x95   :  { %1178 = vmatpush1.bf16.msra.mxu0 %v9940_v29  ;;  %1219 = vmatpush1.bf16.msra.mxu1 %v9944_v30 }
  0x96   :  { %1179 = vmatprep.subr.bf16.mxu0 %v9946_v31  ;;  %1220 = vmatprep.subr.bf16.mxu1 %v9949_v32 }
  0x99   :  { %1180 = vmatpush1.bf16.msra.mxu0 %v9952_v33  ;;  %1221 = vmatpush1.bf16.msra.mxu1 %v9956_v34 }
  0x9a   :  { %1181 = vmatprep.subr.bf16.mxu0 %v9958_v35  ;;  %1222 = vmatprep.subr.bf16.mxu1 %v9961_v36 }
  0x9d   :  { %1182 = vmatpush1.bf16.msra.mxu0 %v9964_v37  ;;  %1223 = vmatpush1.bf16.msra.mxu1 %v9968_v38 }
  0x9e   :  { %1409 = vmatprep.subr.bf16.mxu0 %v9970_v39  ;;  %1450 = vmatprep.subr.bf16.mxu1 %v9973_v40 }
 0x11f   :  { %v376_v47 = vpop.f32.mrf.mxu0  ;;  %v9987_v48 = vpop.f32.mrf.mxu1 }
 0x121   :  { %v378_v51 = vpop.f32.mrf.mxu0  ;;  %v9994_v52 = vpop.f32.mrf.mxu1 }
 0x123   :  { %v380_v55 = vpop.f32.mrf.mxu0  ;;  %v453_v56 = vpop.f32.mrf.mxu1 }
 0x124   :  { %v381_v58 = vadd.f32 %v380_v55, %v9998_v53  ;;  %v454_v59 = vadd.f32 %v453_v56, %v9991_v49 }
 0x125   :  { %v382_v60 = vpop.f32.mrf.mxu0  ;;  %v455_v61 = vpop.f32.mrf.mxu1 }
 0x126   :  { %v383_v62 = vadd.f32 %v382_v60, %v10006_v57  ;;  %v456_v63 = vadd.f32 %v455_v61, %v10002_v54 }
 0x127   :  { %v386_v1 = vpop.f32.mrf.mxu0  ;;  %v459_v2 = vpop.f32.mrf.mxu1 }
 0x128   :  { %v10012_v3 = vpack.c.bf16 %v383_v62, %v381_v58  ;;  %v10014_v4 = vpack.c.bf16 %v456_v63, %v454_v59  ;;  %v387_v5 = vadd.f32 %v386_v1, %v9998_v53  ;;  %v460_v6 = vadd.f32 %v459_v2, %v9991_v49 }
 0x129   :  { %v388_v41 = vpop.f32.mrf.mxu0  ;;  %v461_v46 = vpop.f32.mrf.mxu1 }
 0x12a   :  { %v389_v55 = vadd.f32 %v388_v41, %v10006_v57  ;;  %v462_v56 = vadd.f32 %v461_v46, %v10002_v54 }
 0x12b   :  { %v390_v43 = vpop.f32.mrf.mxu0  ;;  %v463_v60 = vpop.f32.mrf.mxu1 }
 0x12c   :  { %v10020_v45 = vpack.c.bf16 %v389_v55, %v387_v5  ;;  %v10022_v61 = vpack.c.bf16 %v462_v56, %v460_v6  ;;  %v391_v58 = vadd.f32 %v390_v43, %v9998_v53  ;;  %v464_v59 = vadd.f32 %v463_v60, %v9991_v49 }
 0x12d   :  { %v392_v62 = vpop.f32.mrf.mxu0  ;;  %v465_v63 = vpop.f32.mrf.mxu1 }
 0x12e   :  { %11723 = vst [vmem:[#allocation21_spill] sm:$0xff] %v10020_v45  ;;  %11724 = vst [vmem:[#allocation22_spill] sm:$0xff] %v10022_v61  ;;  %v393_v1 = vadd.f32 %v392_v62, %v10006_v57  ;;  %v466_v2 = vadd.f32 %v465_v63, %v10002_v54 }
 0x12f   :  { %v396_v50 = vpop.f32.mrf.mxu0  ;;  %v469_v41 = vpop.f32.mrf.mxu1 }
 0x130   :  { %v10028_v44 = vpack.c.bf16 %v393_v1, %v391_v58  ;;  %v10030_v46 = vpack.c.bf16 %v466_v2, %v464_v59  ;;  %v397_v5 = vadd.f32 %v396_v50, %v9998_v53  ;;  %v470_v6 = vadd.f32 %v469_v41, %v9991_v49 }
 0x131   :  { %v398_v55 = vpop.f32.mrf.mxu0  ;;  %v471_v43 = vpop.f32.mrf.mxu1  ;;  %v379_v2 = vadd.f32 %v378_v51, %v10006_v57 }
 0x132   :  { %11725 = vst [vmem:[#allocation23_spill] sm:$0xff] %v10028_v44  ;;  %11726 = vst [vmem:[#allocation24_spill] sm:$0xff] %v10030_v46  ;;  %v399_v56 = vadd.f32 %v398_v55, %v10006_v57  ;;  %v472_v60 = vadd.f32 %v471_v43, %v10002_v54  ;;  %v377_v43 = vadd.f32 %v376_v47, %v9998_v53 }
 0x133   :  { %v400_v0 = vpop.f32.mrf.mxu0  ;;  %v473_v62 = vpop.f32.mrf.mxu1 }
 0x134   :  { %v10036_v61 = vpack.c.bf16 %v399_v56, %v397_v5  ;;  %v10038_v63 = vpack.c.bf16 %v472_v60, %v470_v6  ;;  %v401_v58 = vadd.f32 %v400_v0, %v9998_v53  ;;  %v474_v59 = vadd.f32 %v473_v62, %v9991_v49 }
 0x135   :  { %v402_v1 = vpop.f32.mrf.mxu0  ;;  %v475_v50 = vpop.f32.mrf.mxu1 }
 0x136   :  { %11727 = vst [vmem:[#allocation25_spill] sm:$0xff] %v10036_v61  ;;  %11728 = vst [vmem:[#allocation26_spill] sm:$0xff] %v10038_v63  ;;  %v403_v41 = vadd.f32 %v402_v1, %v10006_v57  ;;  %v476_v55 = vadd.f32 %v475_v50, %v10002_v54  ;;  %v8711_v63 = vpack.c.bf16 %v379_v2, %v377_v43 }
 0x137   :  { %v406_v46 = vpop.f32.mrf.mxu0  ;;  %v479_v44 = vpop.f32.mrf.mxu1 }
 0x138   :  { %v10046_v5 = vpack.c.bf16 %v403_v41, %v401_v58  ;;  %v10048_v6 = vpack.c.bf16 %v476_v55, %v474_v59  ;;  %v407_v0 = vadd.f32 %v406_v46, %v9998_v53  ;;  %v480_v56 = vadd.f32 %v479_v44, %v9991_v49 }
 0x139   :  { %v408_v60 = vpop.f32.mrf.mxu0  ;;  %v481_v62 = vpop.f32.mrf.mxu1  ;;  %v664_v55 = vunpack.c.l.bf16 %v8711_v63 }
 0x13a   :  { %11729 = vst [vmem:[#allocation27_spill] sm:$0xff] %v10046_v5  ;;  %11730 = vst [vmem:[#allocation28_spill] sm:$0xff] %v10048_v6  ;;  %v409_v51 = vadd.f32 %v408_v60, %v10006_v57  ;;  %v482_v1 = vadd.f32 %v481_v62, %v10002_v54  ;;  %v10145_v5 = vld [vmem:[#allocation15 + $0x20] ss:$16 sps:$4 sm:$0xff]  }
 0x13b   :  { %v410_v50 = vpop.f32.mrf.mxu0  ;;  %v483_v61 = vpop.f32.mrf.mxu1  ;;  %11746 = vst [vmem:[#allocation43_spill] sm:$0xff] %v10145_v5 }
 0x13c   :  { %v10054_v47 = vpack.c.bf16 %v409_v51, %v407_v0  ;;  %v10056_v45 = vpack.c.bf16 %v482_v1, %v480_v56  ;;  %v411_v58 = vadd.f32 %v410_v50, %v9998_v53  ;;  %v484_v59 = vadd.f32 %v483_v61, %v9991_v49 }
 0x13d   :  { %v412_v46 = vpop.f32.mrf.mxu0  ;;  %v485_v41 = vpop.f32.mrf.mxu1  ;;  %v665_v56 = vunpack.c.h.bf16 %v8711_v63  ;;  %v450_v53 = vadd.f32 %v9987_v48, %v9991_v49  ;;  %v452_v61 = vadd.f32 %v9994_v52, %v10002_v54 }
 0x13e   :  { %11731 = vst [vmem:[#allocation29_spill] sm:$0xff] %v10054_v47  ;;  %11732 = vst [vmem:[#allocation30_spill] sm:$0xff] %v10056_v45  ;;  %v413_v44 = vadd.f32 %v412_v46, %v10006_v57  ;;  %v486_v2 = vadd.f32 %v485_v41, %v10002_v54  ;;  %v10141_v47 = vld [vmem:[#allocation15 + $0x2c] ss:$16 sps:$4 sm:$0xff]  }
 0x13f   :  { %v895_v43 = vpop.f32.mrf.mxu0  ;;  %v936_v60 = vpop.f32.mrf.mxu1  ;;  %11745 = vst [vmem:[#allocation42_spill] sm:$0xff] %v10141_v47 }
 0x140   :  { %v10062_v62 = vpack.c.bf16 %v413_v44, %v411_v58  ;;  %v10064_v6 = vpack.c.bf16 %v486_v2, %v484_v59  ;;  %v943_v0 = vadd.f32 %v895_v43, %v664_v55  ;;  %v8712_v58 = vpack.c.bf16 %v452_v61, %v450_v53 }
 0x141   :  { %v897_v51 = vpop.f32.mrf.mxu0  ;;  %v938_v1 = vpop.f32.mrf.mxu1 }
 0x142   :  { %11733 = vst [vmem:[#allocation31_spill] sm:$0xff] %v10062_v62  ;;  %11734 = vst [vmem:[#allocation32_spill] sm:$0xff] %v10064_v6  ;;  %v7927_v57 = vmul.f32 -1.442695, %v943_v0  ;;  %v944_v50 = vadd.f32 %v897_v51, %v665_v56  ;;  %v667_v2 = vunpack.c.h.bf16 %v8712_v58  ;;  %v666_v55 = vunpack.c.l.bf16 %v8712_v58  ;;  %v10139_v62 = vld [vmem:[#allocation15 + $0x24] ss:$16 sps:$4 sm:$0xff]  }
 0x143   :  { %v899_v46 = vpop.f32.mrf.mxu0  ;;  %v940_v41 = vpop.f32.mrf.mxu1  ;;  %11744 = vst [vmem:[#allocation41_spill] sm:$0xff] %v10139_v62 }
 0x144   :  { %9366 = vpow2.f32 %v7927_v57  ;;  %v7928_v45 = vmul.f32 -1.442695, %v944_v50  ;;  %v946_v63 = vadd.f32 %v938_v1, %v667_v2  ;;  %v945_v49 = vadd.f32 %v936_v60, %v666_v55  ;;  %v10073_v41 = vld [vmem:[#allocation15 + $0xe0] ss:$16 sps:$4 sm:$0xff]   ;;  %v10089_v55 = vld [vmem:[#allocation15 + $0xa4] ss:$16 sps:$4 sm:$0xff]  }
 0x145   :  { %v900_v44 = vpop.f32.mrf.mxu0  ;;  %v941_v59 = vpop.f32.mrf.mxu1  ;;  %v10083_v2 = vld [vmem:[#allocation15 + $0xc0] ss:$16 sps:$4 sm:$0xff]  }
 0x146   :  { %9368 = vpow2.f32 %v7928_v45  ;;  %v7929_v43 = vmul.f32 -1.442695, %v946_v63  ;;  %v10077_v44 = vld [vmem:[#allocation15 + $0xc4] ss:$16 sps:$4 sm:$0xff]   ;;  %v10079_v59 = vld [vmem:[#allocation15 + $0xcc] ss:$16 sps:$4 sm:$0xff]  }
 0x147   :  { %v10085_v63 = vld [vmem:[#allocation15 + $0xc8] ss:$16 sps:$4 sm:$0xff]  }
 0x148   :  { %9370 = vpow2.f32 %v7929_v43  ;;  %v10091_v43 = vld [vmem:[#allocation15 + $0xac] ss:$16 sps:$4 sm:$0xff]  }
 0x151   :  { %v9367_v48 = vpop.eup %9366 }
 0x152   :  { %v951_v6 = vadd.f32 1.0, %v9367_v48  ;;  %v11735_v48 = vmov 0  }
 0x153   :  { %v9369_v52 = vpop.eup %9368 }
 0x154   :  { %9372 = vrcp.f32 %v951_v6  ;;  %v957_v54 = vadd.f32 1.0, %v9369_v52  ;;  %v10075_v6 = vld [vmem:[#allocation15 + $0xe8] ss:$16 sps:$4 sm:$0xff]  }
 0x155   :  { %9374 = vtanh.f32 %v945_v49  ;;  %v9371_v0 = vpop.eup %9370  ;;  %v10097_v49 = vld [vmem:[#allocation15 + $0xa0] ss:$16 sps:$4 sm:$0xff]   ;;  %v10099_v52 = vld [vmem:[#allocation15 + $0xa8] ss:$16 sps:$4 sm:$0xff]  }
 0x156   :  { %9376 = vrcp.f32 %v957_v54  ;;  %v964_v61 = vadd.f32 1.0, %v9371_v0  ;;  %v10103_v54 = vld [vmem:[#allocation15 + $0x84] ss:$16 sps:$4 sm:$0xff]   ;;  %v10105_v0 = vld [vmem:[#allocation15 + $0x8c] ss:$16 sps:$4 sm:$0xff]  }
 0x158   :  { %9378 = vrcp.f32 %v964_v61  ;;  %v10117_v61 = vld [vmem:[#allocation15 + $0x6c] ss:$16 sps:$4 sm:$0xff]  }
 0x159   :  { %11737 = vst [vmem:[#allocation34_spill] sm:$0xff] %v10117_v61 }
 0x161   :  { %v9373_v56 = vpop.eup %9372 }
 0x162   :  { %v9375_v51 = vpop.eup %9374 }
 0x163   :  { %v9377_v53 = vpop.eup %9376  ;;  %v968_v45 = vmul.f32 %v9375_v51, %v9373_v56  ;;  %v10109_v56 = vld [vmem:[#allocation15 + $0x80] ss:$16 sps:$4 sm:$0xff]   ;;  %v10111_v51 = vld [vmem:[#allocation15 + $0x88] ss:$16 sps:$4 sm:$0xff]  }
 0x164   :  { %v967_v57 = vmul.f32 0.0, %v9377_v53  ;;  %v10115_v53 = vld [vmem:[#allocation15 + $0x64] ss:$16 sps:$4 sm:$0xff]  }
 0x165   :  { %v9379_v60 = vpop.eup %9378  ;;  %11736 = vst [vmem:[#allocation33_spill] sm:$0xff] %v10115_v53 }
 0x166   :  { %v10070_v50 = vadd.f32 %v968_v45, %v967_v57  ;;  %v10121_v57 = vld [vmem:[#allocation15 + $0x60] ss:$16 sps:$4 sm:$0xff]   ;;  %v10123_v45 = vld [vmem:[#allocation15 + $0x68] ss:$16 sps:$4 sm:$0xff]  }
 0x167   :  { %11738 = vst [vmem:[#allocation35_spill] sm:$0xff] %v10121_v57  ;;  %11739 = vst [vmem:[#allocation36_spill] sm:$0xff] %v10123_v45 }
 0x168   :  { %9380 = vtanh.f32 %v10070_v50 }
 0x175   :  { %v9381_v1 = vpop.eup %9380 }
 0x176   :  { %v971_v46 = vmul.f32 %v9381_v1, %v9379_v60  ;;  %v10127_v60 = vld [vmem:[#allocation15 + $0x44] ss:$16 sps:$4 sm:$0xff]   ;;  %v10129_v1 = vld [vmem:[#allocation15 + $0x4c] ss:$16 sps:$4 sm:$0xff]  }
 0x177   :  { %11740 = vst [vmem:[#allocation37_spill] sm:$0xff] %v10127_v60  ;;  %11741 = vst [vmem:[#allocation38_spill] sm:$0xff] %v10129_v1 }
 0x178   :  { %v973_v58 = vpack.c.bf16 %v971_v46, %v971_v46  ;;  %v10133_v46 = vld [vmem:[#allocation15 + $0x40] ss:$16 sps:$4 sm:$0xff]  }
 0x179   :  { %11742 = vst [vmem:[#allocation39_spill] sm:$0xff] %v10133_v46 }
 0x17a   :  { %974 = vst [vmem:[#allocation3] sm:$0xf] %v973_v58  ;;  %1200 = vmatmul.mubr.bf16.vlgmr.msra.gmra.mxu0 %v973_v58  ;;  %1241 = vmatmul.mubr.bf16.vlgmr.msra.gmra.mxu1 %v973_v58  ;;  %v10135_v58 = vld [vmem:[#allocation15 + $0x48] ss:$16 sps:$4 sm:$0xff]  }
 0x17b   :  { %1410 = vmatpush1.bf16.msra.mxu0 %v10073_v41  ;;  %1451 = vmatpush1.bf16.msra.mxu1 %v10075_v6  ;;  %11743 = vst [vmem:[#allocation40_spill] sm:$0xff] %v10135_v58 }
 0x17c   :  { %1411 = vmatprep.subr.bf16.mxu0 %v10077_v44  ;;  %1452 = vmatprep.subr.bf16.mxu1 %v10079_v59 }
 0x17d   :  { %1441 = vmatprep.mubr.bf16.mxu0 %v11735_v48  ;;  %1482 = vmatprep.mubr.bf16.mxu1 %v11735_v48 }
 0x17f   :  { %1412 = vmatpush1.bf16.msra.mxu0 %v10083_v2  ;;  %1453 = vmatpush1.bf16.msra.mxu1 %v10085_v63 }
 0x180   :  { %1413 = vmatprep.subr.bf16.mxu0 %v10089_v55  ;;  %1454 = vmatprep.subr.bf16.mxu1 %v10091_v43 }
 0x183   :  { %1414 = vmatpush1.bf16.msra.mxu0 %v10097_v49  ;;  %1455 = vmatpush1.bf16.msra.mxu1 %v10099_v52 }
 0x184   :  { %1415 = vmatprep.subr.bf16.mxu0 %v10103_v54  ;;  %1456 = vmatprep.subr.bf16.mxu1 %v10105_v0 }
 0x187   :  { %1416 = vmatpush1.bf16.msra.mxu0 %v10109_v56  ;;  %1457 = vmatpush1.bf16.msra.mxu1 %v10111_v51 }
 0x188   :  { %1417 = vmatprep.subr.bf16.mxu0 %v10115_v53  ;;  %1458 = vmatprep.subr.bf16.mxu1 %v10117_v61  ;;  %v9626_v61 = vld [vmem:[#allocation12 + $0xc4] ss:$16 sps:$4 sm:$0xff]  }
 0x189   :  { %v9638_v53 = vld [vmem:[#allocation12 + $0x64] ss:$16 sps:$4 sm:$0xff]  }
 0x18b   :  { %1418 = vmatpush1.bf16.msra.mxu0 %v10121_v57  ;;  %1459 = vmatpush1.bf16.msra.mxu1 %v10123_v45  ;;  %v10147_v57 = vld [vmem:[#allocation15 + $0x28] ss:$16 sps:$4 sm:$0xff]   ;;  %v10151_v45 = vld [vmem:[#allocation15 + $0x4] ss:$16 sps:$4 sm:$0xff]  }
 0x18c   :  { %1419 = vmatprep.subr.bf16.mxu0 %v10127_v60  ;;  %1460 = vmatprep.subr.bf16.mxu1 %v10129_v1  ;;  %11747 = vst [vmem:[#allocation44_spill] sm:$0xff] %v10147_v57  ;;  %11748 = vst [vmem:[#allocation45_spill] sm:$0xff] %v10151_v45  ;;  %v10153_v60 = vld [vmem:[#allocation15 + $0xc] ss:$16 sps:$4 sm:$0xff]   ;;  %v10157_v1 = vld [vmem:[#allocation15] ss:$16 sps:$4 sm:$0xff]  }
 0x18d   :  { %11749 = vst [vmem:[#allocation46_spill] sm:$0xff] %v10153_v60  ;;  %11750 = vst [vmem:[#allocation47_spill] sm:$0xff] %v10157_v1 }
 0x18f   :  { %1420 = vmatpush1.bf16.msra.mxu0 %v10133_v46  ;;  %1461 = vmatpush1.bf16.msra.mxu1 %v10135_v58  ;;  %v10159_v46 = vld [vmem:[#allocation15 + $0x8] ss:$16 sps:$4 sm:$0xff]   ;;  %v9623_v58 = vld [vmem:[#allocation12 + $0xec] ss:$16 sps:$4 sm:$0xff]  }
 0x190   :  { %1421 = vmatprep.subr.bf16.mxu0 %v10139_v62  ;;  %1462 = vmatprep.subr.bf16.mxu1 %v10141_v47  ;;  %11751 = vst [vmem:[#allocation48_spill] sm:$0xff] %v10159_v46  ;;  %v626_v47 = vld [vmem:[#allocation4] sm:$0xf]  ;;  %v9622_v62 = vld [vmem:[#allocation12 + $0xe4] ss:$16 sps:$4 sm:$0xff]  }
 0x193   :  { %1422 = vmatpush1.bf16.msra.mxu0 %v10145_v5  ;;  %1463 = vmatpush1.bf16.msra.mxu1 %v10147_v57  ;;  %v9624_v57 = vld [vmem:[#allocation12 + $0xe0] ss:$16 sps:$4 sm:$0xff]   ;;  %v9625_v5 = vld [vmem:[#allocation12 + $0xe8] ss:$16 sps:$4 sm:$0xff]  }
 0x194   :  { %1423 = vmatprep.subr.bf16.mxu0 %v10151_v45  ;;  %1464 = vmatprep.subr.bf16.mxu1 %v10153_v60  ;;  %v9627_v45 = vld [vmem:[#allocation12 + $0xcc] ss:$16 sps:$4 sm:$0xff]   ;;  %v9637_v60 = vld [vmem:[#allocation12 + $0x88] ss:$16 sps:$4 sm:$0xff]  }
 0x197   :  { %1424 = vmatpush1.bf16.msra.mxu0 %v10157_v1  ;;  %1465 = vmatpush1.bf16.msra.mxu1 %v10159_v46  ;;  %v9628_v46 = vld [vmem:[#allocation12 + $0xc0] ss:$16 sps:$4 sm:$0xff]   ;;  %v9629_v1 = vld [vmem:[#allocation12 + $0xc8] ss:$16 sps:$4 sm:$0xff]  }
 0x198   :  { %1759 = vmatprep.subr.bf16.mxu0 %v9622_v62  ;;  %1800 = vmatprep.subr.bf16.mxu1 %v9623_v58  ;;  %v9630_v62 = vld [vmem:[#allocation12 + $0xa4] ss:$16 sps:$4 sm:$0xff]   ;;  %v9631_v58 = vld [vmem:[#allocation12 + $0xac] ss:$16 sps:$4 sm:$0xff]  }
 0x19a   :  { %1442 = vmatmul.mubr.bf16.vlgmr.msra.gmra.mxu0 %v626_v47  ;;  %1483 = vmatmul.mubr.bf16.vlgmr.msra.gmra.mxu1 %v626_v47  ;;  %v9632_v47 = vld [vmem:[#allocation12 + $0xa0] ss:$16 sps:$4 sm:$0xff]  }
 0x19b   :  { %1760 = vmatpush1.bf16.msra.mxu0 %v9624_v57  ;;  %1801 = vmatpush1.bf16.msra.mxu1 %v9625_v5  ;;  %v9633_v57 = vld [vmem:[#allocation12 + $0xa8] ss:$16 sps:$4 sm:$0xff]   ;;  %v9634_v5 = vld [vmem:[#allocation12 + $0x84] ss:$16 sps:$4 sm:$0xff]  }
 0x19c   :  { %1761 = vmatprep.subr.bf16.mxu0 %v9626_v61  ;;  %1802 = vmatprep.subr.bf16.mxu1 %v9627_v45  ;;  %v9635_v61 = vld [vmem:[#allocation12 + $0x8c] ss:$16 sps:$4 sm:$0xff]   ;;  %v9636_v45 = vld [vmem:[#allocation12 + $0x80] ss:$16 sps:$4 sm:$0xff]  }
 0x19d   :  { %1791 = vmatprep.mubr.bf16.mxu0 %v11735_v48  ;;  %1832 = vmatprep.mubr.bf16.mxu1 %v11735_v48 }
 0x19f   :  { %1762 = vmatpush1.bf16.msra.mxu0 %v9628_v46  ;;  %1803 = vmatpush1.bf16.msra.mxu1 %v9629_v1  ;;  %v9639_v46 = vld [vmem:[#allocation12 + $0x6c] ss:$16 sps:$4 sm:$0xff]   ;;  %v9640_v1 = vld [vmem:[#allocation12 + $0x60] ss:$16 sps:$4 sm:$0xff]  }
 0x1a0   :  { %1763 = vmatprep.subr.bf16.mxu0 %v9630_v62  ;;  %1804 = vmatprep.subr.bf16.mxu1 %v9631_v58  ;;  %v9641_v62 = vld [vmem:[#allocation12 + $0x68] ss:$16 sps:$4 sm:$0xff]   ;;  %v9642_v58 = vld [vmem:[#allocation12 + $0x44] ss:$16 sps:$4 sm:$0xff]  }
 0x1a3   :  { %1764 = vmatpush1.bf16.msra.mxu0 %v9632_v47  ;;  %1805 = vmatpush1.bf16.msra.mxu1 %v9633_v57  ;;  %v9643_v47 = vld [vmem:[#allocation12 + $0x4c] ss:$16 sps:$4 sm:$0xff]   ;;  %v9644_v57 = vld [vmem:[#allocation12 + $0x40] ss:$16 sps:$4 sm:$0xff]  }
 0x1a4   :  { %1765 = vmatprep.subr.bf16.mxu0 %v9634_v5  ;;  %1806 = vmatprep.subr.bf16.mxu1 %v9635_v61  ;;  %v9645_v5 = vld [vmem:[#allocation12 + $0x48] ss:$16 sps:$4 sm:$0xff]   ;;  %v9646_v61 = vld [vmem:[#allocation12 + $0x24] ss:$16 sps:$4 sm:$0xff]  }
 0x1a7   :  { %1766 = vmatpush1.bf16.msra.mxu0 %v9636_v45  ;;  %1807 = vmatpush1.bf16.msra.mxu1 %v9637_v60  ;;  %v9647_v45 = vld [vmem:[#allocation12 + $0x2c] ss:$16 sps:$4 sm:$0xff]   ;;  %v9648_v60 = vld [vmem:[#allocation12 + $0x20] ss:$16 sps:$4 sm:$0xff]  }
 0x1a8   :  { %1767 = vmatprep.subr.bf16.mxu0 %v9638_v53  ;;  %1808 = vmatprep.subr.bf16.mxu1 %v9639_v46  ;;  %v9649_v53 = vld [vmem:[#allocation12 + $0x28] ss:$16 sps:$4 sm:$0xff]   ;;  %v9650_v46 = vld [vmem:[#allocation12 + $0x4] ss:$16 sps:$4 sm:$0xff]  }
 0x1ab   :  { %1768 = vmatpush1.bf16.msra.mxu0 %v9640_v1  ;;  %1809 = vmatpush1.bf16.msra.mxu1 %v9641_v62  ;;  %v9651_v1 = vld [vmem:[#allocation12 + $0xc] ss:$16 sps:$4 sm:$0xff]   ;;  %v9652_v62 = vld [vmem:[#allocation12] ss:$16 sps:$4 sm:$0xff]  }
 0x1ac   :  { %1769 = vmatprep.subr.bf16.mxu0 %v9642_v58  ;;  %1810 = vmatprep.subr.bf16.mxu1 %v9643_v47  ;;  %v9653_v58 = vld [vmem:[#allocation12 + $0x8] ss:$16 sps:$4 sm:$0xff]  }
 0x1ad   :  { %v1566_v47 = vld [vmem:[#allocation3] sm:$0xf] }
 0x1af   :  { %1770 = vmatpush1.bf16.msra.mxu0 %v9644_v57  ;;  %1811 = vmatpush1.bf16.msra.mxu1 %v9645_v5 }
 0x1b0   :  { %1771 = vmatprep.subr.bf16.mxu0 %v9646_v61  ;;  %1812 = vmatprep.subr.bf16.mxu1 %v9647_v45 }
 0x1b3   :  { %1772 = vmatpush1.bf16.msra.mxu0 %v9648_v60  ;;  %1813 = vmatpush1.bf16.msra.mxu1 %v9649_v53 }
 0x1b4   :  { %1773 = vmatprep.subr.bf16.mxu0 %v9650_v46  ;;  %1814 = vmatprep.subr.bf16.mxu1 %v9651_v1  ;;  %v1562_v46 = vunpack.c.l.bf16 %v10012_v3 }
 0x1b7   :  { %1774 = vmatpush1.bf16.msra.mxu0 %v9652_v62  ;;  %1815 = vmatpush1.bf16.msra.mxu1 %v9653_v58 }
 0x1b8   :  { %2065 = vmatprep.subr.bf16.mxu0 %v9877_v7  ;;  %2106 = vmatprep.subr.bf16.mxu1 %v9879_v8 }
 0x1ba   :  { %1792 = vmatmul.mubr.bf16.vlgmr.msra.gmra.mxu0 %v1566_v47  ;;  %1833 = vmatmul.mubr.bf16.vlgmr.msra.gmra.mxu1 %v1566_v47 }
 0x1bb   :  { %2066 = vmatpush1.bf16.msra.mxu0 %v9881_v9  ;;  %2107 = vmatpush1.bf16.msra.mxu1 %v9883_v10 }
 0x1bc   :  { %2067 = vmatprep.subr.bf16.mxu0 %v9889_v11  ;;  %2108 = vmatprep.subr.bf16.mxu1 %v9891_v12 }
 0x1bd   :  { %2097 = vmatprep.mubr.bf16.mxu0 %v11735_v48  ;;  %2138 = vmatprep.mubr.bf16.mxu1 %v11735_v48 }
 0x1bf   :  { %2068 = vmatpush1.bf16.msra.mxu0 %v9893_v13  ;;  %2109 = vmatpush1.bf16.msra.mxu1 %v9895_v14 }
 0x1c0   :  { %2069 = vmatprep.subr.bf16.mxu0 %v9901_v15  ;;  %2110 = vmatprep.subr.bf16.mxu1 %v9903_v16  ;;  %v604_v15 = vld [vmem:[%s11567_s6] sm:$0xf]  ;;  %v11752_v16 = vsub.s32 0, %v9979_v42  ;;  %s9792_s6 = smov [#allocation16]  }
 0x1c1   :  { %s7822_s28 = sshll.u32 %s9792_s6, 4  ;;  %s7823_s28 = int_to_ptr.vmem [resolvable:$true] %s7822_s28 }
 0x1c2   :  { %s9754_s29 = scalar_lea.vmem %s7823_s28, 512  ;;  %p9759_p12 = scmp.lt.s32.totalorder %s7823_s28, %s7823_s28 }
 0x1c3   :  { %2070 = vmatpush1.bf16.msra.mxu0 %v9905_v17  ;;  %2111 = vmatpush1.bf16.msra.mxu1 %v9907_v18  ;;  %v10208_v17 = vrot.slane %v604_v15, %v11752_v16  ;;  %p9755_p11 = scmp.ne.s32.totalorder %s7823_s28, %s9754_s29  ;;  %p9760_p13 = scmp.lt.s32.totalorder %s9754_s29, %s9754_s29 }
 0x1c4   :  { %2071 = vmatprep.subr.bf16.mxu0 %v9913_v19  ;;  %2112 = vmatprep.subr.bf16.mxu1 %v9915_v20 }
 0x1c5   :  { %p9761_p0 = por %p9760_p13, %p9759_p12 }
 0x1c7   :  { %2072 = vmatpush1.bf16.msra.mxu0 %v9917_v21  ;;  %2113 = vmatpush1.bf16.msra.mxu1 %v9919_v22  ;;  %v11753_v21 = vsub.s32 1, %v9979_v42  ;;  %p9762_p1 = pnand %p9761_p0, %p9755_p11 }
 0x1c8   :  { %2073 = vmatprep.subr.bf16.mxu0 %v9927_v24  ;;  %2114 = vmatprep.subr.bf16.mxu1 %v9931_v26 }
 0x1c9   :  { %v10212_v22 = vrot.slane %v604_v15, %v11753_v21 }
 0x1cb   :  { %2074 = vmatpush1.bf16.msra.mxu0 %v9925_v23  ;;  %2115 = vmatpush1.bf16.msra.mxu1 %v9929_v25 }
 0x1cc   :  { %2075 = vmatprep.subr.bf16.mxu0 %v9933_v27  ;;  %2116 = vmatprep.subr.bf16.mxu1 %v9936_v28 }
 0x1cf   :  { %2076 = vmatpush1.bf16.msra.mxu0 %v9940_v29  ;;  %2117 = vmatpush1.bf16.msra.mxu1 %v9944_v30 }
 0x1d0   :  { %2077 = vmatprep.subr.bf16.mxu0 %v9946_v31  ;;  %2118 = vmatprep.subr.bf16.mxu1 %v9949_v32 }
 0x1d3   :  { %2078 = vmatpush1.bf16.msra.mxu0 %v9952_v33  ;;  %2119 = vmatpush1.bf16.msra.mxu1 %v9956_v34  ;;  %v11754_v34 = vsub.s32 3, %v9979_v42 }
 0x1d4   :  { %2079 = vmatprep.subr.bf16.mxu0 %v9958_v35  ;;  %2120 = vmatprep.subr.bf16.mxu1 %v9961_v36 }
 0x1d5   :  { %v10218_v35 = vrot.slane %v604_v15, %v11754_v34 }
 0x1d7   :  { %2080 = vmatpush1.bf16.msra.mxu0 %v9964_v37  ;;  %2121 = vmatpush1.bf16.msra.mxu1 %v9968_v38  ;;  %v11755_v38 = vsub.s32 2, %v9979_v42  ;;  %v1563_v42 = vunpack.c.h.bf16 %v10012_v3  ;;  %v1565_v3 = vunpack.c.h.bf16 %v10014_v4 }
 0x1d8   :  { %2307 = vmatprep.subr.bf16.mxu0 %v9970_v39  ;;  %2348 = vmatprep.subr.bf16.mxu1 %v9973_v40 }
 0x1d9   :  { %v10223_v39 = vrot.slane %v604_v15, %v11755_v38 }
 0x23a   :  { %v1201_v7 = vpop.f32.mrf.mxu0  ;;  %v1242_v8 = vpop.f32.mrf.mxu1 }
 0x23c   :  { %v1203_v9 = vpop.f32.mrf.mxu0  ;;  %v1244_v10 = vpop.f32.mrf.mxu1 }
 0x23e   :  { %v1205_v11 = vpop.f32.mrf.mxu0  ;;  %v1246_v12 = vpop.f32.mrf.mxu1 }
 0x240   :  { %v1206_v13 = vpop.f32.mrf.mxu0  ;;  %v1247_v14 = vpop.f32.mrf.mxu1 }
 0x25a   :  { %v1443_v18 = vpop.f32.mrf.mxu0  ;;  %v1484_v19 = vpop.f32.mrf.mxu1 }
 0x25b   :  { %v1444_v20 = vadd.f32 %v1443_v18, %v1201_v7  ;;  %v1485_v40 = vadd.f32 %v1484_v19, %v1242_v8 }
 0x25c   :  { %v1445_v23 = vpop.f32.mrf.mxu0  ;;  %v1486_v24 = vpop.f32.mrf.mxu1 }
 0x25d   :  { %v1491_v25 = vadd.f32 %v1444_v20, %v10208_v17  ;;  %v1446_v26 = vadd.f32 %v1445_v23, %v1203_v9  ;;  %v1487_v36 = vadd.f32 %v1486_v24, %v1244_v10  ;;  %v1493_v61 = vadd.f32 %v1485_v40, %v10223_v39 }
 0x25e   :  { %v1447_v27 = vpop.f32.mrf.mxu0  ;;  %v1488_v28 = vpop.f32.mrf.mxu1 }
 0x25f   :  { %v7994_v29 = vmul.f32 -1.442695, %v1491_v25  ;;  %v1492_v30 = vadd.f32 %v1446_v26, %v10212_v22  ;;  %v1494_v37 = vadd.f32 %v1487_v36, %v10218_v35  ;;  %v1564_v26 = vunpack.c.l.bf16 %v10014_v4 }
 0x260   :  { %v1448_v31 = vpop.f32.mrf.mxu0  ;;  %v1489_v32 = vpop.f32.mrf.mxu1 }
 0x261   :  { %9382 = vpow2.f32 %v7994_v29  ;;  %v7995_v33 = vmul.f32 -1.442695, %v1492_v30  ;;  %v7996_v57 = vmul.f32 -1.442695, %v1494_v37 }
 0x263   :  { %9384 = vpow2.f32 %v7995_v33 }
 0x264   :  { %9386 = vpow2.f32 %v7996_v57 }
 0x26e   :  { %v9383_v5 = vpop.eup %9382 }
 0x26f   :  { %v1499_v45 = vadd.f32 1.0, %v9383_v5 }
 0x270   :  { %v9385_v60 = vpop.eup %9384 }
 0x271   :  { %9388 = vrcp.f32 %v1499_v45  ;;  %v1505_v53 = vadd.f32 1.0, %v9385_v60  ;;  %v9387_v8 = vpop.eup %9386 }
 0x272   :  { %9390 = vtanh.f32 %v1493_v61  ;;  %v1512_v18 = vadd.f32 1.0, %v9387_v8  ;;  %v10275_v8 = vld [vmem:[#allocation12 + $0xe8] ss:$16 sps:$4 sm:$0xff]  }
 0x273   :  { %9392 = vrcp.f32 %v1505_v53 }
 0x27a   :  { %v1793_v1 = vpop.f32.mrf.mxu0  ;;  %v1834_v62 = vpop.f32.mrf.mxu1 }
 0x27b   :  { %v1841_v58 = vadd.f32 %v1793_v1, %v1562_v46  ;;  %v1843_v27 = vadd.f32 %v1834_v62, %v1564_v26  ;;  %v10323_v26 = vld [vmem:[#allocation12 + $0x60] ss:$16 sps:$4 sm:$0xff]  }
 0x27c   :  { %v1795_v47 = vpop.f32.mrf.mxu0  ;;  %v1836_v7 = vpop.f32.mrf.mxu1 }
 0x27d   :  { %v8029_v9 = vmul.f32 -1.442695, %v1841_v58  ;;  %v1842_v10 = vadd.f32 %v1795_v47, %v1563_v42  ;;  %v1844_v25 = vadd.f32 %v1836_v7, %v1565_v3  ;;  %v10269_v58 = vld [vmem:[#allocation12 + $0xec] ss:$16 sps:$4 sm:$0xff]   ;;  %v11770_v42 = vld [vmem:[#allocation47_spill] sm:$0xff] }
 0x27e   :  { %v9389_v11 = vpop.eup %9388  ;;  %v1797_v12 = vpop.f32.mrf.mxu0  ;;  %v11771_v47 = vld [vmem:[#allocation48_spill] sm:$0xff]  ;;  %v10273_v7 = vld [vmem:[#allocation12 + $0xe0] ss:$16 sps:$4 sm:$0xff]   ;;  %v10317_v3 = vld [vmem:[#allocation12 + $0x64] ss:$16 sps:$4 sm:$0xff]  }
 0x27f   :  { %v1838_v13 = vpop.f32.mrf.mxu1  ;;  %v9391_v14 = vpop.eup %9390  ;;  %9394 = vpow2.f32 %v8029_v9  ;;  %v8030_v15 = vmul.f32 -1.442695, %v1842_v10  ;;  %v8031_v28 = vmul.f32 -1.442695, %v1844_v25  ;;  %v10279_v9 = vld [vmem:[#allocation12 + $0xc4] ss:$16 sps:$4 sm:$0xff]  }
 0x280   :  { %v9393_v16 = vpop.eup %9392  ;;  %v1798_v19 = vpop.f32.mrf.mxu0  ;;  %v1516_v23 = vmul.f32 %v9391_v14, %v9389_v11  ;;  %v10281_v10 = vld [vmem:[#allocation12 + $0xcc] ss:$16 sps:$4 sm:$0xff]   ;;  %v10285_v12 = vld [vmem:[#allocation12 + $0xc0] ss:$16 sps:$4 sm:$0xff]   ;;  %v10287_v13 = vld [vmem:[#allocation12 + $0xc8] ss:$16 sps:$4 sm:$0xff]  }
 0x281   :  { %v1839_v20 = vpop.f32.mrf.mxu1  ;;  %v1515_v21 = vmul.f32 0.0, %v9393_v16  ;;  %9396 = vpow2.f32 %v8030_v15  ;;  %v10291_v14 = vld [vmem:[#allocation12 + $0xa4] ss:$16 sps:$4 sm:$0xff]   ;;  %v10293_v15 = vld [vmem:[#allocation12 + $0xac] ss:$16 sps:$4 sm:$0xff]  }
 0x282   :  { %9398 = vrcp.f32 %v1512_v18  ;;  %v10299_v16 = vld [vmem:[#allocation12 + $0xa0] ss:$16 sps:$4 sm:$0xff]   ;;  %v10301_v18 = vld [vmem:[#allocation12 + $0xa8] ss:$16 sps:$4 sm:$0xff]   ;;  %v10305_v19 = vld [vmem:[#allocation12 + $0x84] ss:$16 sps:$4 sm:$0xff]  }
 0x283   :  { %v10228_v24 = vadd.f32 %v1516_v23, %v1515_v21  ;;  %v10307_v20 = vld [vmem:[#allocation12 + $0x8c] ss:$16 sps:$4 sm:$0xff]   ;;  %v10311_v21 = vld [vmem:[#allocation12 + $0x80] ss:$16 sps:$4 sm:$0xff]   ;;  %v10313_v23 = vld [vmem:[#allocation12 + $0x88] ss:$16 sps:$4 sm:$0xff]  }
 0x284   :  { %v10319_v25 = vld [vmem:[#allocation12 + $0x6c] ss:$16 sps:$4 sm:$0xff]  }
 0x285   :  { %9400 = vtanh.f32 %v10228_v24 }
 0x286   :  { %9402 = vtanh.f32 %v1843_v27  ;;  %v10325_v27 = vld [vmem:[#allocation12 + $0x68] ss:$16 sps:$4 sm:$0xff]  }
 0x287   :  { %9404 = vpow2.f32 %v8031_v28  ;;  %v10329_v28 = vld [vmem:[#allocation12 + $0x44] ss:$16 sps:$4 sm:$0xff]  }
 0x28c   :  { %v9395_v29 = vpop.eup %9394 }
 0x28d   :  { %v1849_v30 = vadd.f32 1.0, %v9395_v29  ;;  %v10331_v29 = vld [vmem:[#allocation12 + $0x4c] ss:$16 sps:$4 sm:$0xff]  }
 0x28e   :  { %v9397_v31 = vpop.eup %9396 }
 0x28f   :  { %9406 = vrcp.f32 %v1849_v30  ;;  %v1855_v32 = vadd.f32 1.0, %v9397_v31  ;;  %v9399_v33 = vpop.eup %9398  ;;  %v10335_v30 = vld [vmem:[#allocation12 + $0x40] ss:$16 sps:$4 sm:$0xff]   ;;  %v10337_v31 = vld [vmem:[#allocation12 + $0x48] ss:$16 sps:$4 sm:$0xff]  }
 0x291   :  { %9408 = vrcp.f32 %v1855_v32  ;;  %v10341_v32 = vld [vmem:[#allocation12 + $0x24] ss:$16 sps:$4 sm:$0xff]  }
 0x292   :  { %v9401_v34 = vpop.eup %9400 }
 0x293   :  { %v1519_v36 = vmul.f32 %v9401_v34, %v9399_v33  ;;  %v9403_v38 = vpop.eup %9402  ;;  %v10343_v33 = vld [vmem:[#allocation12 + $0x2c] ss:$16 sps:$4 sm:$0xff]   ;;  %v10347_v34 = vld [vmem:[#allocation12 + $0x20] ss:$16 sps:$4 sm:$0xff]  }
 0x294   :  { %v9405_v40 = vpop.eup %9404 }
 0x295   :  { %v1521_v37 = vpack.c.bf16 %v1519_v36, %v1519_v36  ;;  %v1862_v61 = vadd.f32 1.0, %v9405_v40  ;;  %v10349_v36 = vld [vmem:[#allocation12 + $0x28] ss:$16 sps:$4 sm:$0xff]   ;;  %v10359_v40 = vld [vmem:[#allocation12] ss:$16 sps:$4 sm:$0xff]  }
 0x297   :  { %1522 = vst [vmem:[#allocation4] sm:$0xf] %v1521_v37  ;;  %1523 = vst [vmem:[#allocation16] sm:$0xf] %v1521_v37  ;;  %9410 = vrcp.f32 %v1862_v61  ;;  %v10353_v37 = vld [vmem:[#allocation12 + $0x4] ss:$16 sps:$4 sm:$0xff]  }
 0x298   :  { %v10371_v61 = vld [vmem:[#allocation13 + $0xec] ss:$16 sps:$4 sm:$0xff]  }
 0x29c   :  { %v9407_v57 = vpop.eup %9406 }
 0x29d   :  { %v1866_v4 = vmul.f32 %v9407_v57, %v9403_v38  ;;  %v10355_v38 = vld [vmem:[#allocation12 + $0xc] ss:$16 sps:$4 sm:$0xff]   ;;  %v10361_v57 = vld [vmem:[#allocation12 + $0x8] ss:$16 sps:$4 sm:$0xff]  }
 0x29e   :  { %v9409_v5 = vpop.eup %9408  ;;  %v1524_v11 = vld [vmem:[#allocation4] sm:$0xf] }
 0x29f   :  { %v1865_v45 = vmul.f32 %v9409_v5, %v10070_v50  ;;  %v11756_v50 = vld [vmem:[#allocation33_spill] sm:$0xff] }
 0x2a0   :  { %v10369_v5 = vld [vmem:[#allocation13 + $0xe4] ss:$16 sps:$4 sm:$0xff]  }
 0x2a1   :  { %v10234_v60 = vadd.f32 %v1866_v4, %v1865_v45  ;;  %v10373_v45 = vld [vmem:[#allocation13 + $0xe0] ss:$16 sps:$4 sm:$0xff]  }
 0x2a3   :  { %9412 = vtanh.f32 %v10234_v60 }
 0x2a4   :  { %v9411_v53 = vpop.eup %9410 }
 0x2b0   :  { %v9413_v46 = vpop.eup %9412 }
 0x2b1   :  { %v1869_v1 = vmul.f32 %v9413_v46, %v9411_v53  ;;  %v10375_v53 = vld [vmem:[#allocation13 + $0xe8] ss:$16 sps:$4 sm:$0xff]   ;;  %v10381_v46 = vld [vmem:[#allocation13 + $0xc4] ss:$16 sps:$4 sm:$0xff]  }
 0x2b2   :  { %11772 = vst [vmem:[#allocation33_spill] sm:$0xff] %v10375_v53 }
 0x2b3   :  { %v1871_v62 = vpack.c.bf16 %v1869_v1, %v1869_v1  ;;  %v10383_v1 = vld [vmem:[#allocation13 + $0xcc] ss:$16 sps:$4 sm:$0xff]  }
 0x2b5   :  { %1872 = vst [vmem:[#allocation3] sm:$0xf] %v1871_v62  ;;  %2098 = vmatmul.mubr.bf16.vlgmr.msra.gmra.mxu0 %v1871_v62  ;;  %2139 = vmatmul.mubr.bf16.vlgmr.msra.gmra.mxu1 %v1871_v62  ;;  %v10385_v62 = vld [vmem:[#allocation13 + $0xc0] ss:$16 sps:$4 sm:$0xff]  }
 0x2b6   :  { %2308 = vmatpush1.bf16.msra.mxu0 %v10073_v41  ;;  %2349 = vmatpush1.bf16.msra.mxu1 %v10075_v6  ;;  %v11757_v41 = vld [vmem:[#allocation34_spill] sm:$0xff]  ;;  %v11758_v6 = vld [vmem:[#allocation35_spill] sm:$0xff] }
 0x2b7   :  { %2309 = vmatprep.subr.bf16.mxu0 %v10077_v44  ;;  %2350 = vmatprep.subr.bf16.mxu1 %v10079_v59  ;;  %v11759_v44 = vld [vmem:[#allocation36_spill] sm:$0xff]  ;;  %v11760_v59 = vld [vmem:[#allocation37_spill] sm:$0xff]  ;;  %11773 = vst [vmem:[#allocation34_spill] sm:$0xff] %v10381_v46  ;;  %11774 = vst [vmem:[#allocation35_spill] sm:$0xff] %v10383_v1 }
 0x2b8   :  { %2339 = vmatprep.mubr.bf16.mxu0 %v11735_v48  ;;  %2380 = vmatprep.mubr.bf16.mxu1 %v11735_v48  ;;  %11775 = vst [vmem:[#allocation36_spill] sm:$0xff] %v10385_v62 }
 0x2ba   :  { %2310 = vmatpush1.bf16.msra.mxu0 %v10083_v2  ;;  %2351 = vmatpush1.bf16.msra.mxu1 %v10085_v63  ;;  %v11761_v2 = vld [vmem:[#allocation38_spill] sm:$0xff]  ;;  %v11762_v63 = vld [vmem:[#allocation39_spill] sm:$0xff] }
 0x2bb   :  { %2311 = vmatprep.subr.bf16.mxu0 %v10089_v55  ;;  %2352 = vmatprep.subr.bf16.mxu1 %v10091_v43  ;;  %v11763_v55 = vld [vmem:[#allocation40_spill] sm:$0xff]  ;;  %v11764_v43 = vld [vmem:[#allocation41_spill] sm:$0xff] }
 0x2bc   :  { %v2465_v4 = vld [vmem:[#allocation3] sm:$0xf] }
 0x2be   :  { %2312 = vmatpush1.bf16.msra.mxu0 %v10097_v49  ;;  %2353 = vmatpush1.bf16.msra.mxu1 %v10099_v52  ;;  %v11765_v49 = vld [vmem:[#allocation42_spill] sm:$0xff]  ;;  %v11766_v52 = vld [vmem:[#allocation43_spill] sm:$0xff] }
 0x2bf   :  { %2313 = vmatprep.subr.bf16.mxu0 %v10103_v54  ;;  %2354 = vmatprep.subr.bf16.mxu1 %v10105_v0  ;;  %v11767_v54 = vld [vmem:[#allocation44_spill] sm:$0xff]  ;;  %v11768_v0 = vld [vmem:[#allocation45_spill] sm:$0xff] }
 0x2c2   :  { %2314 = vmatpush1.bf16.msra.mxu0 %v10109_v56  ;;  %2355 = vmatpush1.bf16.msra.mxu1 %v10111_v51  ;;  %v11769_v56 = vld [vmem:[#allocation46_spill] sm:$0xff]  ;;  %v10267_v51 = vld [vmem:[#allocation12 + $0xe4] ss:$16 sps:$4 sm:$0xff]  }
 0x2c3   :  { %2315 = vmatprep.subr.bf16.mxu0 %v11756_v50  ;;  %2356 = vmatprep.subr.bf16.mxu1 %v11757_v41  ;;  %v10387_v50 = vld [vmem:[#allocation13 + $0xc8] ss:$16 sps:$4 sm:$0xff]   ;;  %v10393_v41 = vld [vmem:[#allocation13 + $0xa4] ss:$16 sps:$4 sm:$0xff]  }
 0x2c4   :  { %11776 = vst [vmem:[#allocation37_spill] sm:$0xff] %v10387_v50  ;;  %11777 = vst [vmem:[#allocation38_spill] sm:$0xff] %v10393_v41 }
 0x2c6   :  { %2316 = vmatpush1.bf16.msra.mxu0 %v11758_v6  ;;  %2357 = vmatpush1.bf16.msra.mxu1 %v11759_v44  ;;  %v10395_v6 = vld [vmem:[#allocation13 + $0xac] ss:$16 sps:$4 sm:$0xff]   ;;  %v10397_v44 = vld [vmem:[#allocation13 + $0xa0] ss:$16 sps:$4 sm:$0xff]  }
 0x2c7   :  { %2317 = vmatprep.subr.bf16.mxu0 %v11760_v59  ;;  %2358 = vmatprep.subr.bf16.mxu1 %v11761_v2  ;;  %11778 = vst [vmem:[#allocation39_spill] sm:$0xff] %v10395_v6  ;;  %11779 = vst [vmem:[#allocation40_spill] sm:$0xff] %v10397_v44  ;;  %v10399_v59 = vld [vmem:[#allocation13 + $0xa8] ss:$16 sps:$4 sm:$0xff]   ;;  %v10405_v2 = vld [vmem:[#allocation13 + $0x84] ss:$16 sps:$4 sm:$0xff]  }
 0x2c8   :  { %11780 = vst [vmem:[#allocation41_spill] sm:$0xff] %v10399_v59  ;;  %11781 = vst [vmem:[#allocation42_spill] sm:$0xff] %v10405_v2 }
 0x2ca   :  { %2318 = vmatpush1.bf16.msra.mxu0 %v11762_v63  ;;  %2359 = vmatpush1.bf16.msra.mxu1 %v11763_v55  ;;  %v10407_v63 = vld [vmem:[#allocation13 + $0x8c] ss:$16 sps:$4 sm:$0xff]   ;;  %v10409_v55 = vld [vmem:[#allocation13 + $0x80] ss:$16 sps:$4 sm:$0xff]  }
 0x2cb   :  { %2319 = vmatprep.subr.bf16.mxu0 %v11764_v43  ;;  %2360 = vmatprep.subr.bf16.mxu1 %v11765_v49  ;;  %11782 = vst [vmem:[#allocation43_spill] sm:$0xff] %v10407_v63  ;;  %11783 = vst [vmem:[#allocation44_spill] sm:$0xff] %v10409_v55  ;;  %v10411_v43 = vld [vmem:[#allocation13 + $0x88] ss:$16 sps:$4 sm:$0xff]   ;;  %v10415_v49 = vld [vmem:[#allocation13 + $0x64] ss:$16 sps:$4 sm:$0xff]  }
 0x2cc   :  { %11784 = vst [vmem:[#allocation45_spill] sm:$0xff] %v10411_v43  ;;  %11785 = vst [vmem:[#allocation46_spill] sm:$0xff] %v10415_v49 }
 0x2ce   :  { %2320 = vmatpush1.bf16.msra.mxu0 %v11766_v52  ;;  %2361 = vmatpush1.bf16.msra.mxu1 %v11767_v54  ;;  %v10419_v52 = vld [vmem:[#allocation13 + $0x60] ss:$16 sps:$4 sm:$0xff]   ;;  %v10421_v54 = vld [vmem:[#allocation13 + $0x68] ss:$16 sps:$4 sm:$0xff]  }
 0x2cf   :  { %2321 = vmatprep.subr.bf16.mxu0 %v11768_v0  ;;  %2362 = vmatprep.subr.bf16.mxu1 %v11769_v56  ;;  %11786 = vst [vmem:[#allocation47_spill] sm:$0xff] %v10419_v52  ;;  %11787 = vst [vmem:[#allocation48_spill] sm:$0xff] %v10421_v54  ;;  %v10423_v0 = vld [vmem:[#allocation13 + $0x6c] ss:$16 sps:$4 sm:$0xff]   ;;  %v10426_v56 = vld [vmem:[#allocation13 + $0x44] ss:$16 sps:$4 sm:$0xff]  }
 0x2d0   :  { %11788 = vst [vmem:[#allocation49_spill] sm:$0xff] %v10423_v0  ;;  %11789 = vst [vmem:[#allocation50_spill] sm:$0xff] %v10426_v56 }
 0x2d2   :  { %2322 = vmatpush1.bf16.msra.mxu0 %v11770_v42  ;;  %2363 = vmatpush1.bf16.msra.mxu1 %v11771_v47  ;;  %v10428_v42 = vld [vmem:[#allocation13 + $0x4c] ss:$16 sps:$4 sm:$0xff]   ;;  %v10433_v47 = vld [vmem:[#allocation13 + $0x40] ss:$16 sps:$4 sm:$0xff]  }
 0x2d3   :  { %2658 = vmatprep.subr.bf16.mxu0 %v10267_v51  ;;  %2699 = vmatprep.subr.bf16.mxu1 %v10269_v58  ;;  %11790 = vst [vmem:[#allocation51_spill] sm:$0xff] %v10428_v42  ;;  %11791 = vst [vmem:[#allocation52_spill] sm:$0xff] %v10433_v47 }
 0x2d5   :  { %2340 = vmatmul.mubr.bf16.vlgmr.msra.gmra.mxu0 %v1524_v11  ;;  %2381 = vmatmul.mubr.bf16.vlgmr.msra.gmra.mxu1 %v1524_v11  ;;  %v10435_v11 = vld [vmem:[#allocation13 + $0x48] ss:$16 sps:$4 sm:$0xff]  }
 0x2d6   :  { %2659 = vmatpush1.bf16.msra.mxu0 %v10273_v7  ;;  %2700 = vmatpush1.bf16.msra.mxu1 %v10275_v8  ;;  %11792 = vst [vmem:[#allocation53_spill] sm:$0xff] %v10435_v11 }
 0x2d7   :  { %2660 = vmatprep.subr.bf16.mxu0 %v10279_v9  ;;  %2701 = vmatprep.subr.bf16.mxu1 %v10281_v10 }
 0x2d8   :  { %2690 = vmatprep.mubr.bf16.mxu0 %v11735_v48  ;;  %2731 = vmatprep.mubr.bf16.mxu1 %v11735_v48 }
 0x2da   :  { %2661 = vmatpush1.bf16.msra.mxu0 %v10285_v12  ;;  %2702 = vmatpush1.bf16.msra.mxu1 %v10287_v13 }
 0x2db   :  { %2662 = vmatprep.subr.bf16.mxu0 %v10291_v14  ;;  %2703 = vmatprep.subr.bf16.mxu1 %v10293_v15 }
 0x2de   :  { %2663 = vmatpush1.bf16.msra.mxu0 %v10299_v16  ;;  %2704 = vmatpush1.bf16.msra.mxu1 %v10301_v18 }
 0x2df   :  { %2664 = vmatprep.subr.bf16.mxu0 %v10305_v19  ;;  %2705 = vmatprep.subr.bf16.mxu1 %v10307_v20 }
 0x2e2   :  { %2665 = vmatpush1.bf16.msra.mxu0 %v10311_v21  ;;  %2706 = vmatpush1.bf16.msra.mxu1 %v10313_v23 }
 0x2e3   :  { %2666 = vmatprep.subr.bf16.mxu0 %v10317_v3  ;;  %2707 = vmatprep.subr.bf16.mxu1 %v10319_v25 }
 0x2e6   :  { %2667 = vmatpush1.bf16.msra.mxu0 %v10323_v26  ;;  %2708 = vmatpush1.bf16.msra.mxu1 %v10325_v27 }
 0x2e7   :  { %2668 = vmatprep.subr.bf16.mxu0 %v10329_v28  ;;  %2709 = vmatprep.subr.bf16.mxu1 %v10331_v29 }
 0x2ea   :  { %2669 = vmatpush1.bf16.msra.mxu0 %v10335_v30  ;;  %2710 = vmatpush1.bf16.msra.mxu1 %v10337_v31 }
 0x2eb   :  { %2670 = vmatprep.subr.bf16.mxu0 %v10341_v32  ;;  %2711 = vmatprep.subr.bf16.mxu1 %v10343_v33 }
 0x2ee   :  { %2671 = vmatpush1.bf16.msra.mxu0 %v10347_v34  ;;  %2712 = vmatpush1.bf16.msra.mxu1 %v10349_v36 }
 0x2ef   :  { %2672 = vmatprep.subr.bf16.mxu0 %v10353_v37  ;;  %2713 = vmatprep.subr.bf16.mxu1 %v10355_v38 }
 0x2f2   :  { %2673 = vmatpush1.bf16.msra.mxu0 %v10359_v40  ;;  %2714 = vmatpush1.bf16.msra.mxu1 %v10361_v57 }
 0x2f3   :  { %2964 = vmatprep.subr.bf16.mxu0 %v10369_v5  ;;  %3005 = vmatprep.subr.bf16.mxu1 %v10371_v61 }
 0x2f5   :  { %2691 = vmatmul.mubr.bf16.vlgmr.msra.gmra.mxu0 %v2465_v4  ;;  %2732 = vmatmul.mubr.bf16.vlgmr.msra.gmra.mxu1 %v2465_v4  ;;  %v10439_v4 = vld [vmem:[#allocation13 + $0x24] ss:$16 sps:$4 sm:$0xff]  }
 0x2f6   :  { %2996 = vmatprep.mubr.bf16.mxu0 %v11735_v48  ;;  %3037 = vmatprep.mubr.bf16.mxu1 %v11735_v48  ;;  %11793 = vst [vmem:[#allocation54_spill] sm:$0xff] %v10439_v4 }
 0x2f7   :  { %2965 = vmatpush1.bf16.msra.mxu0 %v10373_v45  ;;  %3006 = vmatpush1.bf16.msra.mxu1 %v10375_v53 }
 0x2f8   :  { %2966 = vmatprep.subr.bf16.mxu0 %v10381_v46  ;;  %3007 = vmatprep.subr.bf16.mxu1 %v10383_v1 }
 0x2fb   :  { %2967 = vmatpush1.bf16.msra.mxu0 %v10385_v62  ;;  %3008 = vmatpush1.bf16.msra.mxu1 %v10387_v50 }
 0x2fc   :  { %2968 = vmatprep.subr.bf16.mxu0 %v10393_v41  ;;  %3009 = vmatprep.subr.bf16.mxu1 %v10395_v6 }
 0x2ff   :  { %2969 = vmatpush1.bf16.msra.mxu0 %v10397_v44  ;;  %3010 = vmatpush1.bf16.msra.mxu1 %v10399_v59 }
 0x300   :  { %2970 = vmatprep.subr.bf16.mxu0 %v10405_v2  ;;  %3011 = vmatprep.subr.bf16.mxu1 %v10407_v63 }
 0x303   :  { %2971 = vmatpush1.bf16.msra.mxu0 %v10409_v55  ;;  %3012 = vmatpush1.bf16.msra.mxu1 %v10411_v43 }
 0x304   :  { %2972 = vmatprep.subr.bf16.mxu0 %v10415_v49  ;;  %3013 = vmatprep.subr.bf16.mxu1 %v10423_v0  ;;  %v10441_v49 = vld [vmem:[#allocation13 + $0x2c] ss:$16 sps:$4 sm:$0xff]   ;;  %v10445_v0 = vld [vmem:[#allocation13 + $0x20] ss:$16 sps:$4 sm:$0xff]  }
 0x305   :  { %11794 = vst [vmem:[#allocation55_spill] sm:$0xff] %v10441_v49  ;;  %11795 = vst [vmem:[#allocation56_spill] sm:$0xff] %v10445_v0 }
 0x307   :  { %2973 = vmatpush1.bf16.msra.mxu0 %v10419_v52  ;;  %3014 = vmatpush1.bf16.msra.mxu1 %v10421_v54  ;;  %v10447_v52 = vld [vmem:[#allocation13 + $0x28] ss:$16 sps:$4 sm:$0xff]   ;;  %v10451_v54 = vld [vmem:[#allocation13 + $0x4] ss:$16 sps:$4 sm:$0xff]  }
 0x308   :  { %2974 = vmatprep.subr.bf16.mxu0 %v10426_v56  ;;  %3015 = vmatprep.subr.bf16.mxu1 %v10428_v42  ;;  %11796 = vst [vmem:[#allocation57_spill] sm:$0xff] %v10447_v52  ;;  %11797 = vst [vmem:[#allocation58_spill] sm:$0xff] %v10451_v54  ;;  %v10453_v56 = vld [vmem:[#allocation13 + $0xc] ss:$16 sps:$4 sm:$0xff]   ;;  %v10457_v42 = vld [vmem:[#allocation13] ss:$16 sps:$4 sm:$0xff]  }
 0x309   :  { %11798 = vst [vmem:[#allocation59_spill] sm:$0xff] %v10453_v56  ;;  %11799 = vst [vmem:[#allocation60_spill] sm:$0xff] %v10457_v42 }
 0x30b   :  { %2975 = vmatpush1.bf16.msra.mxu0 %v10433_v47  ;;  %3016 = vmatpush1.bf16.msra.mxu1 %v10435_v11  ;;  %v10459_v47 = vld [vmem:[#allocation13 + $0x8] ss:$16 sps:$4 sm:$0xff]   ;;  %v10463_v11 = vld [vmem:[#allocation15 + $0xe4] ss:$16 sps:$4 sm:$0xff]  }
 0x30c   :  { %2976 = vmatprep.subr.bf16.mxu0 %v10439_v4  ;;  %3017 = vmatprep.subr.bf16.mxu1 %v10441_v49  ;;  %11800 = vst [vmem:[#allocation61_spill] sm:$0xff] %v10459_v47  ;;  %11801 = vst [vmem:[#allocation62_spill] sm:$0xff] %v10463_v11  ;;  %v10465_v4 = vld [vmem:[#allocation15 + $0xec] ss:$16 sps:$4 sm:$0xff]  }
 0x30d   :  { %11802 = vst [vmem:[#allocation63_spill] sm:$0xff] %v10465_v4 }
 0x30f   :  { %2977 = vmatpush1.bf16.msra.mxu0 %v10445_v0  ;;  %3018 = vmatpush1.bf16.msra.mxu1 %v10447_v52 }
 0x310   :  { %2978 = vmatprep.subr.bf16.mxu0 %v10451_v54  ;;  %3019 = vmatprep.subr.bf16.mxu1 %v10453_v56 }
 0x313   :  { %2979 = vmatpush1.bf16.msra.mxu0 %v10457_v42  ;;  %3020 = vmatpush1.bf16.msra.mxu1 %v10459_v47 }
 0x314   :  { %3206 = vmatprep.subr.bf16.mxu0 %v10463_v11  ;;  %3247 = vmatprep.subr.bf16.mxu1 %v10465_v4 }
 0x375   :  { %v2099_v52 = vpop.f32.mrf.mxu0  ;;  %v2140_v0 = vpop.f32.mrf.mxu1 }
 0x377   :  { %v2101_v49 = vpop.f32.mrf.mxu0  ;;  %v2142_v43 = vpop.f32.mrf.mxu1 }
 0x379   :  { %v2103_v55 = vpop.f32.mrf.mxu0  ;;  %v2144_v54 = vpop.f32.mrf.mxu1 }
 0x37b   :  { %v2104_v63 = vpop.f32.mrf.mxu0  ;;  %v2145_v56 = vpop.f32.mrf.mxu1 }
 0x395   :  { %v2341_v2 = vpop.f32.mrf.mxu0  ;;  %v2382_v59 = vpop.f32.mrf.mxu1 }
 0x396   :  { %v2342_v44 = vadd.f32 %v2341_v2, %v2099_v52  ;;  %v2383_v56 = vadd.f32 %v2382_v59, %v2140_v0 }
 0x397   :  { %v2343_v6 = vpop.f32.mrf.mxu0  ;;  %v2384_v41 = vpop.f32.mrf.mxu1 }
 0x398   :  { %v2389_v42 = vadd.f32 %v2342_v44, %v10208_v17  ;;  %v2344_v47 = vadd.f32 %v2343_v6, %v2101_v49  ;;  %v2385_v63 = vadd.f32 %v2384_v41, %v2142_v43  ;;  %v2391_v53 = vadd.f32 %v2383_v56, %v10223_v39 }
 0x399   :  { %v2345_v50 = vpop.f32.mrf.mxu0  ;;  %v2386_v11 = vpop.f32.mrf.mxu1 }
 0x39a   :  { %v8096_v62 = vmul.f32 -1.442695, %v2389_v42  ;;  %v2390_v4 = vadd.f32 %v2344_v47, %v10212_v22  ;;  %v2392_v54 = vadd.f32 %v2385_v63, %v10218_v35 }
 0x39b   :  { %v2346_v1 = vpop.f32.mrf.mxu0  ;;  %v2387_v46 = vpop.f32.mrf.mxu1 }
 0x39c   :  { %9414 = vpow2.f32 %v8096_v62  ;;  %v8097_v55 = vmul.f32 -1.442695, %v2390_v4  ;;  %v8098_v2 = vmul.f32 -1.442695, %v2392_v54  ;;  %v11803_v1 = vld [vmem:[#allocation21_spill] sm:$0xff] }
 0x39d   :  { %v2461_v46 = vunpack.c.l.bf16 %v11803_v1  ;;  %v2462_v41 = vunpack.c.h.bf16 %v11803_v1 }
 0x39e   :  { %9416 = vpow2.f32 %v8097_v55 }
 0x39f   :  { %9418 = vpow2.f32 %v8098_v2 }
 0x3a9   :  { %v9415_v52 = vpop.eup %9414 }
 0x3aa   :  { %v2397_v44 = vadd.f32 1.0, %v9415_v52 }
 0x3ab   :  { %v9417_v6 = vpop.eup %9416 }
 0x3ac   :  { %9420 = vrcp.f32 %v2397_v44  ;;  %v2403_v50 = vadd.f32 1.0, %v9417_v6  ;;  %v9419_v0 = vpop.eup %9418 }
 0x3ad   :  { %9422 = vtanh.f32 %v2391_v53  ;;  %v2410_v2 = vadd.f32 1.0, %v9419_v0 }
 0x3ae   :  { %9424 = vrcp.f32 %v2403_v50 }
 0x3b5   :  { %v2692_v62 = vpop.f32.mrf.mxu0  ;;  %v2733_v49 = vpop.f32.mrf.mxu1 }
 0x3b6   :  { %v2740_v42 = vadd.f32 %v2692_v62, %v2461_v46  ;;  %v11804_v46 = vld [vmem:[#allocation22_spill] sm:$0xff] }
 0x3b7   :  { %v2694_v43 = vpop.f32.mrf.mxu0  ;;  %v2735_v59 = vpop.f32.mrf.mxu1  ;;  %v2464_v62 = vunpack.c.h.bf16 %v11804_v46 }
 0x3b8   :  { %v8131_v47 = vmul.f32 -1.442695, %v2740_v42  ;;  %v2741_v11 = vadd.f32 %v2694_v43, %v2462_v41  ;;  %v2463_v41 = vunpack.c.l.bf16 %v11804_v46 }
 0x3b9   :  { %v9421_v4 = vpop.eup %9420  ;;  %v2696_v55 = vpop.f32.mrf.mxu0  ;;  %v2743_v42 = vadd.f32 %v2735_v59, %v2464_v62 }
 0x3ba   :  { %v2737_v63 = vpop.f32.mrf.mxu1  ;;  %v9423_v54 = vpop.eup %9422  ;;  %9426 = vpow2.f32 %v8131_v47  ;;  %v8132_v56 = vmul.f32 -1.442695, %v2741_v11  ;;  %v2742_v43 = vadd.f32 %v2733_v49, %v2463_v41  ;;  %v10487_v41 = vld [vmem:[#allocation15 + $0xe0] ss:$16 sps:$4 sm:$0xff]  }
 0x3bb   :  { %v9425_v53 = vpop.eup %9424  ;;  %v2697_v52 = vpop.f32.mrf.mxu0  ;;  %v2414_v6 = vmul.f32 %v9423_v54, %v9421_v4  ;;  %v8133_v47 = vmul.f32 -1.442695, %v2743_v42 }
 0x3bc   :  { %v2738_v44 = vpop.f32.mrf.mxu1  ;;  %v2413_v50 = vmul.f32 %v9425_v53, %v10228_v24  ;;  %9428 = vpow2.f32 %v8132_v56 }
 0x3bd   :  { %9430 = vrcp.f32 %v2410_v2 }
 0x3be   :  { %v10478_v1 = vadd.f32 %v2414_v6, %v2413_v50 }
 0x3c0   :  { %9432 = vtanh.f32 %v10478_v1 }
 0x3c1   :  { %9434 = vtanh.f32 %v2742_v43  ;;  %v10489_v43 = vld [vmem:[#allocation15 + $0xe8] ss:$16 sps:$4 sm:$0xff]  }
 0x3c2   :  { %9436 = vpow2.f32 %v8133_v47 }
 0x3c7   :  { %v9427_v11 = vpop.eup %9426 }
 0x3c8   :  { %v2748_v0 = vadd.f32 1.0, %v9427_v11  ;;  %v10491_v11 = vld [vmem:[#allocation15 + $0xc4] ss:$16 sps:$4 sm:$0xff]  }
 0x3c9   :  { %v9429_v55 = vpop.eup %9428 }
 0x3ca   :  { %9438 = vrcp.f32 %v2748_v0  ;;  %v2754_v24 = vadd.f32 1.0, %v9429_v55  ;;  %v9431_v4 = vpop.eup %9430  ;;  %v10493_v0 = vld [vmem:[#allocation15 + $0xcc] ss:$16 sps:$4 sm:$0xff]   ;;  %v10499_v55 = vld [vmem:[#allocation15 + $0xc8] ss:$16 sps:$4 sm:$0xff]  }
 0x3cc   :  { %9440 = vrcp.f32 %v2754_v24  ;;  %v10503_v24 = vld [vmem:[#allocation15 + $0xa4] ss:$16 sps:$4 sm:$0xff]  }
 0x3cd   :  { %v9433_v63 = vpop.eup %9432 }
 0x3ce   :  { %v2417_v54 = vmul.f32 %v9433_v63, %v9431_v4  ;;  %v9435_v53 = vpop.eup %9434  ;;  %v10505_v4 = vld [vmem:[#allocation15 + $0xac] ss:$16 sps:$4 sm:$0xff]   ;;  %v10511_v63 = vld [vmem:[#allocation15 + $0xa0] ss:$16 sps:$4 sm:$0xff]  }
 0x3cf   :  { %v9437_v59 = vpop.eup %9436 }
 0x3d0   :  { %v2419_v56 = vpack.c.bf16 %v2417_v54, %v2417_v54  ;;  %v2761_v44 = vadd.f32 1.0, %v9437_v59  ;;  %v10513_v54 = vld [vmem:[#allocation15 + $0xa8] ss:$16 sps:$4 sm:$0xff]   ;;  %v10523_v59 = vld [vmem:[#allocation15 + $0x80] ss:$16 sps:$4 sm:$0xff]  }
 0x3d2   :  { %2420 = vst [vmem:[#allocation4] sm:$0xf] %v2419_v56  ;;  %2422 = vst [vmem:[#allocation16 + $0x4] sm:$0xf] %v2419_v56  ;;  %9442 = vrcp.f32 %v2761_v44  ;;  %v10517_v56 = vld [vmem:[#allocation15 + $0x84] ss:$16 sps:$4 sm:$0xff]  }
 0x3d3   :  { %v10535_v44 = vld [vmem:[#allocation15 + $0x60] ss:$16 sps:$4 sm:$0xff]  }
 0x3d4   :  { %11808 = vst [vmem:[#allocation65_spill] sm:$0xff] %v10535_v44 }
 0x3d7   :  { %v9439_v2 = vpop.eup %9438 }
 0x3d8   :  { %v2765_v52 = vmul.f32 %v9439_v2, %v9435_v53  ;;  %v10519_v53 = vld [vmem:[#allocation15 + $0x8c] ss:$16 sps:$4 sm:$0xff]   ;;  %v10525_v2 = vld [vmem:[#allocation15 + $0x88] ss:$16 sps:$4 sm:$0xff]  }
 0x3d9   :  { %v9441_v49 = vpop.eup %9440  ;;  %11805 = vst [vmem:[#allocation21_spill] sm:$0xff] %v10525_v2 }
 0x3da   :  { %v2764_v6 = vmul.f32 %v9441_v49, %v10234_v60  ;;  %v10497_v60 = vld [vmem:[#allocation15 + $0xc0] ss:$16 sps:$4 sm:$0xff]   ;;  %v10531_v49 = vld [vmem:[#allocation15 + $0x6c] ss:$16 sps:$4 sm:$0xff]  }
 0x3db   :  { %11807 = vst [vmem:[#allocation64_spill] sm:$0xff] %v10531_v49 }
 0x3dc   :  { %v10484_v50 = vadd.f32 %v2765_v52, %v2764_v6  ;;  %v10529_v52 = vld [vmem:[#allocation15 + $0x64] ss:$16 sps:$4 sm:$0xff]   ;;  %v10537_v6 = vld [vmem:[#allocation15 + $0x68] ss:$16 sps:$4 sm:$0xff]  }
 0x3dd   :  { %11806 = vst [vmem:[#allocation22_spill] sm:$0xff] %v10529_v52  ;;  %11809 = vst [vmem:[#allocation66_spill] sm:$0xff] %v10537_v6 }
 0x3de   :  { %9444 = vtanh.f32 %v10484_v50 }
 0x3df   :  { %v9443_v46 = vpop.eup %9442 }
 0x3eb   :  { %v9445_v62 = vpop.eup %9444 }
 0x3ec   :  { %v2768_v42 = vmul.f32 %v9445_v62, %v9443_v46  ;;  %v10541_v46 = vld [vmem:[#allocation15 + $0x44] ss:$16 sps:$4 sm:$0xff]   ;;  %v10543_v62 = vld [vmem:[#allocation15 + $0x4c] ss:$16 sps:$4 sm:$0xff]  }
 0x3ed   :  { %11810 = vst [vmem:[#allocation67_spill] sm:$0xff] %v10541_v46  ;;  %11811 = vst [vmem:[#allocation68_spill] sm:$0xff] %v10543_v62 }
 0x3ee   :  { %v2770_v47 = vpack.c.bf16 %v2768_v42, %v2768_v42  ;;  %v10547_v42 = vld [vmem:[#allocation15 + $0x40] ss:$16 sps:$4 sm:$0xff]  }
 0x3ef   :  { %11812 = vst [vmem:[#allocation69_spill] sm:$0xff] %v10547_v42 }
 0x3f0   :  { %2771 = vst [vmem:[#allocation3] sm:$0xf] %v2770_v47  ;;  %2997 = vmatmul.mubr.bf16.vlgmr.msra.gmra.mxu0 %v2770_v47  ;;  %3038 = vmatmul.mubr.bf16.vlgmr.msra.gmra.mxu1 %v2770_v47  ;;  %v10549_v47 = vld [vmem:[#allocation15 + $0x48] ss:$16 sps:$4 sm:$0xff]  }
 0x3f1   :  { %3207 = vmatpush1.bf16.msra.mxu0 %v10487_v41  ;;  %3248 = vmatpush1.bf16.msra.mxu1 %v10489_v43 }
 0x3f2   :  { %3208 = vmatprep.subr.bf16.mxu0 %v10491_v11  ;;  %3249 = vmatprep.subr.bf16.mxu1 %v10493_v0 }
 0x3f3   :  { %3238 = vmatprep.mubr.bf16.mxu0 %v11735_v48  ;;  %3279 = vmatprep.mubr.bf16.mxu1 %v11735_v48 }
 0x3f5   :  { %3209 = vmatpush1.bf16.msra.mxu0 %v10497_v60  ;;  %3250 = vmatpush1.bf16.msra.mxu1 %v10499_v55 }
 0x3f6   :  { %3210 = vmatprep.subr.bf16.mxu0 %v10503_v24  ;;  %3251 = vmatprep.subr.bf16.mxu1 %v10505_v4 }
 0x3f9   :  { %3211 = vmatpush1.bf16.msra.mxu0 %v10511_v63  ;;  %3252 = vmatpush1.bf16.msra.mxu1 %v10513_v54 }
 0x3fa   :  { %3212 = vmatprep.subr.bf16.mxu0 %v10517_v56  ;;  %3253 = vmatprep.subr.bf16.mxu1 %v10519_v53 }
 0x3fd   :  { %3213 = vmatpush1.bf16.msra.mxu0 %v10523_v59  ;;  %3254 = vmatpush1.bf16.msra.mxu1 %v10525_v2  ;;  %v10553_v2 = vld [vmem:[#allocation15 + $0x24] ss:$16 sps:$4 sm:$0xff]  }
 0x3fe   :  { %3214 = vmatprep.subr.bf16.mxu0 %v10529_v52  ;;  %3255 = vmatprep.subr.bf16.mxu1 %v10531_v49  ;;  %v10555_v52 = vld [vmem:[#allocation15 + $0x2c] ss:$16 sps:$4 sm:$0xff]   ;;  %v10559_v49 = vld [vmem:[#allocation15 + $0x20] ss:$16 sps:$4 sm:$0xff]  }
 0x3ff   :  { %11813 = vst [vmem:[#allocation70_spill] sm:$0xff] %v10555_v52 }
 0x401   :  { %3215 = vmatpush1.bf16.msra.mxu0 %v10535_v44  ;;  %3256 = vmatpush1.bf16.msra.mxu1 %v10537_v6  ;;  %v10561_v44 = vld [vmem:[#allocation15 + $0x28] ss:$16 sps:$4 sm:$0xff]   ;;  %v10565_v6 = vld [vmem:[#allocation15 + $0x4] ss:$16 sps:$4 sm:$0xff]  }
 0x402   :  { %3216 = vmatprep.subr.bf16.mxu0 %v10541_v46  ;;  %3257 = vmatprep.subr.bf16.mxu1 %v10543_v62  ;;  %v10567_v46 = vld [vmem:[#allocation15 + $0xc] ss:$16 sps:$4 sm:$0xff]   ;;  %v10571_v62 = vld [vmem:[#allocation15] ss:$16 sps:$4 sm:$0xff]  }
 0x405   :  { %3217 = vmatpush1.bf16.msra.mxu0 %v10547_v42  ;;  %3258 = vmatpush1.bf16.msra.mxu1 %v10549_v47  ;;  %v10573_v42 = vld [vmem:[#allocation15 + $0x8] ss:$16 sps:$4 sm:$0xff]  }
 0x406   :  { %3218 = vmatprep.subr.bf16.mxu0 %v10553_v2  ;;  %3259 = vmatprep.subr.bf16.mxu1 %v10555_v52  ;;  %v2423_v52 = vld [vmem:[#allocation4] sm:$0xf] }
 0x409   :  { %3219 = vmatpush1.bf16.msra.mxu0 %v10559_v49  ;;  %3260 = vmatpush1.bf16.msra.mxu1 %v10561_v44 }
 0x40a   :  { %3220 = vmatprep.subr.bf16.mxu0 %v10565_v6  ;;  %3261 = vmatprep.subr.bf16.mxu1 %v10567_v46 }
 0x40d   :  { %3221 = vmatpush1.bf16.msra.mxu0 %v10571_v62  ;;  %3262 = vmatpush1.bf16.msra.mxu1 %v10573_v42 }
 0x40e   :  { %3557 = vmatprep.subr.bf16.mxu0 %v10267_v51  ;;  %3598 = vmatprep.subr.bf16.mxu1 %v10269_v58  ;;  %v3364_v51 = vld [vmem:[#allocation3] sm:$0xf]  ;;  %v11814_v58 = vld [vmem:[#allocation33_spill] sm:$0xff] }
 0x410   :  { %3239 = vmatmul.mubr.bf16.vlgmr.msra.gmra.mxu0 %v2423_v52  ;;  %3280 = vmatmul.mubr.bf16.vlgmr.msra.gmra.mxu1 %v2423_v52 }
 0x411   :  { %3558 = vmatpush1.bf16.msra.mxu0 %v10273_v7  ;;  %3599 = vmatpush1.bf16.msra.mxu1 %v10275_v8  ;;  %v11815_v7 = vld [vmem:[#allocation34_spill] sm:$0xff]  ;;  %v11816_v8 = vld [vmem:[#allocation35_spill] sm:$0xff] }
 0x412   :  { %3559 = vmatprep.subr.bf16.mxu0 %v10279_v9  ;;  %3600 = vmatprep.subr.bf16.mxu1 %v10281_v10  ;;  %v11817_v9 = vld [vmem:[#allocation36_spill] sm:$0xff]  ;;  %v11818_v10 = vld [vmem:[#allocation37_spill] sm:$0xff] }
 0x413   :  { %3589 = vmatprep.mubr.bf16.mxu0 %v11735_v48  ;;  %3630 = vmatprep.mubr.bf16.mxu1 %v11735_v48 }
 0x415   :  { %3560 = vmatpush1.bf16.msra.mxu0 %v10285_v12  ;;  %3601 = vmatpush1.bf16.msra.mxu1 %v10287_v13  ;;  %v11819_v12 = vld [vmem:[#allocation38_spill] sm:$0xff]  ;;  %v11820_v13 = vld [vmem:[#allocation39_spill] sm:$0xff] }
 0x416   :  { %3561 = vmatprep.subr.bf16.mxu0 %v10291_v14  ;;  %3602 = vmatprep.subr.bf16.mxu1 %v10293_v15  ;;  %v11821_v14 = vld [vmem:[#allocation40_spill] sm:$0xff]  ;;  %v11822_v15 = vld [vmem:[#allocation41_spill] sm:$0xff] }
 0x419   :  { %3562 = vmatpush1.bf16.msra.mxu0 %v10299_v16  ;;  %3603 = vmatpush1.bf16.msra.mxu1 %v10301_v18  ;;  %v11823_v16 = vld [vmem:[#allocation42_spill] sm:$0xff]  ;;  %v11824_v18 = vld [vmem:[#allocation43_spill] sm:$0xff] }
 0x41a   :  { %3563 = vmatprep.subr.bf16.mxu0 %v10305_v19  ;;  %3604 = vmatprep.subr.bf16.mxu1 %v10307_v20  ;;  %v11825_v19 = vld [vmem:[#allocation44_spill] sm:$0xff]  ;;  %v11826_v20 = vld [vmem:[#allocation45_spill] sm:$0xff] }
 0x41d   :  { %3564 = vmatpush1.bf16.msra.mxu0 %v10311_v21  ;;  %3605 = vmatpush1.bf16.msra.mxu1 %v10313_v23  ;;  %v11827_v21 = vld [vmem:[#allocation46_spill] sm:$0xff]  ;;  %v11828_v23 = vld [vmem:[#allocation49_spill] sm:$0xff] }
 0x41e   :  { %3565 = vmatprep.subr.bf16.mxu0 %v10317_v3  ;;  %3606 = vmatprep.subr.bf16.mxu1 %v10319_v25  ;;  %v11829_v3 = vld [vmem:[#allocation47_spill] sm:$0xff]  ;;  %v11830_v25 = vld [vmem:[#allocation48_spill] sm:$0xff] }
 0x421   :  { %3566 = vmatpush1.bf16.msra.mxu0 %v10323_v26  ;;  %3607 = vmatpush1.bf16.msra.mxu1 %v10325_v27  ;;  %v11831_v26 = vld [vmem:[#allocation50_spill] sm:$0xff]  ;;  %v11832_v27 = vld [vmem:[#allocation51_spill] sm:$0xff] }
 0x422   :  { %3567 = vmatprep.subr.bf16.mxu0 %v10329_v28  ;;  %3608 = vmatprep.subr.bf16.mxu1 %v10331_v29  ;;  %v11833_v28 = vld [vmem:[#allocation52_spill] sm:$0xff]  ;;  %v11834_v29 = vld [vmem:[#allocation53_spill] sm:$0xff] }
 0x425   :  { %3568 = vmatpush1.bf16.msra.mxu0 %v10335_v30  ;;  %3609 = vmatpush1.bf16.msra.mxu1 %v10337_v31  ;;  %v11835_v30 = vld [vmem:[#allocation54_spill] sm:$0xff]  ;;  %v11836_v31 = vld [vmem:[#allocation55_spill] sm:$0xff] }
 0x426   :  { %3569 = vmatprep.subr.bf16.mxu0 %v10341_v32  ;;  %3610 = vmatprep.subr.bf16.mxu1 %v10343_v33  ;;  %v11837_v32 = vld [vmem:[#allocation56_spill] sm:$0xff]  ;;  %v11838_v33 = vld [vmem:[#allocation57_spill] sm:$0xff] }
 0x429   :  { %3570 = vmatpush1.bf16.msra.mxu0 %v10347_v34  ;;  %3611 = vmatpush1.bf16.msra.mxu1 %v10349_v36  ;;  %v11839_v34 = vld [vmem:[#allocation58_spill] sm:$0xff]  ;;  %v11840_v36 = vld [vmem:[#allocation59_spill] sm:$0xff] }
 0x42a   :  { %3571 = vmatprep.subr.bf16.mxu0 %v10353_v37  ;;  %3612 = vmatprep.subr.bf16.mxu1 %v10355_v38  ;;  %v11841_v37 = vld [vmem:[#allocation60_spill] sm:$0xff]  ;;  %v11842_v38 = vld [vmem:[#allocation61_spill] sm:$0xff] }
 0x42d   :  { %3572 = vmatpush1.bf16.msra.mxu0 %v10359_v40  ;;  %3613 = vmatpush1.bf16.msra.mxu1 %v10361_v57  ;;  %v11843_v40 = vld [vmem:[#allocation62_spill] sm:$0xff]  ;;  %v11844_v57 = vld [vmem:[#allocation63_spill] sm:$0xff] }
 0x42e   :  { %3863 = vmatprep.subr.bf16.mxu0 %v10369_v5  ;;  %3904 = vmatprep.subr.bf16.mxu1 %v10371_v61 }
 0x430   :  { %3590 = vmatmul.mubr.bf16.vlgmr.msra.gmra.mxu0 %v3364_v51  ;;  %3631 = vmatmul.mubr.bf16.vlgmr.msra.gmra.mxu1 %v3364_v51 }
 0x431   :  { %3864 = vmatpush1.bf16.msra.mxu0 %v10373_v45  ;;  %3905 = vmatpush1.bf16.msra.mxu1 %v11814_v58 }
 0x432   :  { %3865 = vmatprep.subr.bf16.mxu0 %v11815_v7  ;;  %3906 = vmatprep.subr.bf16.mxu1 %v11816_v8 }
 0x433   :  { %3895 = vmatprep.mubr.bf16.mxu0 %v11735_v48  ;;  %3936 = vmatprep.mubr.bf16.mxu1 %v11735_v48 }
 0x435   :  { %3866 = vmatpush1.bf16.msra.mxu0 %v11817_v9  ;;  %3907 = vmatpush1.bf16.msra.mxu1 %v11818_v10 }
 0x436   :  { %3867 = vmatprep.subr.bf16.mxu0 %v11819_v12  ;;  %3908 = vmatprep.subr.bf16.mxu1 %v11820_v13 }
 0x439   :  { %3868 = vmatpush1.bf16.msra.mxu0 %v11821_v14  ;;  %3909 = vmatpush1.bf16.msra.mxu1 %v11822_v15 }
 0x43a   :  { %3869 = vmatprep.subr.bf16.mxu0 %v11823_v16  ;;  %3910 = vmatprep.subr.bf16.mxu1 %v11824_v18 }
 0x43d   :  { %3870 = vmatpush1.bf16.msra.mxu0 %v11825_v19  ;;  %3911 = vmatpush1.bf16.msra.mxu1 %v11826_v20 }
 0x43e   :  { %3871 = vmatprep.subr.bf16.mxu0 %v11827_v21  ;;  %3912 = vmatprep.subr.bf16.mxu1 %v11828_v23 }
 0x441   :  { %3872 = vmatpush1.bf16.msra.mxu0 %v11829_v3  ;;  %3913 = vmatpush1.bf16.msra.mxu1 %v11830_v25 }
 0x442   :  { %3873 = vmatprep.subr.bf16.mxu0 %v11831_v26  ;;  %3914 = vmatprep.subr.bf16.mxu1 %v11832_v27 }
 0x445   :  { %3874 = vmatpush1.bf16.msra.mxu0 %v11833_v28  ;;  %3915 = vmatpush1.bf16.msra.mxu1 %v11834_v29 }
 0x446   :  { %3875 = vmatprep.subr.bf16.mxu0 %v11835_v30  ;;  %3916 = vmatprep.subr.bf16.mxu1 %v11836_v31 }
 0x449   :  { %3876 = vmatpush1.bf16.msra.mxu0 %v11837_v32  ;;  %3917 = vmatpush1.bf16.msra.mxu1 %v11838_v33 }
 0x44a   :  { %3877 = vmatprep.subr.bf16.mxu0 %v11839_v34  ;;  %3918 = vmatprep.subr.bf16.mxu1 %v11840_v36  ;;  %v11845_v36 = vld [vmem:[#allocation23_spill] sm:$0xff] }
 0x44d   :  { %3878 = vmatpush1.bf16.msra.mxu0 %v11841_v37  ;;  %3919 = vmatpush1.bf16.msra.mxu1 %v11842_v38  ;;  %v3360_v37 = vunpack.c.l.bf16 %v11845_v36 }
 0x44e   :  { %4105 = vmatprep.subr.bf16.mxu0 %v11843_v40  ;;  %4146 = vmatprep.subr.bf16.mxu1 %v11844_v57 }
 0x4b0   :  { %v2998_v5 = vpop.f32.mrf.mxu0  ;;  %v3039_v61 = vpop.f32.mrf.mxu1 }
 0x4b2   :  { %v3000_v45 = vpop.f32.mrf.mxu0  ;;  %v3041_v52 = vpop.f32.mrf.mxu1 }
 0x4b4   :  { %v3002_v51 = vpop.f32.mrf.mxu0  ;;  %v3043_v58 = vpop.f32.mrf.mxu1 }
 0x4b6   :  { %v3003_v7 = vpop.f32.mrf.mxu0  ;;  %v3044_v8 = vpop.f32.mrf.mxu1 }
 0x4d0   :  { %v3240_v9 = vpop.f32.mrf.mxu0  ;;  %v3281_v10 = vpop.f32.mrf.mxu1 }
 0x4d1   :  { %v3241_v12 = vadd.f32 %v3240_v9, %v2998_v5  ;;  %v3282_v28 = vadd.f32 %v3281_v10, %v3039_v61  ;;  %v3361_v5 = vunpack.c.h.bf16 %v11845_v36 }
 0x4d2   :  { %v3242_v13 = vpop.f32.mrf.mxu0  ;;  %v3283_v14 = vpop.f32.mrf.mxu1 }
 0x4d3   :  { %v3288_v15 = vadd.f32 %v3241_v12, %v10208_v17  ;;  %v3243_v16 = vadd.f32 %v3242_v13, %v3000_v45  ;;  %v3284_v26 = vadd.f32 %v3283_v14, %v3041_v52  ;;  %v3290_v31 = vadd.f32 %v3282_v28, %v10223_v39 }
 0x4d4   :  { %v3244_v18 = vpop.f32.mrf.mxu0  ;;  %v3285_v19 = vpop.f32.mrf.mxu1 }
 0x4d5   :  { %v8198_v20 = vmul.f32 -1.442695, %v3288_v15  ;;  %v3289_v21 = vadd.f32 %v3243_v16, %v10212_v22  ;;  %v3291_v27 = vadd.f32 %v3284_v26, %v10218_v35 }
 0x4d6   :  { %v3245_v23 = vpop.f32.mrf.mxu0  ;;  %v3286_v3 = vpop.f32.mrf.mxu1 }
 0x4d7   :  { %9446 = vpow2.f32 %v8198_v20  ;;  %v8199_v25 = vmul.f32 -1.442695, %v3289_v21  ;;  %v8200_v29 = vmul.f32 -1.442695, %v3291_v27  ;;  %v11846_v21 = vld [vmem:[#allocation24_spill] sm:$0xff] }
 0x4d8   :  { %v3363_v23 = vunpack.c.h.bf16 %v11846_v21 }
 0x4d9   :  { %9448 = vpow2.f32 %v8199_v25  ;;  %v3362_v25 = vunpack.c.l.bf16 %v11846_v21  ;;  %v10763_v21 = vld [vmem:[#allocation12 + $0x40] ss:$16 sps:$4 sm:$0xff]  }
 0x4da   :  { %9450 = vpow2.f32 %v8200_v29 }
 0x4e4   :  { %v9447_v30 = vpop.eup %9446 }
 0x4e5   :  { %v3296_v32 = vadd.f32 1.0, %v9447_v30 }
 0x4e6   :  { %v9449_v33 = vpop.eup %9448 }
 0x4e7   :  { %9452 = vrcp.f32 %v3296_v32  ;;  %v3302_v34 = vadd.f32 1.0, %v9449_v33  ;;  %v9451_v52 = vpop.eup %9450 }
 0x4e8   :  { %9454 = vtanh.f32 %v3290_v31  ;;  %v3309_v14 = vadd.f32 1.0, %v9451_v52 }
 0x4e9   :  { %9456 = vrcp.f32 %v3302_v34 }
 0x4f0   :  { %v3591_v38 = vpop.f32.mrf.mxu0  ;;  %v3632_v40 = vpop.f32.mrf.mxu1 }
 0x4f1   :  { %v3639_v57 = vadd.f32 %v3591_v38, %v3360_v37  ;;  %v3641_v26 = vadd.f32 %v3632_v40, %v3362_v25  ;;  %v10771_v25 = vld [vmem:[#allocation12 + $0x2c] ss:$16 sps:$4 sm:$0xff]  }
 0x4f2   :  { %v3593_v45 = vpop.f32.mrf.mxu0  ;;  %v3634_v61 = vpop.f32.mrf.mxu1 }
 0x4f3   :  { %v8233_v51 = vmul.f32 -1.442695, %v3639_v57  ;;  %v3640_v58 = vadd.f32 %v3593_v45, %v3361_v5  ;;  %v3642_v3 = vadd.f32 %v3634_v61, %v3363_v23  ;;  %v10765_v23 = vld [vmem:[#allocation12 + $0x48] ss:$16 sps:$4 sm:$0xff]  }
 0x4f4   :  { %v9453_v7 = vpop.eup %9452  ;;  %v3595_v8 = vpop.f32.mrf.mxu0 }
 0x4f5   :  { %v3636_v9 = vpop.f32.mrf.mxu1  ;;  %v9455_v10 = vpop.eup %9454  ;;  %9458 = vpow2.f32 %v8233_v51  ;;  %v8234_v12 = vmul.f32 -1.442695, %v3640_v58  ;;  %v8235_v27 = vmul.f32 -1.442695, %v3642_v3  ;;  %v10733_v8 = vld [vmem:[#allocation12 + $0x84] ss:$16 sps:$4 sm:$0xff]  }
 0x4f6   :  { %v9457_v13 = vpop.eup %9456  ;;  %v3596_v15 = vpop.f32.mrf.mxu0  ;;  %v3313_v18 = vmul.f32 %v9455_v10, %v9453_v7  ;;  %v10735_v9 = vld [vmem:[#allocation12 + $0x8c] ss:$16 sps:$4 sm:$0xff]   ;;  %v10739_v10 = vld [vmem:[#allocation12 + $0x80] ss:$16 sps:$4 sm:$0xff]   ;;  %v10769_v3 = vld [vmem:[#allocation12 + $0x24] ss:$16 sps:$4 sm:$0xff]  }
 0x4f7   :  { %v3637_v16 = vpop.f32.mrf.mxu1  ;;  %v3312_v19 = vmul.f32 %v9457_v13, %v10478_v1  ;;  %9460 = vpow2.f32 %v8234_v12  ;;  %v10741_v12 = vld [vmem:[#allocation12 + $0x88] ss:$16 sps:$4 sm:$0xff]   ;;  %v10745_v13 = vld [vmem:[#allocation12 + $0x64] ss:$16 sps:$4 sm:$0xff]   ;;  %v10751_v15 = vld [vmem:[#allocation12 + $0x60] ss:$16 sps:$4 sm:$0xff]  }
 0x4f8   :  { %9462 = vrcp.f32 %v3309_v14  ;;  %v10747_v14 = vld [vmem:[#allocation12 + $0x6c] ss:$16 sps:$4 sm:$0xff]   ;;  %v10753_v16 = vld [vmem:[#allocation12 + $0x68] ss:$16 sps:$4 sm:$0xff]  }
 0x4f9   :  { %v10656_v20 = vadd.f32 %v3313_v18, %v3312_v19  ;;  %v10757_v18 = vld [vmem:[#allocation12 + $0x44] ss:$16 sps:$4 sm:$0xff]   ;;  %v10759_v19 = vld [vmem:[#allocation12 + $0x4c] ss:$16 sps:$4 sm:$0xff]  }
 0x4fb   :  { %9464 = vtanh.f32 %v10656_v20 }
 0x4fc   :  { %9466 = vtanh.f32 %v3641_v26  ;;  %v10775_v26 = vld [vmem:[#allocation12 + $0x20] ss:$16 sps:$4 sm:$0xff]  }
 0x4fd   :  { %9468 = vpow2.f32 %v8235_v27  ;;  %v10777_v27 = vld [vmem:[#allocation12 + $0x28] ss:$16 sps:$4 sm:$0xff]  }
 0x502   :  { %v9459_v28 = vpop.eup %9458 }
 0x503   :  { %v3647_v29 = vadd.f32 1.0, %v9459_v28  ;;  %v10781_v28 = vld [vmem:[#allocation12 + $0x4] ss:$16 sps:$4 sm:$0xff]  }
 0x504   :  { %v9461_v30 = vpop.eup %9460 }
 0x505   :  { %9470 = vrcp.f32 %v3647_v29  ;;  %v3653_v1 = vadd.f32 1.0, %v9461_v30  ;;  %v9463_v31 = vpop.eup %9462  ;;  %v10783_v29 = vld [vmem:[#allocation12 + $0xc] ss:$16 sps:$4 sm:$0xff]   ;;  %v10787_v30 = vld [vmem:[#allocation12] ss:$16 sps:$4 sm:$0xff]  }
 0x507   :  { %9472 = vrcp.f32 %v3653_v1  ;;  %v10789_v1 = vld [vmem:[#allocation12 + $0x8] ss:$16 sps:$4 sm:$0xff]  }
 0x508   :  { %v9465_v32 = vpop.eup %9464 }
 0x509   :  { %v3316_v33 = vmul.f32 %v9465_v32, %v9463_v31  ;;  %v9467_v36 = vpop.eup %9466  ;;  %v10797_v32 = vld [vmem:[#allocation13 + $0xe4] ss:$16 sps:$4 sm:$0xff]  }
 0x50a   :  { %v9469_v37 = vpop.eup %9468 }
 0x50b   :  { %v3318_v34 = vpack.c.bf16 %v3316_v33, %v3316_v33  ;;  %v3660_v5 = vadd.f32 1.0, %v9469_v37  ;;  %v10799_v33 = vld [vmem:[#allocation13 + $0xec] ss:$16 sps:$4 sm:$0xff]   ;;  %v10809_v37 = vld [vmem:[#allocation13 + $0xc4] ss:$16 sps:$4 sm:$0xff]  }
 0x50c   :  { %11857 = vst [vmem:[#allocation34_spill] sm:$0xff] %v10809_v37 }
 0x50d   :  { %3319 = vst [vmem:[#allocation4] sm:$0xf] %v3318_v34  ;;  %3321 = vst [vmem:[#allocation16 + $0x8] sm:$0xf] %v3318_v34  ;;  %9474 = vrcp.f32 %v3660_v5  ;;  %v10801_v34 = vld [vmem:[#allocation13 + $0xe0] ss:$16 sps:$4 sm:$0xff]  }
 0x50e   :  { %v10821_v5 = vld [vmem:[#allocation13 + $0xa4] ss:$16 sps:$4 sm:$0xff]  }
 0x50f   :  { %11861 = vst [vmem:[#allocation38_spill] sm:$0xff] %v10821_v5 }
 0x512   :  { %v9471_v38 = vpop.eup %9470 }
 0x513   :  { %v3664_v57 = vmul.f32 %v9471_v38, %v9467_v36  ;;  %v10803_v36 = vld [vmem:[#allocation13 + $0xe8] ss:$16 sps:$4 sm:$0xff]   ;;  %v10811_v38 = vld [vmem:[#allocation13 + $0xcc] ss:$16 sps:$4 sm:$0xff]  }
 0x514   :  { %v9473_v40 = vpop.eup %9472  ;;  %11856 = vst [vmem:[#allocation33_spill] sm:$0xff] %v10803_v36  ;;  %11858 = vst [vmem:[#allocation35_spill] sm:$0xff] %v10811_v38 }
 0x515   :  { %v3663_v45 = vmul.f32 %v9473_v40, %v10484_v50  ;;  %v11847_v50 = vld [vmem:[#allocation21_spill] sm:$0xff]  ;;  %v10815_v40 = vld [vmem:[#allocation13 + $0xc8] ss:$16 sps:$4 sm:$0xff]  }
 0x516   :  { %11860 = vst [vmem:[#allocation37_spill] sm:$0xff] %v10815_v40 }
 0x517   :  { %v10662_v61 = vadd.f32 %v3664_v57, %v3663_v45  ;;  %v10813_v57 = vld [vmem:[#allocation13 + $0xc0] ss:$16 sps:$4 sm:$0xff]   ;;  %v10823_v45 = vld [vmem:[#allocation13 + $0xac] ss:$16 sps:$4 sm:$0xff]  }
 0x518   :  { %11859 = vst [vmem:[#allocation36_spill] sm:$0xff] %v10813_v57  ;;  %11862 = vst [vmem:[#allocation39_spill] sm:$0xff] %v10823_v45 }
 0x519   :  { %9476 = vtanh.f32 %v10662_v61 }
 0x51a   :  { %v9475_v52 = vpop.eup %9474 }
 0x526   :  { %v9477_v51 = vpop.eup %9476 }
 0x527   :  { %v3667_v58 = vmul.f32 %v9477_v51, %v9475_v52  ;;  %v10825_v52 = vld [vmem:[#allocation13 + $0xa0] ss:$16 sps:$4 sm:$0xff]   ;;  %v10827_v51 = vld [vmem:[#allocation13 + $0xa8] ss:$16 sps:$4 sm:$0xff]  }
 0x528   :  { %11863 = vst [vmem:[#allocation40_spill] sm:$0xff] %v10825_v52  ;;  %11864 = vst [vmem:[#allocation41_spill] sm:$0xff] %v10827_v51 }
 0x529   :  { %v3669_v7 = vpack.c.bf16 %v3667_v58, %v3667_v58  ;;  %v10833_v58 = vld [vmem:[#allocation13 + $0x84] ss:$16 sps:$4 sm:$0xff]  }
 0x52a   :  { %11865 = vst [vmem:[#allocation42_spill] sm:$0xff] %v10833_v58 }
 0x52b   :  { %3670 = vst [vmem:[#allocation3] sm:$0xf] %v3669_v7  ;;  %3896 = vmatmul.mubr.bf16.vlgmr.msra.gmra.mxu0 %v3669_v7  ;;  %3937 = vmatmul.mubr.bf16.vlgmr.msra.gmra.mxu1 %v3669_v7  ;;  %v10835_v7 = vld [vmem:[#allocation13 + $0x8c] ss:$16 sps:$4 sm:$0xff]  }
 0x52c   :  { %4106 = vmatpush1.bf16.msra.mxu0 %v10487_v41  ;;  %4147 = vmatpush1.bf16.msra.mxu1 %v10489_v43  ;;  %v11848_v41 = vld [vmem:[#allocation22_spill] sm:$0xff]  ;;  %v11849_v43 = vld [vmem:[#allocation64_spill] sm:$0xff]  ;;  %11866 = vst [vmem:[#allocation43_spill] sm:$0xff] %v10835_v7 }
 0x52d   :  { %4107 = vmatprep.subr.bf16.mxu0 %v10491_v11  ;;  %4148 = vmatprep.subr.bf16.mxu1 %v10493_v0  ;;  %v11850_v11 = vld [vmem:[#allocation65_spill] sm:$0xff]  ;;  %v11851_v0 = vld [vmem:[#allocation66_spill] sm:$0xff] }
 0x52e   :  { %4137 = vmatprep.mubr.bf16.mxu0 %v11735_v48  ;;  %4178 = vmatprep.mubr.bf16.mxu1 %v11735_v48 }
 0x530   :  { %4108 = vmatpush1.bf16.msra.mxu0 %v10497_v60  ;;  %4149 = vmatpush1.bf16.msra.mxu1 %v10499_v55  ;;  %v11852_v60 = vld [vmem:[#allocation67_spill] sm:$0xff]  ;;  %v11853_v55 = vld [vmem:[#allocation68_spill] sm:$0xff] }
 0x531   :  { %4109 = vmatprep.subr.bf16.mxu0 %v10503_v24  ;;  %4150 = vmatprep.subr.bf16.mxu1 %v10505_v4  ;;  %v11854_v24 = vld [vmem:[#allocation69_spill] sm:$0xff]  ;;  %v11855_v4 = vld [vmem:[#allocation70_spill] sm:$0xff] }
 0x532   :  { %v4263_v31 = vld [vmem:[#allocation3] sm:$0xf] }
 0x534   :  { %4110 = vmatpush1.bf16.msra.mxu0 %v10511_v63  ;;  %4151 = vmatpush1.bf16.msra.mxu1 %v10513_v54  ;;  %v10695_v63 = vld [vmem:[#allocation12 + $0xe4] ss:$16 sps:$4 sm:$0xff]   ;;  %v10697_v54 = vld [vmem:[#allocation12 + $0xec] ss:$16 sps:$4 sm:$0xff]  }
 0x535   :  { %4111 = vmatprep.subr.bf16.mxu0 %v10517_v56  ;;  %4152 = vmatprep.subr.bf16.mxu1 %v10519_v53  ;;  %v10701_v56 = vld [vmem:[#allocation12 + $0xe0] ss:$16 sps:$4 sm:$0xff]   ;;  %v10703_v53 = vld [vmem:[#allocation12 + $0xe8] ss:$16 sps:$4 sm:$0xff]  }
 0x538   :  { %4112 = vmatpush1.bf16.msra.mxu0 %v10523_v59  ;;  %4153 = vmatpush1.bf16.msra.mxu1 %v11847_v50  ;;  %v10707_v59 = vld [vmem:[#allocation12 + $0xc4] ss:$16 sps:$4 sm:$0xff]   ;;  %v10837_v50 = vld [vmem:[#allocation13 + $0x80] ss:$16 sps:$4 sm:$0xff]  }
 0x539   :  { %4113 = vmatprep.subr.bf16.mxu0 %v11848_v41  ;;  %4154 = vmatprep.subr.bf16.mxu1 %v11849_v43  ;;  %11867 = vst [vmem:[#allocation44_spill] sm:$0xff] %v10837_v50  ;;  %v10839_v41 = vld [vmem:[#allocation13 + $0x88] ss:$16 sps:$4 sm:$0xff]   ;;  %v10843_v43 = vld [vmem:[#allocation13 + $0x64] ss:$16 sps:$4 sm:$0xff]  }
 0x53a   :  { %11868 = vst [vmem:[#allocation45_spill] sm:$0xff] %v10839_v41  ;;  %11869 = vst [vmem:[#allocation46_spill] sm:$0xff] %v10843_v43 }
 0x53c   :  { %4114 = vmatpush1.bf16.msra.mxu0 %v11850_v11  ;;  %4155 = vmatpush1.bf16.msra.mxu1 %v11851_v0  ;;  %v10847_v11 = vld [vmem:[#allocation13 + $0x60] ss:$16 sps:$4 sm:$0xff]   ;;  %v10849_v0 = vld [vmem:[#allocation13 + $0x68] ss:$16 sps:$4 sm:$0xff]  }
 0x53d   :  { %4115 = vmatprep.subr.bf16.mxu0 %v11852_v60  ;;  %4156 = vmatprep.subr.bf16.mxu1 %v11853_v55  ;;  %11870 = vst [vmem:[#allocation49_spill] sm:$0xff] %v10847_v11  ;;  %11871 = vst [vmem:[#allocation47_spill] sm:$0xff] %v10849_v0  ;;  %v10851_v60 = vld [vmem:[#allocation13 + $0x6c] ss:$16 sps:$4 sm:$0xff]   ;;  %v10854_v55 = vld [vmem:[#allocation13 + $0x44] ss:$16 sps:$4 sm:$0xff]  }
 0x53e   :  { %11872 = vst [vmem:[#allocation48_spill] sm:$0xff] %v10851_v60  ;;  %11873 = vst [vmem:[#allocation50_spill] sm:$0xff] %v10854_v55 }
 0x540   :  { %4116 = vmatpush1.bf16.msra.mxu0 %v11854_v24  ;;  %4157 = vmatpush1.bf16.msra.mxu1 %v10549_v47  ;;  %v10729_v47 = vld [vmem:[#allocation12 + $0xa8] ss:$16 sps:$4 sm:$0xff]   ;;  %v10856_v24 = vld [vmem:[#allocation13 + $0x4c] ss:$16 sps:$4 sm:$0xff]  }
 0x541   :  { %4117 = vmatprep.subr.bf16.mxu0 %v10553_v2  ;;  %4158 = vmatprep.subr.bf16.mxu1 %v11855_v4  ;;  %v10709_v2 = vld [vmem:[#allocation12 + $0xcc] ss:$16 sps:$4 sm:$0xff]   ;;  %11874 = vst [vmem:[#allocation51_spill] sm:$0xff] %v10856_v24  ;;  %v10861_v4 = vld [vmem:[#allocation13 + $0x40] ss:$16 sps:$4 sm:$0xff]  }
 0x542   :  { %11875 = vst [vmem:[#allocation52_spill] sm:$0xff] %v10861_v4 }
 0x544   :  { %4118 = vmatpush1.bf16.msra.mxu0 %v10559_v49  ;;  %4159 = vmatpush1.bf16.msra.mxu1 %v10561_v44  ;;  %v3322_v49 = vld [vmem:[#allocation4] sm:$0xf]  ;;  %v10713_v44 = vld [vmem:[#allocation12 + $0xc0] ss:$16 sps:$4 sm:$0xff]  }
 0x545   :  { %4119 = vmatprep.subr.bf16.mxu0 %v10565_v6  ;;  %4160 = vmatprep.subr.bf16.mxu1 %v10567_v46  ;;  %v10715_v6 = vld [vmem:[#allocation12 + $0xc8] ss:$16 sps:$4 sm:$0xff]   ;;  %v10719_v46 = vld [vmem:[#allocation12 + $0xa4] ss:$16 sps:$4 sm:$0xff]  }
 0x548   :  { %4120 = vmatpush1.bf16.msra.mxu0 %v10571_v62  ;;  %4161 = vmatpush1.bf16.msra.mxu1 %v10573_v42  ;;  %v10721_v62 = vld [vmem:[#allocation12 + $0xac] ss:$16 sps:$4 sm:$0xff]   ;;  %v10727_v42 = vld [vmem:[#allocation12 + $0xa0] ss:$16 sps:$4 sm:$0xff]  }
 0x549   :  { %4456 = vmatprep.subr.bf16.mxu0 %v10695_v63  ;;  %4497 = vmatprep.subr.bf16.mxu1 %v10697_v54 }
 0x54b   :  { %4138 = vmatmul.mubr.bf16.vlgmr.msra.gmra.mxu0 %v3322_v49  ;;  %4179 = vmatmul.mubr.bf16.vlgmr.msra.gmra.mxu1 %v3322_v49  ;;  %v10863_v49 = vld [vmem:[#allocation13 + $0x48] ss:$16 sps:$4 sm:$0xff]  }
 0x54c   :  { %4457 = vmatpush1.bf16.msra.mxu0 %v10701_v56  ;;  %4498 = vmatpush1.bf16.msra.mxu1 %v10703_v53  ;;  %11876 = vst [vmem:[#allocation53_spill] sm:$0xff] %v10863_v49 }
 0x54d   :  { %4458 = vmatprep.subr.bf16.mxu0 %v10707_v59  ;;  %4499 = vmatprep.subr.bf16.mxu1 %v10709_v2 }
 0x54e   :  { %4488 = vmatprep.mubr.bf16.mxu0 %v11735_v48  ;;  %4529 = vmatprep.mubr.bf16.mxu1 %v11735_v48 }
 0x550   :  { %4459 = vmatpush1.bf16.msra.mxu0 %v10713_v44  ;;  %4500 = vmatpush1.bf16.msra.mxu1 %v10715_v6 }
 0x551   :  { %4460 = vmatprep.subr.bf16.mxu0 %v10719_v46  ;;  %4501 = vmatprep.subr.bf16.mxu1 %v10721_v62 }
 0x554   :  { %4461 = vmatpush1.bf16.msra.mxu0 %v10727_v42  ;;  %4502 = vmatpush1.bf16.msra.mxu1 %v10729_v47 }
 0x555   :  { %4462 = vmatprep.subr.bf16.mxu0 %v10733_v8  ;;  %4503 = vmatprep.subr.bf16.mxu1 %v10735_v9 }
 0x558   :  { %4463 = vmatpush1.bf16.msra.mxu0 %v10739_v10  ;;  %4504 = vmatpush1.bf16.msra.mxu1 %v10741_v12 }
 0x559   :  { %4464 = vmatprep.subr.bf16.mxu0 %v10745_v13  ;;  %4505 = vmatprep.subr.bf16.mxu1 %v10747_v14 }
 0x55c   :  { %4465 = vmatpush1.bf16.msra.mxu0 %v10751_v15  ;;  %4506 = vmatpush1.bf16.msra.mxu1 %v10753_v16 }
 0x55d   :  { %4466 = vmatprep.subr.bf16.mxu0 %v10757_v18  ;;  %4507 = vmatprep.subr.bf16.mxu1 %v10759_v19 }
 0x560   :  { %4467 = vmatpush1.bf16.msra.mxu0 %v10763_v21  ;;  %4508 = vmatpush1.bf16.msra.mxu1 %v10765_v23 }
 0x561   :  { %4468 = vmatprep.subr.bf16.mxu0 %v10769_v3  ;;  %4509 = vmatprep.subr.bf16.mxu1 %v10771_v25 }
 0x564   :  { %4469 = vmatpush1.bf16.msra.mxu0 %v10775_v26  ;;  %4510 = vmatpush1.bf16.msra.mxu1 %v10777_v27 }
 0x565   :  { %4470 = vmatprep.subr.bf16.mxu0 %v10781_v28  ;;  %4511 = vmatprep.subr.bf16.mxu1 %v10783_v29 }
 0x568   :  { %4471 = vmatpush1.bf16.msra.mxu0 %v10787_v30  ;;  %4512 = vmatpush1.bf16.msra.mxu1 %v10789_v1 }
 0x569   :  { %4762 = vmatprep.subr.bf16.mxu0 %v10797_v32  ;;  %4803 = vmatprep.subr.bf16.mxu1 %v10799_v33 }
 0x56b   :  { %4489 = vmatmul.mubr.bf16.vlgmr.msra.gmra.mxu0 %v4263_v31  ;;  %4530 = vmatmul.mubr.bf16.vlgmr.msra.gmra.mxu1 %v4263_v31  ;;  %v10867_v31 = vld [vmem:[#allocation13 + $0x24] ss:$16 sps:$4 sm:$0xff]  }
 0x56c   :  { %4794 = vmatprep.mubr.bf16.mxu0 %v11735_v48  ;;  %4835 = vmatprep.mubr.bf16.mxu1 %v11735_v48  ;;  %11877 = vst [vmem:[#allocation54_spill] sm:$0xff] %v10867_v31 }
 0x56d   :  { %4763 = vmatpush1.bf16.msra.mxu0 %v10801_v34  ;;  %4804 = vmatpush1.bf16.msra.mxu1 %v10803_v36 }
 0x56e   :  { %4764 = vmatprep.subr.bf16.mxu0 %v10809_v37  ;;  %4805 = vmatprep.subr.bf16.mxu1 %v10811_v38 }
 0x571   :  { %4765 = vmatpush1.bf16.msra.mxu0 %v10813_v57  ;;  %4806 = vmatpush1.bf16.msra.mxu1 %v10815_v40 }
 0x572   :  { %4766 = vmatprep.subr.bf16.mxu0 %v10821_v5  ;;  %4807 = vmatprep.subr.bf16.mxu1 %v10823_v45 }
 0x575   :  { %4767 = vmatpush1.bf16.msra.mxu0 %v10825_v52  ;;  %4808 = vmatpush1.bf16.msra.mxu1 %v10827_v51 }
 0x576   :  { %4768 = vmatprep.subr.bf16.mxu0 %v10833_v58  ;;  %4809 = vmatprep.subr.bf16.mxu1 %v10835_v7 }
 0x579   :  { %4769 = vmatpush1.bf16.msra.mxu0 %v10837_v50  ;;  %4810 = vmatpush1.bf16.msra.mxu1 %v10839_v41 }
 0x57a   :  { %4770 = vmatprep.subr.bf16.mxu0 %v10843_v43  ;;  %4811 = vmatprep.subr.bf16.mxu1 %v10851_v60  ;;  %v10869_v43 = vld [vmem:[#allocation13 + $0x2c] ss:$16 sps:$4 sm:$0xff]   ;;  %v10873_v60 = vld [vmem:[#allocation13 + $0x20] ss:$16 sps:$4 sm:$0xff]  }
 0x57b   :  { %11878 = vst [vmem:[#allocation55_spill] sm:$0xff] %v10869_v43  ;;  %11879 = vst [vmem:[#allocation56_spill] sm:$0xff] %v10873_v60 }
 0x57d   :  { %4771 = vmatpush1.bf16.msra.mxu0 %v10847_v11  ;;  %4812 = vmatpush1.bf16.msra.mxu1 %v10849_v0  ;;  %v10875_v11 = vld [vmem:[#allocation13 + $0x28] ss:$16 sps:$4 sm:$0xff]   ;;  %v10879_v0 = vld [vmem:[#allocation13 + $0x4] ss:$16 sps:$4 sm:$0xff]  }
 0x57e   :  { %4772 = vmatprep.subr.bf16.mxu0 %v10854_v55  ;;  %4813 = vmatprep.subr.bf16.mxu1 %v10856_v24  ;;  %11880 = vst [vmem:[#allocation57_spill] sm:$0xff] %v10875_v11  ;;  %11881 = vst [vmem:[#allocation58_spill] sm:$0xff] %v10879_v0  ;;  %v10881_v55 = vld [vmem:[#allocation13 + $0xc] ss:$16 sps:$4 sm:$0xff]   ;;  %v10885_v24 = vld [vmem:[#allocation13] ss:$16 sps:$4 sm:$0xff]  }
 0x57f   :  { %11882 = vst [vmem:[#allocation59_spill] sm:$0xff] %v10881_v55  ;;  %11883 = vst [vmem:[#allocation60_spill] sm:$0xff] %v10885_v24 }
 0x581   :  { %4773 = vmatpush1.bf16.msra.mxu0 %v10861_v4  ;;  %4814 = vmatpush1.bf16.msra.mxu1 %v10863_v49  ;;  %v10887_v4 = vld [vmem:[#allocation13 + $0x8] ss:$16 sps:$4 sm:$0xff]   ;;  %v10891_v49 = vld [vmem:[#allocation15 + $0xe4] ss:$16 sps:$4 sm:$0xff]  }
 0x582   :  { %4774 = vmatprep.subr.bf16.mxu0 %v10867_v31  ;;  %4815 = vmatprep.subr.bf16.mxu1 %v10869_v43  ;;  %11884 = vst [vmem:[#allocation61_spill] sm:$0xff] %v10887_v4  ;;  %11885 = vst [vmem:[#allocation62_spill] sm:$0xff] %v10891_v49  ;;  %v10893_v31 = vld [vmem:[#allocation15 + $0xec] ss:$16 sps:$4 sm:$0xff]  }
 0x583   :  { %11886 = vst [vmem:[#allocation63_spill] sm:$0xff] %v10893_v31 }
 0x585   :  { %4775 = vmatpush1.bf16.msra.mxu0 %v10873_v60  ;;  %4816 = vmatpush1.bf16.msra.mxu1 %v10875_v11 }
 0x586   :  { %4776 = vmatprep.subr.bf16.mxu0 %v10879_v0  ;;  %4817 = vmatprep.subr.bf16.mxu1 %v10881_v55 }
 0x589   :  { %4777 = vmatpush1.bf16.msra.mxu0 %v10885_v24  ;;  %4818 = vmatpush1.bf16.msra.mxu1 %v10887_v4 }
 0x58a   :  { %5004 = vmatprep.subr.bf16.mxu0 %v10891_v49  ;;  %5045 = vmatprep.subr.bf16.mxu1 %v10893_v31 }
 0x5eb   :  { %v3897_v11 = vpop.f32.mrf.mxu0  ;;  %v3938_v60 = vpop.f32.mrf.mxu1 }
 0x5ed   :  { %v3899_v43 = vpop.f32.mrf.mxu0  ;;  %v3940_v41 = vpop.f32.mrf.mxu1 }
 0x5ef   :  { %v3901_v50 = vpop.f32.mrf.mxu0  ;;  %v3942_v0 = vpop.f32.mrf.mxu1 }
 0x5f1   :  { %v3902_v7 = vpop.f32.mrf.mxu0  ;;  %v3943_v55 = vpop.f32.mrf.mxu1 }
 0x60b   :  { %v4139_v58 = vpop.f32.mrf.mxu0  ;;  %v4180_v51 = vpop.f32.mrf.mxu1 }
 0x60c   :  { %v4140_v52 = vadd.f32 %v4139_v58, %v3897_v11  ;;  %v4181_v55 = vadd.f32 %v4180_v51, %v3938_v60 }
 0x60d   :  { %v4141_v45 = vpop.f32.mrf.mxu0  ;;  %v4182_v5 = vpop.f32.mrf.mxu1 }
 0x60e   :  { %v4187_v24 = vadd.f32 %v4140_v52, %v10208_v17  ;;  %v4142_v4 = vadd.f32 %v4141_v45, %v3899_v43  ;;  %v4183_v7 = vadd.f32 %v4182_v5, %v3940_v41  ;;  %v4189_v36 = vadd.f32 %v4181_v55, %v10223_v39 }
 0x60f   :  { %v4143_v40 = vpop.f32.mrf.mxu0  ;;  %v4184_v49 = vpop.f32.mrf.mxu1 }
 0x610   :  { %v8300_v57 = vmul.f32 -1.442695, %v4187_v24  ;;  %v4188_v31 = vadd.f32 %v4142_v4, %v10212_v22  ;;  %v4190_v0 = vadd.f32 %v4183_v7, %v10218_v35 }
 0x611   :  { %v4144_v38 = vpop.f32.mrf.mxu0  ;;  %v4185_v37 = vpop.f32.mrf.mxu1 }
 0x612   :  { %9478 = vpow2.f32 %v8300_v57  ;;  %v8301_v50 = vmul.f32 -1.442695, %v4188_v31  ;;  %v8302_v58 = vmul.f32 -1.442695, %v4190_v0  ;;  %v11887_v38 = vld [vmem:[#allocation25_spill] sm:$0xff] }
 0x613   :  { %v4259_v37 = vunpack.c.l.bf16 %v11887_v38  ;;  %v4260_v5 = vunpack.c.h.bf16 %v11887_v38 }
 0x614   :  { %9480 = vpow2.f32 %v8301_v50 }
 0x615   :  { %9482 = vpow2.f32 %v8302_v58 }
 0x61f   :  { %v9479_v11 = vpop.eup %9478 }
 0x620   :  { %v4195_v52 = vadd.f32 1.0, %v9479_v11 }
 0x621   :  { %v9481_v45 = vpop.eup %9480 }
 0x622   :  { %9484 = vrcp.f32 %v4195_v52  ;;  %v4201_v40 = vadd.f32 1.0, %v9481_v45  ;;  %v9483_v60 = vpop.eup %9482 }
 0x623   :  { %9486 = vtanh.f32 %v4189_v36  ;;  %v4208_v58 = vadd.f32 1.0, %v9483_v60 }
 0x624   :  { %9488 = vrcp.f32 %v4201_v40 }
 0x62b   :  { %v4490_v57 = vpop.f32.mrf.mxu0  ;;  %v4531_v43 = vpop.f32.mrf.mxu1 }
 0x62c   :  { %v4538_v24 = vadd.f32 %v4490_v57, %v4259_v37  ;;  %v11888_v37 = vld [vmem:[#allocation26_spill] sm:$0xff] }
 0x62d   :  { %v4492_v41 = vpop.f32.mrf.mxu0  ;;  %v4533_v51 = vpop.f32.mrf.mxu1  ;;  %v4262_v57 = vunpack.c.h.bf16 %v11888_v37 }
 0x62e   :  { %v8335_v4 = vmul.f32 -1.442695, %v4538_v24  ;;  %v4539_v49 = vadd.f32 %v4492_v41, %v4260_v5  ;;  %v4261_v5 = vunpack.c.l.bf16 %v11888_v37 }
 0x62f   :  { %v9485_v31 = vpop.eup %9484  ;;  %v4494_v50 = vpop.f32.mrf.mxu0  ;;  %v4541_v24 = vadd.f32 %v4533_v51, %v4262_v57 }
 0x630   :  { %v4535_v7 = vpop.f32.mrf.mxu1  ;;  %v9487_v0 = vpop.eup %9486  ;;  %9490 = vpow2.f32 %v8335_v4  ;;  %v8336_v55 = vmul.f32 -1.442695, %v4539_v49  ;;  %v4540_v41 = vadd.f32 %v4531_v43, %v4261_v5  ;;  %v10915_v5 = vld [vmem:[#allocation15 + $0xe0] ss:$16 sps:$4 sm:$0xff]  }
 0x631   :  { %v9489_v36 = vpop.eup %9488  ;;  %v4495_v11 = vpop.f32.mrf.mxu0  ;;  %v4212_v45 = vmul.f32 %v9487_v0, %v9485_v31  ;;  %v8337_v4 = vmul.f32 -1.442695, %v4541_v24 }
 0x632   :  { %v4536_v52 = vpop.f32.mrf.mxu1  ;;  %v4211_v40 = vmul.f32 %v9489_v36, %v10656_v20  ;;  %9492 = vpow2.f32 %v8336_v55 }
 0x633   :  { %9494 = vrcp.f32 %v4208_v58 }
 0x634   :  { %v10906_v38 = vadd.f32 %v4212_v45, %v4211_v40 }
 0x636   :  { %9496 = vtanh.f32 %v10906_v38 }
 0x637   :  { %9498 = vtanh.f32 %v4540_v41  ;;  %v10917_v41 = vld [vmem:[#allocation15 + $0xe8] ss:$16 sps:$4 sm:$0xff]  }
 0x638   :  { %9500 = vpow2.f32 %v8337_v4 }
 0x63d   :  { %v9491_v49 = vpop.eup %9490 }
 0x63e   :  { %v4546_v60 = vadd.f32 1.0, %v9491_v49  ;;  %v10919_v49 = vld [vmem:[#allocation15 + $0xc4] ss:$16 sps:$4 sm:$0xff]  }
 0x63f   :  { %v9493_v50 = vpop.eup %9492 }
 0x640   :  { %9502 = vrcp.f32 %v4546_v60  ;;  %v4552_v20 = vadd.f32 1.0, %v9493_v50  ;;  %v9495_v31 = vpop.eup %9494  ;;  %v10921_v60 = vld [vmem:[#allocation15 + $0xcc] ss:$16 sps:$4 sm:$0xff]   ;;  %v10927_v50 = vld [vmem:[#allocation15 + $0xc8] ss:$16 sps:$4 sm:$0xff]  }
 0x642   :  { %9504 = vrcp.f32 %v4552_v20  ;;  %v10931_v20 = vld [vmem:[#allocation15 + $0xa4] ss:$16 sps:$4 sm:$0xff]  }
 0x643   :  { %v9497_v7 = vpop.eup %9496 }
 0x644   :  { %v4215_v0 = vmul.f32 %v9497_v7, %v9495_v31  ;;  %v9499_v36 = vpop.eup %9498  ;;  %v10933_v31 = vld [vmem:[#allocation15 + $0xac] ss:$16 sps:$4 sm:$0xff]   ;;  %v10939_v7 = vld [vmem:[#allocation15 + $0xa0] ss:$16 sps:$4 sm:$0xff]  }
 0x645   :  { %v9501_v51 = vpop.eup %9500 }
 0x646   :  { %v4217_v55 = vpack.c.bf16 %v4215_v0, %v4215_v0  ;;  %v4559_v52 = vadd.f32 1.0, %v9501_v51  ;;  %v10941_v0 = vld [vmem:[#allocation15 + $0xa8] ss:$16 sps:$4 sm:$0xff]   ;;  %v10951_v51 = vld [vmem:[#allocation15 + $0x80] ss:$16 sps:$4 sm:$0xff]  }
 0x648   :  { %4220 = vst [vmem:[#allocation16 + $0xc] sm:$0xf] %v4217_v55  ;;  %4218 = vst [vmem:[#allocation4] sm:$0xf] %v4217_v55  ;;  %9506 = vrcp.f32 %v4559_v52  ;;  %v10945_v55 = vld [vmem:[#allocation15 + $0x84] ss:$16 sps:$4 sm:$0xff]  }
 0x649   :  { %v10963_v52 = vld [vmem:[#allocation15 + $0x60] ss:$16 sps:$4 sm:$0xff]  }
 0x64a   :  { %11892 = vst [vmem:[#allocation22_spill] sm:$0xff] %v10963_v52 }
 0x64d   :  { %v9503_v58 = vpop.eup %9502 }
 0x64e   :  { %v4563_v11 = vmul.f32 %v9503_v58, %v9499_v36  ;;  %v10947_v36 = vld [vmem:[#allocation15 + $0x8c] ss:$16 sps:$4 sm:$0xff]   ;;  %v10953_v58 = vld [vmem:[#allocation15 + $0x88] ss:$16 sps:$4 sm:$0xff]  }
 0x64f   :  { %v9505_v43 = vpop.eup %9504  ;;  %11889 = vst [vmem:[#allocation23_spill] sm:$0xff] %v10953_v58 }
 0x650   :  { %v4562_v45 = vmul.f32 %v9505_v43, %v10662_v61  ;;  %v10925_v61 = vld [vmem:[#allocation15 + $0xc0] ss:$16 sps:$4 sm:$0xff]   ;;  %v10959_v43 = vld [vmem:[#allocation15 + $0x6c] ss:$16 sps:$4 sm:$0xff]  }
 0x651   :  { %11891 = vst [vmem:[#allocation21_spill] sm:$0xff] %v10959_v43 }
 0x652   :  { %v10912_v40 = vadd.f32 %v4563_v11, %v4562_v45  ;;  %v10957_v11 = vld [vmem:[#allocation15 + $0x64] ss:$16 sps:$4 sm:$0xff]   ;;  %v10965_v45 = vld [vmem:[#allocation15 + $0x68] ss:$16 sps:$4 sm:$0xff]  }
 0x653   :  { %11890 = vst [vmem:[#allocation24_spill] sm:$0xff] %v10957_v11  ;;  %11893 = vst [vmem:[#allocation64_spill] sm:$0xff] %v10965_v45 }
 0x654   :  { %9508 = vtanh.f32 %v10912_v40 }
 0x655   :  { %v9507_v37 = vpop.eup %9506 }
 0x661   :  { %v9509_v57 = vpop.eup %9508 }
 0x662   :  { %v4566_v24 = vmul.f32 %v9509_v57, %v9507_v37  ;;  %v10969_v37 = vld [vmem:[#allocation15 + $0x44] ss:$16 sps:$4 sm:$0xff]   ;;  %v10971_v57 = vld [vmem:[#allocation15 + $0x4c] ss:$16 sps:$4 sm:$0xff]  }
 0x663   :  { %11894 = vst [vmem:[#allocation65_spill] sm:$0xff] %v10969_v37  ;;  %11895 = vst [vmem:[#allocation66_spill] sm:$0xff] %v10971_v57 }
 0x664   :  { %v4568_v4 = vpack.c.bf16 %v4566_v24, %v4566_v24  ;;  %v10975_v24 = vld [vmem:[#allocation15 + $0x40] ss:$16 sps:$4 sm:$0xff]  }
 0x665   :  { %11896 = vst [vmem:[#allocation67_spill] sm:$0xff] %v10975_v24 }
 0x666   :  { %4795 = vmatmul.mubr.bf16.vlgmr.msra.gmra.mxu0 %v4568_v4  ;;  %4569 = vst [vmem:[#allocation3] sm:$0xf] %v4568_v4  ;;  %4836 = vmatmul.mubr.bf16.vlgmr.msra.gmra.mxu1 %v4568_v4  ;;  %v10977_v4 = vld [vmem:[#allocation15 + $0x48] ss:$16 sps:$4 sm:$0xff]  }
 0x667   :  { %5005 = vmatpush1.bf16.msra.mxu0 %v10915_v5  ;;  %5046 = vmatpush1.bf16.msra.mxu1 %v10917_v41 }
 0x668   :  { %5006 = vmatprep.subr.bf16.mxu0 %v10919_v49  ;;  %5047 = vmatprep.subr.bf16.mxu1 %v10921_v60 }
 0x669   :  { %5036 = vmatprep.mubr.bf16.mxu0 %v11735_v48  ;;  %5077 = vmatprep.mubr.bf16.mxu1 %v11735_v48 }
 0x66b   :  { %5007 = vmatpush1.bf16.msra.mxu0 %v10925_v61  ;;  %5048 = vmatpush1.bf16.msra.mxu1 %v10927_v50 }
 0x66c   :  { %5008 = vmatprep.subr.bf16.mxu0 %v10931_v20  ;;  %5049 = vmatprep.subr.bf16.mxu1 %v10933_v31 }
 0x66f   :  { %5009 = vmatpush1.bf16.msra.mxu0 %v10939_v7  ;;  %5050 = vmatpush1.bf16.msra.mxu1 %v10941_v0 }
 0x670   :  { %5010 = vmatprep.subr.bf16.mxu0 %v10945_v55  ;;  %5051 = vmatprep.subr.bf16.mxu1 %v10947_v36 }
 0x673   :  { %5011 = vmatpush1.bf16.msra.mxu0 %v10951_v51  ;;  %5052 = vmatpush1.bf16.msra.mxu1 %v10953_v58  ;;  %v10981_v58 = vld [vmem:[#allocation15 + $0x24] ss:$16 sps:$4 sm:$0xff]  }
 0x674   :  { %5012 = vmatprep.subr.bf16.mxu0 %v10957_v11  ;;  %5053 = vmatprep.subr.bf16.mxu1 %v10959_v43  ;;  %v10983_v11 = vld [vmem:[#allocation15 + $0x2c] ss:$16 sps:$4 sm:$0xff]   ;;  %v10987_v43 = vld [vmem:[#allocation15 + $0x20] ss:$16 sps:$4 sm:$0xff]  }
 0x675   :  { %11897 = vst [vmem:[#allocation68_spill] sm:$0xff] %v10983_v11 }
 0x677   :  { %5013 = vmatpush1.bf16.msra.mxu0 %v10963_v52  ;;  %5054 = vmatpush1.bf16.msra.mxu1 %v10965_v45  ;;  %v10989_v52 = vld [vmem:[#allocation15 + $0x28] ss:$16 sps:$4 sm:$0xff]   ;;  %v10993_v45 = vld [vmem:[#allocation15 + $0x4] ss:$16 sps:$4 sm:$0xff]  }
 0x678   :  { %5014 = vmatprep.subr.bf16.mxu0 %v10969_v37  ;;  %5055 = vmatprep.subr.bf16.mxu1 %v10971_v57  ;;  %v10995_v37 = vld [vmem:[#allocation15 + $0xc] ss:$16 sps:$4 sm:$0xff]   ;;  %v10999_v57 = vld [vmem:[#allocation15] ss:$16 sps:$4 sm:$0xff]  }
 0x67b   :  { %5015 = vmatpush1.bf16.msra.mxu0 %v10975_v24  ;;  %5056 = vmatpush1.bf16.msra.mxu1 %v10977_v4  ;;  %v11001_v24 = vld [vmem:[#allocation15 + $0x8] ss:$16 sps:$4 sm:$0xff]  }
 0x67c   :  { %5016 = vmatprep.subr.bf16.mxu0 %v10981_v58  ;;  %5057 = vmatprep.subr.bf16.mxu1 %v10983_v11  ;;  %v4221_v11 = vld [vmem:[#allocation4] sm:$0xf] }
 0x67f   :  { %5017 = vmatpush1.bf16.msra.mxu0 %v10987_v43  ;;  %5058 = vmatpush1.bf16.msra.mxu1 %v10989_v52 }
 0x680   :  { %5018 = vmatprep.subr.bf16.mxu0 %v10993_v45  ;;  %5059 = vmatprep.subr.bf16.mxu1 %v10995_v37 }
 0x683   :  { %5019 = vmatpush1.bf16.msra.mxu0 %v10999_v57  ;;  %5060 = vmatpush1.bf16.msra.mxu1 %v11001_v24 }
 0x684   :  { %5355 = vmatprep.subr.bf16.mxu0 %v10695_v63  ;;  %5396 = vmatprep.subr.bf16.mxu1 %v10697_v54  ;;  %v5162_v63 = vld [vmem:[#allocation3] sm:$0xf]  ;;  %v11898_v54 = vld [vmem:[#allocation33_spill] sm:$0xff] }
 0x686   :  { %5037 = vmatmul.mubr.bf16.vlgmr.msra.gmra.mxu0 %v4221_v11  ;;  %5078 = vmatmul.mubr.bf16.vlgmr.msra.gmra.mxu1 %v4221_v11 }
 0x687   :  { %5356 = vmatpush1.bf16.msra.mxu0 %v10701_v56  ;;  %5397 = vmatpush1.bf16.msra.mxu1 %v10703_v53  ;;  %v11899_v56 = vld [vmem:[#allocation34_spill] sm:$0xff]  ;;  %v11900_v53 = vld [vmem:[#allocation35_spill] sm:$0xff] }
 0x688   :  { %5357 = vmatprep.subr.bf16.mxu0 %v10707_v59  ;;  %5398 = vmatprep.subr.bf16.mxu1 %v10709_v2  ;;  %v11901_v59 = vld [vmem:[#allocation36_spill] sm:$0xff]  ;;  %v11902_v2 = vld [vmem:[#allocation37_spill] sm:$0xff] }
 0x689   :  { %5387 = vmatprep.mubr.bf16.mxu0 %v11735_v48  ;;  %5428 = vmatprep.mubr.bf16.mxu1 %v11735_v48 }
 0x68b   :  { %5358 = vmatpush1.bf16.msra.mxu0 %v10713_v44  ;;  %5399 = vmatpush1.bf16.msra.mxu1 %v10715_v6  ;;  %v11903_v44 = vld [vmem:[#allocation38_spill] sm:$0xff]  ;;  %v11904_v6 = vld [vmem:[#allocation39_spill] sm:$0xff] }
 0x68c   :  { %5359 = vmatprep.subr.bf16.mxu0 %v10719_v46  ;;  %5400 = vmatprep.subr.bf16.mxu1 %v10721_v62  ;;  %v11905_v46 = vld [vmem:[#allocation40_spill] sm:$0xff]  ;;  %v11906_v62 = vld [vmem:[#allocation41_spill] sm:$0xff] }
 0x68f   :  { %5360 = vmatpush1.bf16.msra.mxu0 %v10727_v42  ;;  %5401 = vmatpush1.bf16.msra.mxu1 %v10729_v47  ;;  %v11907_v42 = vld [vmem:[#allocation42_spill] sm:$0xff]  ;;  %v11908_v47 = vld [vmem:[#allocation43_spill] sm:$0xff] }
 0x690   :  { %5361 = vmatprep.subr.bf16.mxu0 %v10733_v8  ;;  %5402 = vmatprep.subr.bf16.mxu1 %v10735_v9  ;;  %v11909_v8 = vld [vmem:[#allocation44_spill] sm:$0xff]  ;;  %v11910_v9 = vld [vmem:[#allocation45_spill] sm:$0xff] }
 0x693   :  { %5362 = vmatpush1.bf16.msra.mxu0 %v10739_v10  ;;  %5403 = vmatpush1.bf16.msra.mxu1 %v10741_v12  ;;  %v11911_v10 = vld [vmem:[#allocation46_spill] sm:$0xff]  ;;  %v11912_v12 = vld [vmem:[#allocation48_spill] sm:$0xff] }
 0x694   :  { %5363 = vmatprep.subr.bf16.mxu0 %v10745_v13  ;;  %5404 = vmatprep.subr.bf16.mxu1 %v10747_v14  ;;  %v11913_v13 = vld [vmem:[#allocation49_spill] sm:$0xff]  ;;  %v11914_v14 = vld [vmem:[#allocation47_spill] sm:$0xff] }
 0x697   :  { %5364 = vmatpush1.bf16.msra.mxu0 %v10751_v15  ;;  %5405 = vmatpush1.bf16.msra.mxu1 %v10753_v16  ;;  %v11915_v15 = vld [vmem:[#allocation50_spill] sm:$0xff]  ;;  %v11916_v16 = vld [vmem:[#allocation51_spill] sm:$0xff] }
 0x698   :  { %5365 = vmatprep.subr.bf16.mxu0 %v10757_v18  ;;  %5406 = vmatprep.subr.bf16.mxu1 %v10759_v19  ;;  %v11917_v18 = vld [vmem:[#allocation52_spill] sm:$0xff]  ;;  %v11918_v19 = vld [vmem:[#allocation53_spill] sm:$0xff] }
 0x69b   :  { %5366 = vmatpush1.bf16.msra.mxu0 %v10763_v21  ;;  %5407 = vmatpush1.bf16.msra.mxu1 %v10765_v23  ;;  %v11919_v21 = vld [vmem:[#allocation54_spill] sm:$0xff]  ;;  %v11920_v23 = vld [vmem:[#allocation55_spill] sm:$0xff] }
 0x69c   :  { %5367 = vmatprep.subr.bf16.mxu0 %v10769_v3  ;;  %5408 = vmatprep.subr.bf16.mxu1 %v10771_v25  ;;  %v11921_v3 = vld [vmem:[#allocation56_spill] sm:$0xff]  ;;  %v11922_v25 = vld [vmem:[#allocation57_spill] sm:$0xff] }
 0x69f   :  { %5368 = vmatpush1.bf16.msra.mxu0 %v10775_v26  ;;  %5409 = vmatpush1.bf16.msra.mxu1 %v10777_v27  ;;  %v11923_v26 = vld [vmem:[#allocation58_spill] sm:$0xff]  ;;  %v11924_v27 = vld [vmem:[#allocation59_spill] sm:$0xff] }
 0x6a0   :  { %5369 = vmatprep.subr.bf16.mxu0 %v10781_v28  ;;  %5410 = vmatprep.subr.bf16.mxu1 %v10783_v29  ;;  %v11925_v28 = vld [vmem:[#allocation60_spill] sm:$0xff]  ;;  %v11926_v29 = vld [vmem:[#allocation61_spill] sm:$0xff] }
 0x6a3   :  { %5370 = vmatpush1.bf16.msra.mxu0 %v10787_v30  ;;  %5411 = vmatpush1.bf16.msra.mxu1 %v10789_v1  ;;  %v11927_v30 = vld [vmem:[#allocation62_spill] sm:$0xff]  ;;  %v11928_v1 = vld [vmem:[#allocation63_spill] sm:$0xff] }
 0x6a4   :  { %5661 = vmatprep.subr.bf16.mxu0 %v10797_v32  ;;  %5702 = vmatprep.subr.bf16.mxu1 %v10799_v33 }
 0x6a6   :  { %5388 = vmatmul.mubr.bf16.vlgmr.msra.gmra.mxu0 %v5162_v63  ;;  %5429 = vmatmul.mubr.bf16.vlgmr.msra.gmra.mxu1 %v5162_v63 }
 0x6a7   :  { %5662 = vmatpush1.bf16.msra.mxu0 %v10801_v34  ;;  %5703 = vmatpush1.bf16.msra.mxu1 %v11898_v54 }
 0x6a8   :  { %5663 = vmatprep.subr.bf16.mxu0 %v11899_v56  ;;  %5704 = vmatprep.subr.bf16.mxu1 %v11900_v53 }
 0x6a9   :  { %5693 = vmatprep.mubr.bf16.mxu0 %v11735_v48  ;;  %5734 = vmatprep.mubr.bf16.mxu1 %v11735_v48 }
 0x6ab   :  { %5664 = vmatpush1.bf16.msra.mxu0 %v11901_v59  ;;  %5705 = vmatpush1.bf16.msra.mxu1 %v11902_v2 }
 0x6ac   :  { %5665 = vmatprep.subr.bf16.mxu0 %v11903_v44  ;;  %5706 = vmatprep.subr.bf16.mxu1 %v11904_v6 }
 0x6af   :  { %5666 = vmatpush1.bf16.msra.mxu0 %v11905_v46  ;;  %5707 = vmatpush1.bf16.msra.mxu1 %v11906_v62 }
 0x6b0   :  { %5667 = vmatprep.subr.bf16.mxu0 %v11907_v42  ;;  %5708 = vmatprep.subr.bf16.mxu1 %v11908_v47 }
 0x6b3   :  { %5668 = vmatpush1.bf16.msra.mxu0 %v11909_v8  ;;  %5709 = vmatpush1.bf16.msra.mxu1 %v11910_v9 }
 0x6b4   :  { %5669 = vmatprep.subr.bf16.mxu0 %v11911_v10  ;;  %5710 = vmatprep.subr.bf16.mxu1 %v11912_v12 }
 0x6b7   :  { %5670 = vmatpush1.bf16.msra.mxu0 %v11913_v13  ;;  %5711 = vmatpush1.bf16.msra.mxu1 %v11914_v14 }
 0x6b8   :  { %5671 = vmatprep.subr.bf16.mxu0 %v11915_v15  ;;  %5712 = vmatprep.subr.bf16.mxu1 %v11916_v16 }
 0x6bb   :  { %5672 = vmatpush1.bf16.msra.mxu0 %v11917_v18  ;;  %5713 = vmatpush1.bf16.msra.mxu1 %v11918_v19 }
 0x6bc   :  { %5673 = vmatprep.subr.bf16.mxu0 %v11919_v21  ;;  %5714 = vmatprep.subr.bf16.mxu1 %v11920_v23 }
 0x6bf   :  { %5674 = vmatpush1.bf16.msra.mxu0 %v11921_v3  ;;  %5715 = vmatpush1.bf16.msra.mxu1 %v11922_v25 }
 0x6c0   :  { %5675 = vmatprep.subr.bf16.mxu0 %v11923_v26  ;;  %5716 = vmatprep.subr.bf16.mxu1 %v11924_v27  ;;  %v11929_v27 = vld [vmem:[#allocation27_spill] sm:$0xff] }
 0x6c3   :  { %5676 = vmatpush1.bf16.msra.mxu0 %v11925_v28  ;;  %5717 = vmatpush1.bf16.msra.mxu1 %v11926_v29  ;;  %v5158_v28 = vunpack.c.l.bf16 %v11929_v27 }
 0x6c4   :  { %5903 = vmatprep.subr.bf16.mxu0 %v11927_v30  ;;  %5944 = vmatprep.subr.bf16.mxu1 %v11928_v1 }
 0x726   :  { %v4796_v32 = vpop.f32.mrf.mxu0  ;;  %v4837_v33 = vpop.f32.mrf.mxu1 }
 0x728   :  { %v4798_v34 = vpop.f32.mrf.mxu0  ;;  %v4839_v11 = vpop.f32.mrf.mxu1 }
 0x72a   :  { %v4800_v63 = vpop.f32.mrf.mxu0  ;;  %v4841_v54 = vpop.f32.mrf.mxu1 }
 0x72c   :  { %v4801_v56 = vpop.f32.mrf.mxu0  ;;  %v4842_v53 = vpop.f32.mrf.mxu1 }
 0x746   :  { %v5038_v59 = vpop.f32.mrf.mxu0  ;;  %v5079_v2 = vpop.f32.mrf.mxu1 }
 0x747   :  { %v5039_v44 = vadd.f32 %v5038_v59, %v4796_v32  ;;  %v5080_v18 = vadd.f32 %v5079_v2, %v4837_v33  ;;  %v5159_v32 = vunpack.c.h.bf16 %v11929_v27 }
 0x748   :  { %v5040_v6 = vpop.f32.mrf.mxu0  ;;  %v5081_v46 = vpop.f32.mrf.mxu1 }
 0x749   :  { %v5086_v62 = vadd.f32 %v5039_v44, %v10208_v17  ;;  %v5041_v42 = vadd.f32 %v5040_v6, %v4798_v34  ;;  %v5082_v15 = vadd.f32 %v5081_v46, %v4839_v11  ;;  %v5088_v23 = vadd.f32 %v5080_v18, %v10223_v39 }
 0x74a   :  { %v5042_v47 = vpop.f32.mrf.mxu0  ;;  %v5083_v8 = vpop.f32.mrf.mxu1 }
 0x74b   :  { %v8402_v9 = vmul.f32 -1.442695, %v5086_v62  ;;  %v5087_v10 = vadd.f32 %v5041_v42, %v10212_v22  ;;  %v5089_v16 = vadd.f32 %v5082_v15, %v10218_v35 }
 0x74c   :  { %v5043_v12 = vpop.f32.mrf.mxu0  ;;  %v5084_v13 = vpop.f32.mrf.mxu1 }
 0x74d   :  { %9510 = vpow2.f32 %v8402_v9  ;;  %v8403_v14 = vmul.f32 -1.442695, %v5087_v10  ;;  %v8404_v19 = vmul.f32 -1.442695, %v5089_v16  ;;  %v11930_v10 = vld [vmem:[#allocation28_spill] sm:$0xff] }
 0x74e   :  { %v5161_v12 = vunpack.c.h.bf16 %v11930_v10 }
 0x74f   :  { %9512 = vpow2.f32 %v8403_v14  ;;  %v5160_v14 = vunpack.c.l.bf16 %v11930_v10  ;;  %v11191_v10 = vld [vmem:[#allocation12 + $0x40] ss:$16 sps:$4 sm:$0xff]  }
 0x750   :  { %9514 = vpow2.f32 %v8404_v19 }
 0x75a   :  { %v9511_v21 = vpop.eup %9510 }
 0x75b   :  { %v5094_v3 = vadd.f32 1.0, %v9511_v21 }
 0x75c   :  { %v9513_v25 = vpop.eup %9512 }
 0x75d   :  { %9516 = vrcp.f32 %v5094_v3  ;;  %v5100_v26 = vadd.f32 1.0, %v9513_v25  ;;  %v9515_v11 = vpop.eup %9514 }
 0x75e   :  { %9518 = vtanh.f32 %v5088_v23  ;;  %v5107_v46 = vadd.f32 1.0, %v9515_v11 }
 0x75f   :  { %9520 = vrcp.f32 %v5100_v26 }
 0x766   :  { %v5389_v29 = vpop.f32.mrf.mxu0  ;;  %v5430_v30 = vpop.f32.mrf.mxu1 }
 0x767   :  { %v5437_v1 = vadd.f32 %v5389_v29, %v5158_v28  ;;  %v5439_v15 = vadd.f32 %v5430_v30, %v5160_v14  ;;  %v11199_v14 = vld [vmem:[#allocation12 + $0x2c] ss:$16 sps:$4 sm:$0xff]  }
 0x768   :  { %v5391_v34 = vpop.f32.mrf.mxu0  ;;  %v5432_v33 = vpop.f32.mrf.mxu1 }
 0x769   :  { %v8437_v63 = vmul.f32 -1.442695, %v5437_v1  ;;  %v5438_v54 = vadd.f32 %v5391_v34, %v5159_v32  ;;  %v5440_v13 = vadd.f32 %v5432_v33, %v5161_v12  ;;  %v11193_v12 = vld [vmem:[#allocation12 + $0x48] ss:$16 sps:$4 sm:$0xff]  }
 0x76a   :  { %v9517_v56 = vpop.eup %9516  ;;  %v5393_v53 = vpop.f32.mrf.mxu0 }
 0x76b   :  { %v5434_v59 = vpop.f32.mrf.mxu1  ;;  %v9519_v2 = vpop.eup %9518  ;;  %9522 = vpow2.f32 %v8437_v63  ;;  %v8438_v44 = vmul.f32 -1.442695, %v5438_v54  ;;  %v8439_v16 = vmul.f32 -1.442695, %v5440_v13  ;;  %v11161_v53 = vld [vmem:[#allocation12 + $0x84] ss:$16 sps:$4 sm:$0xff]  }
 0x76c   :  { %v9521_v6 = vpop.eup %9520  ;;  %v5394_v62 = vpop.f32.mrf.mxu0  ;;  %v5111_v47 = vmul.f32 %v9519_v2, %v9517_v56  ;;  %v11163_v59 = vld [vmem:[#allocation12 + $0x8c] ss:$16 sps:$4 sm:$0xff]   ;;  %v11167_v2 = vld [vmem:[#allocation12 + $0x80] ss:$16 sps:$4 sm:$0xff]   ;;  %v11197_v13 = vld [vmem:[#allocation12 + $0x24] ss:$16 sps:$4 sm:$0xff]  }
 0x76d   :  { %v5435_v42 = vpop.f32.mrf.mxu1  ;;  %v5110_v8 = vmul.f32 %v9521_v6, %v10906_v38  ;;  %9524 = vpow2.f32 %v8438_v44  ;;  %v11169_v44 = vld [vmem:[#allocation12 + $0x88] ss:$16 sps:$4 sm:$0xff]   ;;  %v11173_v6 = vld [vmem:[#allocation12 + $0x64] ss:$16 sps:$4 sm:$0xff]   ;;  %v11179_v62 = vld [vmem:[#allocation12 + $0x60] ss:$16 sps:$4 sm:$0xff]  }
 0x76e   :  { %9526 = vrcp.f32 %v5107_v46  ;;  %v11175_v46 = vld [vmem:[#allocation12 + $0x6c] ss:$16 sps:$4 sm:$0xff]   ;;  %v11181_v42 = vld [vmem:[#allocation12 + $0x68] ss:$16 sps:$4 sm:$0xff]  }
 0x76f   :  { %v11084_v9 = vadd.f32 %v5111_v47, %v5110_v8  ;;  %v11185_v47 = vld [vmem:[#allocation12 + $0x44] ss:$16 sps:$4 sm:$0xff]   ;;  %v11187_v8 = vld [vmem:[#allocation12 + $0x4c] ss:$16 sps:$4 sm:$0xff]  }
 0x771   :  { %9528 = vtanh.f32 %v11084_v9 }
 0x772   :  { %9530 = vtanh.f32 %v5439_v15  ;;  %v11203_v15 = vld [vmem:[#allocation12 + $0x20] ss:$16 sps:$4 sm:$0xff]  }
 0x773   :  { %9532 = vpow2.f32 %v8439_v16  ;;  %v11205_v16 = vld [vmem:[#allocation12 + $0x28] ss:$16 sps:$4 sm:$0xff]  }
 0x778   :  { %v9523_v18 = vpop.eup %9522 }
 0x779   :  { %v5445_v19 = vadd.f32 1.0, %v9523_v18  ;;  %v11209_v18 = vld [vmem:[#allocation12 + $0x4] ss:$16 sps:$4 sm:$0xff]  }
 0x77a   :  { %v9525_v21 = vpop.eup %9524 }
 0x77b   :  { %9534 = vrcp.f32 %v5445_v19  ;;  %v5451_v38 = vadd.f32 1.0, %v9525_v21  ;;  %v9527_v23 = vpop.eup %9526  ;;  %v11211_v19 = vld [vmem:[#allocation12 + $0xc] ss:$16 sps:$4 sm:$0xff]   ;;  %v11215_v21 = vld [vmem:[#allocation12] ss:$16 sps:$4 sm:$0xff]  }
 0x77d   :  { %9536 = vrcp.f32 %v5451_v38  ;;  %v11217_v38 = vld [vmem:[#allocation12 + $0x8] ss:$16 sps:$4 sm:$0xff]  }
 0x77e   :  { %v9529_v3 = vpop.eup %9528 }
 0x77f   :  { %v5114_v25 = vmul.f32 %v9529_v3, %v9527_v23  ;;  %v9531_v27 = vpop.eup %9530  ;;  %v11225_v3 = vld [vmem:[#allocation13 + $0xe4] ss:$16 sps:$4 sm:$0xff]  }
 0x780   :  { %v9533_v28 = vpop.eup %9532 }
 0x781   :  { %v5116_v26 = vpack.c.bf16 %v5114_v25, %v5114_v25  ;;  %v5458_v32 = vadd.f32 1.0, %v9533_v28  ;;  %v11227_v25 = vld [vmem:[#allocation13 + $0xec] ss:$16 sps:$4 sm:$0xff]   ;;  %v11237_v28 = vld [vmem:[#allocation13 + $0xc4] ss:$16 sps:$4 sm:$0xff]  }
 0x782   :  { %11941 = vst [vmem:[#allocation70_spill] sm:$0xff] %v11237_v28 }
 0x783   :  { %5119 = vst [vmem:[#allocation16 + $0x10] sm:$0xf] %v5116_v26  ;;  %5117 = vst [vmem:[#allocation4] sm:$0xf] %v5116_v26  ;;  %9538 = vrcp.f32 %v5458_v32  ;;  %v11229_v26 = vld [vmem:[#allocation13 + $0xe0] ss:$16 sps:$4 sm:$0xff]  }
 0x784   :  { %v11249_v32 = vld [vmem:[#allocation13 + $0xa4] ss:$16 sps:$4 sm:$0xff]  }
 0x785   :  { %11945 = vst [vmem:[#allocation34_spill] sm:$0xff] %v11249_v32 }
 0x788   :  { %v9535_v29 = vpop.eup %9534 }
 0x789   :  { %v5462_v1 = vmul.f32 %v9535_v29, %v9531_v27  ;;  %v11231_v27 = vld [vmem:[#allocation13 + $0xe8] ss:$16 sps:$4 sm:$0xff]   ;;  %v11239_v29 = vld [vmem:[#allocation13 + $0xcc] ss:$16 sps:$4 sm:$0xff]  }
 0x78a   :  { %v9537_v30 = vpop.eup %9536  ;;  %11940 = vst [vmem:[#allocation69_spill] sm:$0xff] %v11231_v27  ;;  %11942 = vst [vmem:[#allocation25_spill] sm:$0xff] %v11239_v29 }
 0x78b   :  { %v5461_v34 = vmul.f32 %v9537_v30, %v10912_v40  ;;  %v11931_v40 = vld [vmem:[#allocation23_spill] sm:$0xff]  ;;  %v11243_v30 = vld [vmem:[#allocation13 + $0xc8] ss:$16 sps:$4 sm:$0xff]  }
 0x78c   :  { %11944 = vst [vmem:[#allocation33_spill] sm:$0xff] %v11243_v30 }
 0x78d   :  { %v11090_v33 = vadd.f32 %v5462_v1, %v5461_v34  ;;  %v11241_v1 = vld [vmem:[#allocation13 + $0xc0] ss:$16 sps:$4 sm:$0xff]   ;;  %v11251_v34 = vld [vmem:[#allocation13 + $0xac] ss:$16 sps:$4 sm:$0xff]  }
 0x78e   :  { %11943 = vst [vmem:[#allocation26_spill] sm:$0xff] %v11241_v1  ;;  %11946 = vst [vmem:[#allocation35_spill] sm:$0xff] %v11251_v34 }
 0x78f   :  { %9540 = vtanh.f32 %v11090_v33 }
 0x790   :  { %v9539_v11 = vpop.eup %9538 }
 0x79c   :  { %v9541_v63 = vpop.eup %9540 }
 0x79d   :  { %v5465_v54 = vmul.f32 %v9541_v63, %v9539_v11  ;;  %v11253_v11 = vld [vmem:[#allocation13 + $0xa0] ss:$16 sps:$4 sm:$0xff]   ;;  %v11255_v63 = vld [vmem:[#allocation13 + $0xa8] ss:$16 sps:$4 sm:$0xff]  }
 0x79e   :  { %11947 = vst [vmem:[#allocation36_spill] sm:$0xff] %v11253_v11  ;;  %11948 = vst [vmem:[#allocation37_spill] sm:$0xff] %v11255_v63 }
 0x79f   :  { %v5467_v56 = vpack.c.bf16 %v5465_v54, %v5465_v54  ;;  %v11261_v54 = vld [vmem:[#allocation13 + $0x84] ss:$16 sps:$4 sm:$0xff]  }
 0x7a0   :  { %11949 = vst [vmem:[#allocation38_spill] sm:$0xff] %v11261_v54 }
 0x7a1   :  { %5694 = vmatmul.mubr.bf16.vlgmr.msra.gmra.mxu0 %v5467_v56  ;;  %5468 = vst [vmem:[#allocation3] sm:$0xf] %v5467_v56  ;;  %5735 = vmatmul.mubr.bf16.vlgmr.msra.gmra.mxu1 %v5467_v56  ;;  %v11263_v56 = vld [vmem:[#allocation13 + $0x8c] ss:$16 sps:$4 sm:$0xff]  }
 0x7a2   :  { %5904 = vmatpush1.bf16.msra.mxu0 %v10915_v5  ;;  %5945 = vmatpush1.bf16.msra.mxu1 %v10917_v41  ;;  %v11932_v5 = vld [vmem:[#allocation24_spill] sm:$0xff]  ;;  %v11933_v41 = vld [vmem:[#allocation21_spill] sm:$0xff]  ;;  %11950 = vst [vmem:[#allocation39_spill] sm:$0xff] %v11263_v56 }
 0x7a3   :  { %5905 = vmatprep.subr.bf16.mxu0 %v10919_v49  ;;  %5946 = vmatprep.subr.bf16.mxu1 %v10921_v60  ;;  %v11934_v49 = vld [vmem:[#allocation22_spill] sm:$0xff]  ;;  %v11935_v60 = vld [vmem:[#allocation64_spill] sm:$0xff] }
 0x7a4   :  { %5935 = vmatprep.mubr.bf16.mxu0 %v11735_v48  ;;  %5976 = vmatprep.mubr.bf16.mxu1 %v11735_v48 }
 0x7a6   :  { %5906 = vmatpush1.bf16.msra.mxu0 %v10925_v61  ;;  %5947 = vmatpush1.bf16.msra.mxu1 %v10927_v50  ;;  %v11936_v61 = vld [vmem:[#allocation65_spill] sm:$0xff]  ;;  %v11937_v50 = vld [vmem:[#allocation66_spill] sm:$0xff] }
 0x7a7   :  { %5907 = vmatprep.subr.bf16.mxu0 %v10931_v20  ;;  %5948 = vmatprep.subr.bf16.mxu1 %v10933_v31  ;;  %v11938_v20 = vld [vmem:[#allocation67_spill] sm:$0xff]  ;;  %v11939_v31 = vld [vmem:[#allocation68_spill] sm:$0xff] }
 0x7a8   :  { %v6061_v23 = vld [vmem:[#allocation3] sm:$0xf] }
 0x7aa   :  { %5908 = vmatpush1.bf16.msra.mxu0 %v10939_v7  ;;  %5949 = vmatpush1.bf16.msra.mxu1 %v10941_v0  ;;  %v11123_v7 = vld [vmem:[#allocation12 + $0xe4] ss:$16 sps:$4 sm:$0xff]   ;;  %v11125_v0 = vld [vmem:[#allocation12 + $0xec] ss:$16 sps:$4 sm:$0xff]  }
 0x7ab   :  { %5909 = vmatprep.subr.bf16.mxu0 %v10945_v55  ;;  %5950 = vmatprep.subr.bf16.mxu1 %v10947_v36  ;;  %v11129_v55 = vld [vmem:[#allocation12 + $0xe0] ss:$16 sps:$4 sm:$0xff]   ;;  %v11131_v36 = vld [vmem:[#allocation12 + $0xe8] ss:$16 sps:$4 sm:$0xff]  }
 0x7ae   :  { %5910 = vmatpush1.bf16.msra.mxu0 %v10951_v51  ;;  %5951 = vmatpush1.bf16.msra.mxu1 %v11931_v40  ;;  %v11135_v51 = vld [vmem:[#allocation12 + $0xc4] ss:$16 sps:$4 sm:$0xff]   ;;  %v11265_v40 = vld [vmem:[#allocation13 + $0x80] ss:$16 sps:$4 sm:$0xff]  }
 0x7af   :  { %5911 = vmatprep.subr.bf16.mxu0 %v11932_v5  ;;  %5952 = vmatprep.subr.bf16.mxu1 %v11933_v41  ;;  %11951 = vst [vmem:[#allocation40_spill] sm:$0xff] %v11265_v40  ;;  %v11267_v5 = vld [vmem:[#allocation13 + $0x88] ss:$16 sps:$4 sm:$0xff]   ;;  %v11271_v41 = vld [vmem:[#allocation13 + $0x64] ss:$16 sps:$4 sm:$0xff]  }
 0x7b0   :  { %11952 = vst [vmem:[#allocation41_spill] sm:$0xff] %v11267_v5  ;;  %11953 = vst [vmem:[#allocation42_spill] sm:$0xff] %v11271_v41 }
 0x7b2   :  { %5912 = vmatpush1.bf16.msra.mxu0 %v11934_v49  ;;  %5953 = vmatpush1.bf16.msra.mxu1 %v11935_v60  ;;  %v11275_v49 = vld [vmem:[#allocation13 + $0x60] ss:$16 sps:$4 sm:$0xff]   ;;  %v11277_v60 = vld [vmem:[#allocation13 + $0x68] ss:$16 sps:$4 sm:$0xff]  }
 0x7b3   :  { %5913 = vmatprep.subr.bf16.mxu0 %v11936_v61  ;;  %5954 = vmatprep.subr.bf16.mxu1 %v11937_v50  ;;  %11954 = vst [vmem:[#allocation43_spill] sm:$0xff] %v11275_v49  ;;  %11955 = vst [vmem:[#allocation44_spill] sm:$0xff] %v11277_v60  ;;  %v11279_v61 = vld [vmem:[#allocation13 + $0x6c] ss:$16 sps:$4 sm:$0xff]   ;;  %v11282_v50 = vld [vmem:[#allocation13 + $0x44] ss:$16 sps:$4 sm:$0xff]  }
 0x7b4   :  { %11956 = vst [vmem:[#allocation45_spill] sm:$0xff] %v11279_v61  ;;  %11957 = vst [vmem:[#allocation46_spill] sm:$0xff] %v11282_v50 }
 0x7b6   :  { %5914 = vmatpush1.bf16.msra.mxu0 %v11938_v20  ;;  %5955 = vmatpush1.bf16.msra.mxu1 %v10977_v4  ;;  %v11157_v4 = vld [vmem:[#allocation12 + $0xa8] ss:$16 sps:$4 sm:$0xff]   ;;  %v11284_v20 = vld [vmem:[#allocation13 + $0x4c] ss:$16 sps:$4 sm:$0xff]  }
 0x7b7   :  { %5915 = vmatprep.subr.bf16.mxu0 %v10981_v58  ;;  %5956 = vmatprep.subr.bf16.mxu1 %v11939_v31  ;;  %v11137_v58 = vld [vmem:[#allocation12 + $0xcc] ss:$16 sps:$4 sm:$0xff]   ;;  %11958 = vst [vmem:[#allocation48_spill] sm:$0xff] %v11284_v20  ;;  %v11289_v31 = vld [vmem:[#allocation13 + $0x40] ss:$16 sps:$4 sm:$0xff]  }
 0x7b8   :  { %11959 = vst [vmem:[#allocation49_spill] sm:$0xff] %v11289_v31 }
 0x7ba   :  { %5916 = vmatpush1.bf16.msra.mxu0 %v10987_v43  ;;  %5957 = vmatpush1.bf16.msra.mxu1 %v10989_v52  ;;  %v5120_v43 = vld [vmem:[#allocation4] sm:$0xf]  ;;  %v11141_v52 = vld [vmem:[#allocation12 + $0xc0] ss:$16 sps:$4 sm:$0xff]  }
 0x7bb   :  { %5917 = vmatprep.subr.bf16.mxu0 %v10993_v45  ;;  %5958 = vmatprep.subr.bf16.mxu1 %v10995_v37  ;;  %v11143_v45 = vld [vmem:[#allocation12 + $0xc8] ss:$16 sps:$4 sm:$0xff]   ;;  %v11147_v37 = vld [vmem:[#allocation12 + $0xa4] ss:$16 sps:$4 sm:$0xff]  }
 0x7be   :  { %5918 = vmatpush1.bf16.msra.mxu0 %v10999_v57  ;;  %5959 = vmatpush1.bf16.msra.mxu1 %v11001_v24  ;;  %v11149_v57 = vld [vmem:[#allocation12 + $0xac] ss:$16 sps:$4 sm:$0xff]   ;;  %v11155_v24 = vld [vmem:[#allocation12 + $0xa0] ss:$16 sps:$4 sm:$0xff]  }
 0x7bf   :  { %6254 = vmatprep.subr.bf16.mxu0 %v11123_v7  ;;  %6295 = vmatprep.subr.bf16.mxu1 %v11125_v0 }
 0x7c1   :  { %5936 = vmatmul.mubr.bf16.vlgmr.msra.gmra.mxu0 %v5120_v43  ;;  %5977 = vmatmul.mubr.bf16.vlgmr.msra.gmra.mxu1 %v5120_v43  ;;  %v11291_v43 = vld [vmem:[#allocation13 + $0x48] ss:$16 sps:$4 sm:$0xff]  }
 0x7c2   :  { %6255 = vmatpush1.bf16.msra.mxu0 %v11129_v55  ;;  %6296 = vmatpush1.bf16.msra.mxu1 %v11131_v36  ;;  %11960 = vst [vmem:[#allocation47_spill] sm:$0xff] %v11291_v43 }
 0x7c3   :  { %6256 = vmatprep.subr.bf16.mxu0 %v11135_v51  ;;  %6297 = vmatprep.subr.bf16.mxu1 %v11137_v58 }
 0x7c4   :  { %6286 = vmatprep.mubr.bf16.mxu0 %v11735_v48  ;;  %6327 = vmatprep.mubr.bf16.mxu1 %v11735_v48 }
 0x7c6   :  { %6257 = vmatpush1.bf16.msra.mxu0 %v11141_v52  ;;  %6298 = vmatpush1.bf16.msra.mxu1 %v11143_v45 }
 0x7c7   :  { %6258 = vmatprep.subr.bf16.mxu0 %v11147_v37  ;;  %6299 = vmatprep.subr.bf16.mxu1 %v11149_v57 }
 0x7ca   :  { %6259 = vmatpush1.bf16.msra.mxu0 %v11155_v24  ;;  %6300 = vmatpush1.bf16.msra.mxu1 %v11157_v4 }
 0x7cb   :  { %6260 = vmatprep.subr.bf16.mxu0 %v11161_v53  ;;  %6301 = vmatprep.subr.bf16.mxu1 %v11163_v59 }
 0x7ce   :  { %6261 = vmatpush1.bf16.msra.mxu0 %v11167_v2  ;;  %6302 = vmatpush1.bf16.msra.mxu1 %v11169_v44 }
 0x7cf   :  { %6262 = vmatprep.subr.bf16.mxu0 %v11173_v6  ;;  %6303 = vmatprep.subr.bf16.mxu1 %v11175_v46 }
 0x7d2   :  { %6263 = vmatpush1.bf16.msra.mxu0 %v11179_v62  ;;  %6304 = vmatpush1.bf16.msra.mxu1 %v11181_v42 }
 0x7d3   :  { %6264 = vmatprep.subr.bf16.mxu0 %v11185_v47  ;;  %6305 = vmatprep.subr.bf16.mxu1 %v11187_v8 }
 0x7d6   :  { %6265 = vmatpush1.bf16.msra.mxu0 %v11191_v10  ;;  %6306 = vmatpush1.bf16.msra.mxu1 %v11193_v12 }
 0x7d7   :  { %6266 = vmatprep.subr.bf16.mxu0 %v11197_v13  ;;  %6307 = vmatprep.subr.bf16.mxu1 %v11199_v14 }
 0x7da   :  { %6267 = vmatpush1.bf16.msra.mxu0 %v11203_v15  ;;  %6308 = vmatpush1.bf16.msra.mxu1 %v11205_v16 }
 0x7db   :  { %6268 = vmatprep.subr.bf16.mxu0 %v11209_v18  ;;  %6309 = vmatprep.subr.bf16.mxu1 %v11211_v19 }
 0x7de   :  { %6269 = vmatpush1.bf16.msra.mxu0 %v11215_v21  ;;  %6310 = vmatpush1.bf16.msra.mxu1 %v11217_v38 }
 0x7df   :  { %6560 = vmatprep.subr.bf16.mxu0 %v11225_v3  ;;  %6601 = vmatprep.subr.bf16.mxu1 %v11227_v25 }
 0x7e1   :  { %6287 = vmatmul.mubr.bf16.vlgmr.msra.gmra.mxu0 %v6061_v23  ;;  %6328 = vmatmul.mubr.bf16.vlgmr.msra.gmra.mxu1 %v6061_v23  ;;  %v11295_v23 = vld [vmem:[#allocation13 + $0x24] ss:$16 sps:$4 sm:$0xff]  }
 0x7e2   :  { %6592 = vmatprep.mubr.bf16.mxu0 %v11735_v48  ;;  %6633 = vmatprep.mubr.bf16.mxu1 %v11735_v48  ;;  %11961 = vst [vmem:[#allocation50_spill] sm:$0xff] %v11295_v23 }
 0x7e3   :  { %6561 = vmatpush1.bf16.msra.mxu0 %v11229_v26  ;;  %6602 = vmatpush1.bf16.msra.mxu1 %v11231_v27 }
 0x7e4   :  { %6562 = vmatprep.subr.bf16.mxu0 %v11237_v28  ;;  %6603 = vmatprep.subr.bf16.mxu1 %v11239_v29 }
 0x7e7   :  { %6563 = vmatpush1.bf16.msra.mxu0 %v11241_v1  ;;  %6604 = vmatpush1.bf16.msra.mxu1 %v11243_v30 }
 0x7e8   :  { %6564 = vmatprep.subr.bf16.mxu0 %v11249_v32  ;;  %6605 = vmatprep.subr.bf16.mxu1 %v11251_v34 }
 0x7eb   :  { %6565 = vmatpush1.bf16.msra.mxu0 %v11253_v11  ;;  %6606 = vmatpush1.bf16.msra.mxu1 %v11255_v63 }
 0x7ec   :  { %6566 = vmatprep.subr.bf16.mxu0 %v11261_v54  ;;  %6607 = vmatprep.subr.bf16.mxu1 %v11263_v56 }
 0x7ef   :  { %6567 = vmatpush1.bf16.msra.mxu0 %v11265_v40  ;;  %6608 = vmatpush1.bf16.msra.mxu1 %v11267_v5 }
 0x7f0   :  { %6568 = vmatprep.subr.bf16.mxu0 %v11271_v41  ;;  %6609 = vmatprep.subr.bf16.mxu1 %v11279_v61  ;;  %v11297_v41 = vld [vmem:[#allocation13 + $0x2c] ss:$16 sps:$4 sm:$0xff]   ;;  %v11301_v61 = vld [vmem:[#allocation13 + $0x20] ss:$16 sps:$4 sm:$0xff]  }
 0x7f1   :  { %11962 = vst [vmem:[#allocation51_spill] sm:$0xff] %v11297_v41  ;;  %11963 = vst [vmem:[#allocation52_spill] sm:$0xff] %v11301_v61 }
 0x7f3   :  { %6569 = vmatpush1.bf16.msra.mxu0 %v11275_v49  ;;  %6610 = vmatpush1.bf16.msra.mxu1 %v11277_v60  ;;  %v11303_v49 = vld [vmem:[#allocation13 + $0x28] ss:$16 sps:$4 sm:$0xff]   ;;  %v11307_v60 = vld [vmem:[#allocation13 + $0x4] ss:$16 sps:$4 sm:$0xff]  }
 0x7f4   :  { %6570 = vmatprep.subr.bf16.mxu0 %v11282_v50  ;;  %6611 = vmatprep.subr.bf16.mxu1 %v11284_v20  ;;  %11964 = vst [vmem:[#allocation53_spill] sm:$0xff] %v11303_v49  ;;  %11965 = vst [vmem:[#allocation54_spill] sm:$0xff] %v11307_v60  ;;  %v11309_v50 = vld [vmem:[#allocation13 + $0xc] ss:$16 sps:$4 sm:$0xff]   ;;  %v11313_v20 = vld [vmem:[#allocation13] ss:$16 sps:$4 sm:$0xff]  }
 0x7f5   :  { %11966 = vst [vmem:[#allocation55_spill] sm:$0xff] %v11309_v50  ;;  %11967 = vst [vmem:[#allocation56_spill] sm:$0xff] %v11313_v20 }
 0x7f7   :  { %6571 = vmatpush1.bf16.msra.mxu0 %v11289_v31  ;;  %6612 = vmatpush1.bf16.msra.mxu1 %v11291_v43  ;;  %v11315_v31 = vld [vmem:[#allocation13 + $0x8] ss:$16 sps:$4 sm:$0xff]   ;;  %v11319_v43 = vld [vmem:[#allocation15 + $0xe4] ss:$16 sps:$4 sm:$0xff]  }
 0x7f8   :  { %6572 = vmatprep.subr.bf16.mxu0 %v11295_v23  ;;  %6613 = vmatprep.subr.bf16.mxu1 %v11297_v41  ;;  %11968 = vst [vmem:[#allocation57_spill] sm:$0xff] %v11315_v31  ;;  %11969 = vst [vmem:[#allocation58_spill] sm:$0xff] %v11319_v43  ;;  %v11321_v23 = vld [vmem:[#allocation15 + $0xec] ss:$16 sps:$4 sm:$0xff]  }
 0x7f9   :  { %11970 = vst [vmem:[#allocation59_spill] sm:$0xff] %v11321_v23 }
 0x7fb   :  { %6573 = vmatpush1.bf16.msra.mxu0 %v11301_v61  ;;  %6614 = vmatpush1.bf16.msra.mxu1 %v11303_v49 }
 0x7fc   :  { %6574 = vmatprep.subr.bf16.mxu0 %v11307_v60  ;;  %6615 = vmatprep.subr.bf16.mxu1 %v11309_v50 }
 0x7ff   :  { %6575 = vmatpush1.bf16.msra.mxu0 %v11313_v20  ;;  %6616 = vmatpush1.bf16.msra.mxu1 %v11315_v31 }
 0x800   :  { %6802 = vmatprep.subr.bf16.mxu0 %v11319_v43  ;;  %6843 = vmatprep.subr.bf16.mxu1 %v11321_v23 }
 0x861   :  { %v5695_v49 = vpop.f32.mrf.mxu0  ;;  %v5736_v61 = vpop.f32.mrf.mxu1 }
 0x863   :  { %v5697_v41 = vpop.f32.mrf.mxu0  ;;  %v5738_v5 = vpop.f32.mrf.mxu1 }
 0x865   :  { %v5699_v40 = vpop.f32.mrf.mxu0  ;;  %v5740_v60 = vpop.f32.mrf.mxu1 }
 0x867   :  { %v5700_v56 = vpop.f32.mrf.mxu0  ;;  %v5741_v50 = vpop.f32.mrf.mxu1 }
 0x881   :  { %v5937_v54 = vpop.f32.mrf.mxu0  ;;  %v5978_v63 = vpop.f32.mrf.mxu1 }
 0x882   :  { %v5938_v11 = vadd.f32 %v5937_v54, %v5695_v49  ;;  %v5979_v50 = vadd.f32 %v5978_v63, %v5736_v61 }
 0x883   :  { %v5939_v34 = vpop.f32.mrf.mxu0  ;;  %v5980_v32 = vpop.f32.mrf.mxu1 }
 0x884   :  { %v5985_v20 = vadd.f32 %v5938_v11, %v10208_v17  ;;  %v5940_v31 = vadd.f32 %v5939_v34, %v5697_v41  ;;  %v5981_v56 = vadd.f32 %v5980_v32, %v5738_v5  ;;  %v5987_v27 = vadd.f32 %v5979_v50, %v10223_v39 }
 0x885   :  { %v5941_v30 = vpop.f32.mrf.mxu0  ;;  %v5982_v43 = vpop.f32.mrf.mxu1 }
 0x886   :  { %v8504_v1 = vmul.f32 -1.442695, %v5985_v20  ;;  %v5986_v23 = vadd.f32 %v5940_v31, %v10212_v22  ;;  %v5988_v60 = vadd.f32 %v5981_v56, %v10218_v35 }
 0x887   :  { %v5942_v29 = vpop.f32.mrf.mxu0  ;;  %v5983_v28 = vpop.f32.mrf.mxu1 }
 0x888   :  { %9542 = vpow2.f32 %v8504_v1  ;;  %v8505_v40 = vmul.f32 -1.442695, %v5986_v23  ;;  %v8506_v54 = vmul.f32 -1.442695, %v5988_v60  ;;  %v11971_v29 = vld [vmem:[#allocation29_spill] sm:$0xff] }
 0x889   :  { %v6057_v28 = vunpack.c.l.bf16 %v11971_v29  ;;  %v6058_v32 = vunpack.c.h.bf16 %v11971_v29 }
 0x88a   :  { %9544 = vpow2.f32 %v8505_v40 }
 0x88b   :  { %9546 = vpow2.f32 %v8506_v54 }
 0x895   :  { %v9543_v49 = vpop.eup %9542 }
 0x896   :  { %v5993_v11 = vadd.f32 1.0, %v9543_v49 }
 0x897   :  { %v9545_v34 = vpop.eup %9544 }
 0x898   :  { %9548 = vrcp.f32 %v5993_v11  ;;  %v5999_v30 = vadd.f32 1.0, %v9545_v34  ;;  %v9547_v61 = vpop.eup %9546 }
 0x899   :  { %9550 = vtanh.f32 %v5987_v27  ;;  %v6006_v54 = vadd.f32 1.0, %v9547_v61 }
 0x89a   :  { %9552 = vrcp.f32 %v5999_v30 }
 0x8a1   :  { %v6288_v1 = vpop.f32.mrf.mxu0  ;;  %v6329_v41 = vpop.f32.mrf.mxu1 }
 0x8a2   :  { %v6336_v20 = vadd.f32 %v6288_v1, %v6057_v28  ;;  %v11972_v28 = vld [vmem:[#allocation30_spill] sm:$0xff] }
 0x8a3   :  { %v6290_v5 = vpop.f32.mrf.mxu0  ;;  %v6331_v63 = vpop.f32.mrf.mxu1  ;;  %v6060_v1 = vunpack.c.h.bf16 %v11972_v28 }
 0x8a4   :  { %v8539_v31 = vmul.f32 -1.442695, %v6336_v20  ;;  %v6337_v43 = vadd.f32 %v6290_v5, %v6058_v32  ;;  %v6059_v32 = vunpack.c.l.bf16 %v11972_v28 }
 0x8a5   :  { %v9549_v23 = vpop.eup %9548  ;;  %v6292_v40 = vpop.f32.mrf.mxu0  ;;  %v6339_v20 = vadd.f32 %v6331_v63, %v6060_v1 }
 0x8a6   :  { %v6333_v56 = vpop.f32.mrf.mxu1  ;;  %v9551_v60 = vpop.eup %9550  ;;  %9554 = vpow2.f32 %v8539_v31  ;;  %v8540_v50 = vmul.f32 -1.442695, %v6337_v43  ;;  %v6338_v5 = vadd.f32 %v6329_v41, %v6059_v32  ;;  %v11343_v32 = vld [vmem:[#allocation15 + $0xe0] ss:$16 sps:$4 sm:$0xff]  }
 0x8a7   :  { %v9553_v27 = vpop.eup %9552  ;;  %v6293_v49 = vpop.f32.mrf.mxu0  ;;  %v6010_v34 = vmul.f32 %v9551_v60, %v9549_v23  ;;  %v8541_v31 = vmul.f32 -1.442695, %v6339_v20 }
 0x8a8   :  { %v6334_v11 = vpop.f32.mrf.mxu1  ;;  %v6009_v30 = vmul.f32 %v9553_v27, %v11084_v9  ;;  %9556 = vpow2.f32 %v8540_v50 }
 0x8a9   :  { %9558 = vrcp.f32 %v6006_v54 }
 0x8aa   :  { %v11334_v29 = vadd.f32 %v6010_v34, %v6009_v30 }
 0x8ac   :  { %9560 = vtanh.f32 %v11334_v29 }
 0x8ad   :  { %9562 = vtanh.f32 %v6338_v5  ;;  %v11345_v5 = vld [vmem:[#allocation15 + $0xe8] ss:$16 sps:$4 sm:$0xff]  }
 0x8ae   :  { %9564 = vpow2.f32 %v8541_v31 }
 0x8b3   :  { %v9555_v43 = vpop.eup %9554 }
 0x8b4   :  { %v6344_v61 = vadd.f32 1.0, %v9555_v43  ;;  %v11347_v43 = vld [vmem:[#allocation15 + $0xc4] ss:$16 sps:$4 sm:$0xff]  }
 0x8b5   :  { %v9557_v40 = vpop.eup %9556 }
 0x8b6   :  { %9566 = vrcp.f32 %v6344_v61  ;;  %v6350_v9 = vadd.f32 1.0, %v9557_v40  ;;  %v9559_v23 = vpop.eup %9558  ;;  %v11349_v61 = vld [vmem:[#allocation15 + $0xcc] ss:$16 sps:$4 sm:$0xff]   ;;  %v11355_v40 = vld [vmem:[#allocation15 + $0xc8] ss:$16 sps:$4 sm:$0xff]  }
 0x8b8   :  { %9568 = vrcp.f32 %v6350_v9  ;;  %v11359_v9 = vld [vmem:[#allocation15 + $0xa4] ss:$16 sps:$4 sm:$0xff]  }
 0x8b9   :  { %v9561_v56 = vpop.eup %9560 }
 0x8ba   :  { %v6013_v60 = vmul.f32 %v9561_v56, %v9559_v23  ;;  %v9563_v27 = vpop.eup %9562  ;;  %v11361_v23 = vld [vmem:[#allocation15 + $0xac] ss:$16 sps:$4 sm:$0xff]   ;;  %v11367_v56 = vld [vmem:[#allocation15 + $0xa0] ss:$16 sps:$4 sm:$0xff]  }
 0x8bb   :  { %v9565_v63 = vpop.eup %9564 }
 0x8bc   :  { %v6015_v50 = vpack.c.bf16 %v6013_v60, %v6013_v60  ;;  %v6357_v11 = vadd.f32 1.0, %v9565_v63  ;;  %v11369_v60 = vld [vmem:[#allocation15 + $0xa8] ss:$16 sps:$4 sm:$0xff]   ;;  %v11379_v63 = vld [vmem:[#allocation15 + $0x80] ss:$16 sps:$4 sm:$0xff]  }
 0x8be   :  { %6018 = vst [vmem:[#allocation16 + $0x14] sm:$0xf] %v6015_v50  ;;  %6016 = vst [vmem:[#allocation4] sm:$0xf] %v6015_v50  ;;  %9570 = vrcp.f32 %v6357_v11  ;;  %v11373_v50 = vld [vmem:[#allocation15 + $0x84] ss:$16 sps:$4 sm:$0xff]  }
 0x8bf   :  { %v11391_v11 = vld [vmem:[#allocation15 + $0x60] ss:$16 sps:$4 sm:$0xff]  }
 0x8c0   :  { %11976 = vst [vmem:[#allocation63_spill] sm:$0xff] %v11391_v11 }
 0x8c3   :  { %v9567_v54 = vpop.eup %9566 }
 0x8c4   :  { %v6361_v49 = vmul.f32 %v9567_v54, %v9563_v27  ;;  %v11375_v27 = vld [vmem:[#allocation15 + $0x8c] ss:$16 sps:$4 sm:$0xff]   ;;  %v11381_v54 = vld [vmem:[#allocation15 + $0x88] ss:$16 sps:$4 sm:$0xff]  }
 0x8c5   :  { %v9569_v41 = vpop.eup %9568  ;;  %11973 = vst [vmem:[#allocation60_spill] sm:$0xff] %v11381_v54 }
 0x8c6   :  { %v6360_v34 = vmul.f32 %v9569_v41, %v11090_v33  ;;  %v11353_v33 = vld [vmem:[#allocation15 + $0xc0] ss:$16 sps:$4 sm:$0xff]   ;;  %v11387_v41 = vld [vmem:[#allocation15 + $0x6c] ss:$16 sps:$4 sm:$0xff]  }
 0x8c7   :  { %11975 = vst [vmem:[#allocation62_spill] sm:$0xff] %v11387_v41 }
 0x8c8   :  { %v11340_v30 = vadd.f32 %v6361_v49, %v6360_v34  ;;  %v11385_v49 = vld [vmem:[#allocation15 + $0x64] ss:$16 sps:$4 sm:$0xff]   ;;  %v11393_v34 = vld [vmem:[#allocation15 + $0x68] ss:$16 sps:$4 sm:$0xff]  }
 0x8c9   :  { %11974 = vst [vmem:[#allocation61_spill] sm:$0xff] %v11385_v49  ;;  %11977 = vst [vmem:[#allocation27_spill] sm:$0xff] %v11393_v34 }
 0x8ca   :  { %9572 = vtanh.f32 %v11340_v30 }
 0x8cb   :  { %v9571_v28 = vpop.eup %9570 }
 0x8d7   :  { %v9573_v1 = vpop.eup %9572 }
 0x8d8   :  { %v6364_v20 = vmul.f32 %v9573_v1, %v9571_v28  ;;  %v11397_v28 = vld [vmem:[#allocation15 + $0x44] ss:$16 sps:$4 sm:$0xff]   ;;  %v11399_v1 = vld [vmem:[#allocation15 + $0x4c] ss:$16 sps:$4 sm:$0xff]  }
 0x8d9   :  { %11978 = vst [vmem:[#allocation28_spill] sm:$0xff] %v11397_v28  ;;  %11979 = vst [vmem:[#allocation23_spill] sm:$0xff] %v11399_v1 }
 0x8da   :  { %v6366_v31 = vpack.c.bf16 %v6364_v20, %v6364_v20  ;;  %v11403_v20 = vld [vmem:[#allocation15 + $0x40] ss:$16 sps:$4 sm:$0xff]  }
 0x8db   :  { %11980 = vst [vmem:[#allocation24_spill] sm:$0xff] %v11403_v20 }
 0x8dc   :  { %6593 = vmatmul.mubr.bf16.vlgmr.msra.gmra.mxu0 %v6366_v31  ;;  %6367 = vst [vmem:[#allocation3] sm:$0xf] %v6366_v31  ;;  %6634 = vmatmul.mubr.bf16.vlgmr.msra.gmra.mxu1 %v6366_v31  ;;  %v11405_v31 = vld [vmem:[#allocation15 + $0x48] ss:$16 sps:$4 sm:$0xff]  }
 0x8dd   :  { %6803 = vmatpush1.bf16.msra.mxu0 %v11343_v32  ;;  %6844 = vmatpush1.bf16.msra.mxu1 %v11345_v5 }
 0x8de   :  { %6804 = vmatprep.subr.bf16.mxu0 %v11347_v43  ;;  %6845 = vmatprep.subr.bf16.mxu1 %v11349_v61 }
 0x8df   :  { %6834 = vmatprep.mubr.bf16.mxu0 %v11735_v48  ;;  %6875 = vmatprep.mubr.bf16.mxu1 %v11735_v48 }
 0x8e1   :  { %6805 = vmatpush1.bf16.msra.mxu0 %v11353_v33  ;;  %6846 = vmatpush1.bf16.msra.mxu1 %v11355_v40 }
 0x8e2   :  { %6806 = vmatprep.subr.bf16.mxu0 %v11359_v9  ;;  %6847 = vmatprep.subr.bf16.mxu1 %v11361_v23 }
 0x8e5   :  { %6807 = vmatpush1.bf16.msra.mxu0 %v11367_v56  ;;  %6848 = vmatpush1.bf16.msra.mxu1 %v11369_v60 }
 0x8e6   :  { %6808 = vmatprep.subr.bf16.mxu0 %v11373_v50  ;;  %6849 = vmatprep.subr.bf16.mxu1 %v11375_v27 }
 0x8e9   :  { %6809 = vmatpush1.bf16.msra.mxu0 %v11379_v63  ;;  %6850 = vmatpush1.bf16.msra.mxu1 %v11381_v54  ;;  %v11409_v54 = vld [vmem:[#allocation15 + $0x24] ss:$16 sps:$4 sm:$0xff]  }
 0x8ea   :  { %6810 = vmatprep.subr.bf16.mxu0 %v11385_v49  ;;  %6851 = vmatprep.subr.bf16.mxu1 %v11387_v41  ;;  %v11411_v49 = vld [vmem:[#allocation15 + $0x2c] ss:$16 sps:$4 sm:$0xff]   ;;  %v11415_v41 = vld [vmem:[#allocation15 + $0x20] ss:$16 sps:$4 sm:$0xff]  }
 0x8eb   :  { %11981 = vst [vmem:[#allocation21_spill] sm:$0xff] %v11411_v49 }
 0x8ed   :  { %6811 = vmatpush1.bf16.msra.mxu0 %v11391_v11  ;;  %6852 = vmatpush1.bf16.msra.mxu1 %v11393_v34  ;;  %v11417_v11 = vld [vmem:[#allocation15 + $0x28] ss:$16 sps:$4 sm:$0xff]   ;;  %v11421_v34 = vld [vmem:[#allocation15 + $0x4] ss:$16 sps:$4 sm:$0xff]  }
 0x8ee   :  { %6812 = vmatprep.subr.bf16.mxu0 %v11397_v28  ;;  %6853 = vmatprep.subr.bf16.mxu1 %v11399_v1  ;;  %v11423_v28 = vld [vmem:[#allocation15 + $0xc] ss:$16 sps:$4 sm:$0xff]   ;;  %v11427_v1 = vld [vmem:[#allocation15] ss:$16 sps:$4 sm:$0xff]  }
 0x8f1   :  { %6813 = vmatpush1.bf16.msra.mxu0 %v11403_v20  ;;  %6854 = vmatpush1.bf16.msra.mxu1 %v11405_v31  ;;  %v11429_v20 = vld [vmem:[#allocation15 + $0x8] ss:$16 sps:$4 sm:$0xff]  }
 0x8f2   :  { %6814 = vmatprep.subr.bf16.mxu0 %v11409_v54  ;;  %6855 = vmatprep.subr.bf16.mxu1 %v11411_v49  ;;  %v6019_v49 = vld [vmem:[#allocation4] sm:$0xf] }
 0x8f5   :  { %6815 = vmatpush1.bf16.msra.mxu0 %v11415_v41  ;;  %6856 = vmatpush1.bf16.msra.mxu1 %v11417_v11 }
 0x8f6   :  { %6816 = vmatprep.subr.bf16.mxu0 %v11421_v34  ;;  %6857 = vmatprep.subr.bf16.mxu1 %v11423_v28 }
 0x8f9   :  { %6817 = vmatpush1.bf16.msra.mxu0 %v11427_v1  ;;  %6858 = vmatpush1.bf16.msra.mxu1 %v11429_v20 }
 0x8fa   :  { %7153 = vmatprep.subr.bf16.mxu0 %v11123_v7  ;;  %7194 = vmatprep.subr.bf16.mxu1 %v11125_v0  ;;  %v6960_v7 = vld [vmem:[#allocation3] sm:$0xf]  ;;  %v11982_v0 = vld [vmem:[#allocation69_spill] sm:$0xff] }
 0x8fc   :  { %6835 = vmatmul.mubr.bf16.vlgmr.msra.gmra.mxu0 %v6019_v49  ;;  %6876 = vmatmul.mubr.bf16.vlgmr.msra.gmra.mxu1 %v6019_v49 }
 0x8fd   :  { %7154 = vmatpush1.bf16.msra.mxu0 %v11129_v55  ;;  %7195 = vmatpush1.bf16.msra.mxu1 %v11131_v36  ;;  %v11983_v55 = vld [vmem:[#allocation70_spill] sm:$0xff]  ;;  %v11984_v36 = vld [vmem:[#allocation25_spill] sm:$0xff] }
 0x8fe   :  { %7155 = vmatprep.subr.bf16.mxu0 %v11135_v51  ;;  %7196 = vmatprep.subr.bf16.mxu1 %v11137_v58  ;;  %v11985_v51 = vld [vmem:[#allocation26_spill] sm:$0xff]  ;;  %v11986_v58 = vld [vmem:[#allocation33_spill] sm:$0xff] }
 0x8ff   :  { %7185 = vmatprep.mubr.bf16.mxu0 %v11735_v48  ;;  %7226 = vmatprep.mubr.bf16.mxu1 %v11735_v48 }
 0x901   :  { %7156 = vmatpush1.bf16.msra.mxu0 %v11141_v52  ;;  %7197 = vmatpush1.bf16.msra.mxu1 %v11143_v45  ;;  %v11987_v52 = vld [vmem:[#allocation34_spill] sm:$0xff]  ;;  %v11988_v45 = vld [vmem:[#allocation35_spill] sm:$0xff] }
 0x902   :  { %7157 = vmatprep.subr.bf16.mxu0 %v11147_v37  ;;  %7198 = vmatprep.subr.bf16.mxu1 %v11149_v57  ;;  %v11989_v37 = vld [vmem:[#allocation36_spill] sm:$0xff]  ;;  %v11990_v57 = vld [vmem:[#allocation37_spill] sm:$0xff] }
 0x905   :  { %7158 = vmatpush1.bf16.msra.mxu0 %v11155_v24  ;;  %7199 = vmatpush1.bf16.msra.mxu1 %v11157_v4  ;;  %v11991_v24 = vld [vmem:[#allocation38_spill] sm:$0xff]  ;;  %v11992_v4 = vld [vmem:[#allocation39_spill] sm:$0xff] }
 0x906   :  { %7159 = vmatprep.subr.bf16.mxu0 %v11161_v53  ;;  %7200 = vmatprep.subr.bf16.mxu1 %v11163_v59  ;;  %v11993_v53 = vld [vmem:[#allocation40_spill] sm:$0xff]  ;;  %v11994_v59 = vld [vmem:[#allocation41_spill] sm:$0xff] }
 0x909   :  { %7160 = vmatpush1.bf16.msra.mxu0 %v11167_v2  ;;  %7201 = vmatpush1.bf16.msra.mxu1 %v11169_v44  ;;  %v11995_v2 = vld [vmem:[#allocation42_spill] sm:$0xff]  ;;  %v11996_v44 = vld [vmem:[#allocation45_spill] sm:$0xff] }
 0x90a   :  { %7161 = vmatprep.subr.bf16.mxu0 %v11173_v6  ;;  %7202 = vmatprep.subr.bf16.mxu1 %v11175_v46  ;;  %v11997_v6 = vld [vmem:[#allocation43_spill] sm:$0xff]  ;;  %v11998_v46 = vld [vmem:[#allocation44_spill] sm:$0xff] }
 0x90d   :  { %7162 = vmatpush1.bf16.msra.mxu0 %v11179_v62  ;;  %7203 = vmatpush1.bf16.msra.mxu1 %v11181_v42  ;;  %v11999_v62 = vld [vmem:[#allocation46_spill] sm:$0xff]  ;;  %v12000_v42 = vld [vmem:[#allocation48_spill] sm:$0xff] }
 0x90e   :  { %7163 = vmatprep.subr.bf16.mxu0 %v11185_v47  ;;  %7204 = vmatprep.subr.bf16.mxu1 %v11187_v8  ;;  %v12001_v47 = vld [vmem:[#allocation49_spill] sm:$0xff]  ;;  %v12002_v8 = vld [vmem:[#allocation47_spill] sm:$0xff] }
 0x911   :  { %7164 = vmatpush1.bf16.msra.mxu0 %v11191_v10  ;;  %7205 = vmatpush1.bf16.msra.mxu1 %v11193_v12  ;;  %v12003_v10 = vld [vmem:[#allocation50_spill] sm:$0xff]  ;;  %v12004_v12 = vld [vmem:[#allocation51_spill] sm:$0xff] }
 0x912   :  { %7165 = vmatprep.subr.bf16.mxu0 %v11197_v13  ;;  %7206 = vmatprep.subr.bf16.mxu1 %v11199_v14  ;;  %v12005_v13 = vld [vmem:[#allocation52_spill] sm:$0xff]  ;;  %v12006_v14 = vld [vmem:[#allocation53_spill] sm:$0xff] }
 0x915   :  { %7166 = vmatpush1.bf16.msra.mxu0 %v11203_v15  ;;  %7207 = vmatpush1.bf16.msra.mxu1 %v11205_v16  ;;  %v12007_v15 = vld [vmem:[#allocation54_spill] sm:$0xff]  ;;  %v12008_v16 = vld [vmem:[#allocation55_spill] sm:$0xff] }
 0x916   :  { %7167 = vmatprep.subr.bf16.mxu0 %v11209_v18  ;;  %7208 = vmatprep.subr.bf16.mxu1 %v11211_v19  ;;  %v12009_v18 = vld [vmem:[#allocation56_spill] sm:$0xff]  ;;  %v12010_v19 = vld [vmem:[#allocation57_spill] sm:$0xff] }
 0x919   :  { %7168 = vmatpush1.bf16.msra.mxu0 %v11215_v21  ;;  %7209 = vmatpush1.bf16.msra.mxu1 %v11217_v38  ;;  %v12011_v21 = vld [vmem:[#allocation58_spill] sm:$0xff]  ;;  %v12012_v38 = vld [vmem:[#allocation59_spill] sm:$0xff] }
 0x91a   :  { %7459 = vmatprep.subr.bf16.mxu0 %v11225_v3  ;;  %7500 = vmatprep.subr.bf16.mxu1 %v11227_v25 }
 0x91c   :  { %7186 = vmatmul.mubr.bf16.vlgmr.msra.gmra.mxu0 %v6960_v7  ;;  %7227 = vmatmul.mubr.bf16.vlgmr.msra.gmra.mxu1 %v6960_v7 }
 0x91d   :  { %7460 = vmatpush1.bf16.msra.mxu0 %v11229_v26  ;;  %7501 = vmatpush1.bf16.msra.mxu1 %v11982_v0 }
 0x91e   :  { %7461 = vmatprep.subr.bf16.mxu0 %v11983_v55  ;;  %7502 = vmatprep.subr.bf16.mxu1 %v11984_v36 }
 0x91f   :  { %7491 = vmatprep.mubr.bf16.mxu0 %v11735_v48  ;;  %7532 = vmatprep.mubr.bf16.mxu1 %v11735_v48 }
 0x921   :  { %7462 = vmatpush1.bf16.msra.mxu0 %v11985_v51  ;;  %7503 = vmatpush1.bf16.msra.mxu1 %v11986_v58 }
 0x922   :  { %7463 = vmatprep.subr.bf16.mxu0 %v11987_v52  ;;  %7504 = vmatprep.subr.bf16.mxu1 %v11988_v45 }
 0x925   :  { %7464 = vmatpush1.bf16.msra.mxu0 %v11989_v37  ;;  %7505 = vmatpush1.bf16.msra.mxu1 %v11990_v57 }
 0x926   :  { %7465 = vmatprep.subr.bf16.mxu0 %v11991_v24  ;;  %7506 = vmatprep.subr.bf16.mxu1 %v11992_v4 }
 0x929   :  { %7466 = vmatpush1.bf16.msra.mxu0 %v11993_v53  ;;  %7507 = vmatpush1.bf16.msra.mxu1 %v11994_v59 }
 0x92a   :  { %7467 = vmatprep.subr.bf16.mxu0 %v11995_v2  ;;  %7508 = vmatprep.subr.bf16.mxu1 %v11996_v44 }
 0x92d   :  { %7468 = vmatpush1.bf16.msra.mxu0 %v11997_v6  ;;  %7509 = vmatpush1.bf16.msra.mxu1 %v11998_v46 }
 0x92e   :  { %7469 = vmatprep.subr.bf16.mxu0 %v11999_v62  ;;  %7510 = vmatprep.subr.bf16.mxu1 %v12000_v42 }
 0x931   :  { %7470 = vmatpush1.bf16.msra.mxu0 %v12001_v47  ;;  %7511 = vmatpush1.bf16.msra.mxu1 %v12002_v8 }
 0x932   :  { %7471 = vmatprep.subr.bf16.mxu0 %v12003_v10  ;;  %7512 = vmatprep.subr.bf16.mxu1 %v12004_v12 }
 0x935   :  { %7472 = vmatpush1.bf16.msra.mxu0 %v12005_v13  ;;  %7513 = vmatpush1.bf16.msra.mxu1 %v12006_v14 }
 0x936   :  { %7473 = vmatprep.subr.bf16.mxu0 %v12007_v15  ;;  %7514 = vmatprep.subr.bf16.mxu1 %v12008_v16  ;;  %v12013_v16 = vld [vmem:[#allocation31_spill] sm:$0xff] }
 0x939   :  { %7474 = vmatpush1.bf16.msra.mxu0 %v12009_v18  ;;  %7515 = vmatpush1.bf16.msra.mxu1 %v12010_v19  ;;  %v6956_v18 = vunpack.c.l.bf16 %v12013_v16 }
 0x93a   :  { %7701 = vmatprep.subr.bf16.mxu0 %v12011_v21  ;;  %7742 = vmatprep.subr.bf16.mxu1 %v12012_v38 }
 0x99c   :  { %v6594_v3 = vpop.f32.mrf.mxu0  ;;  %v6635_v25 = vpop.f32.mrf.mxu1 }
 0x99e   :  { %v6596_v26 = vpop.f32.mrf.mxu0  ;;  %v6637_v49 = vpop.f32.mrf.mxu1 }
 0x9a0   :  { %v6598_v7 = vpop.f32.mrf.mxu0  ;;  %v6639_v0 = vpop.f32.mrf.mxu1 }
 0x9a2   :  { %v6599_v55 = vpop.f32.mrf.mxu0  ;;  %v6640_v36 = vpop.f32.mrf.mxu1 }
 0x9bc   :  { %v6836_v51 = vpop.f32.mrf.mxu0  ;;  %v6877_v58 = vpop.f32.mrf.mxu1 }
 0x9bd   :  { %v6837_v52 = vadd.f32 %v6836_v51, %v6594_v3  ;;  %v6878_v47 = vadd.f32 %v6877_v58, %v6635_v25  ;;  %v6957_v3 = vunpack.c.h.bf16 %v12013_v16 }
 0x9be   :  { %v6838_v45 = vpop.f32.mrf.mxu0  ;;  %v6879_v37 = vpop.f32.mrf.mxu1 }
 0x9bf   :  { %v6884_v57 = vadd.f32 %v6837_v52, %v10208_v17  ;;  %v6839_v24 = vadd.f32 %v6838_v45, %v6596_v26  ;;  %v6880_v62 = vadd.f32 %v6879_v37, %v6637_v49  ;;  %v6886_v12 = vadd.f32 %v6878_v47, %v10223_v39 }
 0x9c0   :  { %v6840_v4 = vpop.f32.mrf.mxu0  ;;  %v6881_v53 = vpop.f32.mrf.mxu1 }
 0x9c1   :  { %v8606_v59 = vmul.f32 -1.442695, %v6884_v57  ;;  %v6885_v2 = vadd.f32 %v6839_v24, %v10212_v22  ;;  %v6887_v42 = vadd.f32 %v6880_v62, %v10218_v35 }
 0x9c2   :  { %v6841_v44 = vpop.f32.mrf.mxu0  ;;  %v6882_v6 = vpop.f32.mrf.mxu1 }
 0x9c3   :  { %9574 = vpow2.f32 %v8606_v59  ;;  %v8607_v46 = vmul.f32 -1.442695, %v6885_v2  ;;  %v8608_v8 = vmul.f32 -1.442695, %v6887_v42  ;;  %v12014_v2 = vld [vmem:[#allocation32_spill] sm:$0xff] }
 0x9c4   :  { %v6959_v44 = vunpack.c.h.bf16 %v12014_v2 }
 0x9c5   :  { %9576 = vpow2.f32 %v8607_v46  ;;  %v6958_v46 = vunpack.c.l.bf16 %v12014_v2 }
 0x9c6   :  { %9578 = vpow2.f32 %v8608_v8 }
 0x9d0   :  { %v9575_v10 = vpop.eup %9574 }
 0x9d1   :  { %v6892_v13 = vadd.f32 1.0, %v9575_v10 }
 0x9d2   :  { %v9577_v14 = vpop.eup %9576 }
 0x9d3   :  { %9580 = vrcp.f32 %v6892_v13  ;;  %v6898_v15 = vadd.f32 1.0, %v9577_v14  ;;  %v9579_v49 = vpop.eup %9578 }
 0x9d4   :  { %9582 = vtanh.f32 %v6886_v12  ;;  %v6905_v37 = vadd.f32 1.0, %v9579_v49 }
 0x9d5   :  { %9584 = vrcp.f32 %v6898_v15 }
 0x9dc   :  { %v7187_v19 = vpop.f32.mrf.mxu0  ;;  %v7228_v21 = vpop.f32.mrf.mxu1 }
 0x9dd   :  { %v7235_v38 = vadd.f32 %v7187_v19, %v6956_v18  ;;  %v7237_v62 = vadd.f32 %v7228_v21, %v6958_v46 }
 0x9de   :  { %v7189_v26 = vpop.f32.mrf.mxu0  ;;  %v7230_v25 = vpop.f32.mrf.mxu1 }
 0x9df   :  { %v8641_v7 = vmul.f32 -1.442695, %v7235_v38  ;;  %v7236_v0 = vadd.f32 %v7189_v26, %v6957_v3  ;;  %v7238_v6 = vadd.f32 %v7230_v25, %v6959_v44 }
 0x9e0   :  { %v9581_v55 = vpop.eup %9580  ;;  %v7191_v36 = vpop.f32.mrf.mxu0 }
 0x9e1   :  { %v7232_v51 = vpop.f32.mrf.mxu1  ;;  %v9583_v58 = vpop.eup %9582  ;;  %9586 = vpow2.f32 %v8641_v7  ;;  %v8642_v52 = vmul.f32 -1.442695, %v7236_v0  ;;  %v8643_v42 = vmul.f32 -1.442695, %v7238_v6 }
 0x9e2   :  { %v9585_v45 = vpop.eup %9584  ;;  %v7192_v57 = vpop.f32.mrf.mxu0  ;;  %v6909_v4 = vmul.f32 %v9583_v58, %v9581_v55 }
 0x9e3   :  { %v7233_v24 = vpop.f32.mrf.mxu1  ;;  %v6908_v53 = vmul.f32 %v9585_v45, %v11334_v29  ;;  %9588 = vpow2.f32 %v8642_v52 }
 0x9e4   :  { %9590 = vrcp.f32 %v6905_v37 }
 0x9e5   :  { %v11512_v59 = vadd.f32 %v6909_v4, %v6908_v53 }
 0x9e7   :  { %9592 = vtanh.f32 %v11512_v59 }
 0x9e8   :  { %9594 = vtanh.f32 %v7237_v62 }
 0x9e9   :  { %9596 = vpow2.f32 %v8643_v42 }
 0x9ee   :  { %v9587_v47 = vpop.eup %9586 }
 0x9ef   :  { %v7243_v8 = vadd.f32 1.0, %v9587_v47 }
 0x9f0   :  { %v9589_v10 = vpop.eup %9588 }
 0x9f1   :  { %9598 = vrcp.f32 %v7243_v8  ;;  %v7249_v29 = vadd.f32 1.0, %v9589_v10  ;;  %v9591_v12 = vpop.eup %9590 }
 0x9f3   :  { %9600 = vrcp.f32 %v7249_v29 }
 0x9f4   :  { %v9593_v13 = vpop.eup %9592 }
 0x9f5   :  { %v6912_v14 = vmul.f32 %v9593_v13, %v9591_v12  ;;  %v9595_v16 = vpop.eup %9594 }
 0x9f6   :  { %v9597_v18 = vpop.eup %9596 }
 0x9f7   :  { %v6914_v15 = vpack.c.bf16 %v6912_v14, %v6912_v14  ;;  %v7256_v3 = vadd.f32 1.0, %v9597_v18 }
 0x9f9   :  { %6917 = vst [vmem:[#allocation16 + $0x18] sm:$0xf] %v6914_v15  ;;  %6915 = vst [vmem:[#allocation4] sm:$0xf] %v6914_v15  ;;  %9602 = vrcp.f32 %v7256_v3 }
 0x9fe   :  { %v9599_v19 = vpop.eup %9598 }
 0x9ff   :  { %v7260_v38 = vmul.f32 %v9599_v19, %v9595_v16 }
 0xa00   :  { %v9601_v21 = vpop.eup %9600 }
 0xa01   :  { %v7259_v26 = vmul.f32 %v9601_v21, %v11340_v30  ;;  %v12015_v30 = vld [vmem:[#allocation60_spill] sm:$0xff] }
 0xa03   :  { %v7261_v25 = vadd.f32 %v7260_v38, %v7259_v26 }
 0xa05   :  { %9604 = vtanh.f32 %v7261_v25 }
 0xa06   :  { %v9603_v49 = vpop.eup %9602 }
 0xa12   :  { %v9605_v7 = vpop.eup %9604 }
 0xa13   :  { %v7263_v0 = vmul.f32 %v9605_v7, %v9603_v49 }
 0xa15   :  { %v7265_v55 = vpack.c.bf16 %v7263_v0, %v7263_v0 }
 0xa17   :  { %7266 = vst [vmem:[#allocation3] sm:$0xf] %v7265_v55  ;;  %7492 = vmatmul.mubr.bf16.vlgmr.msra.gmra.mxu0 %v7265_v55  ;;  %7533 = vmatmul.mubr.bf16.vlgmr.msra.gmra.mxu1 %v7265_v55 }
 0xa18   :  { %7702 = vmatpush1.bf16.msra.mxu0 %v11343_v32  ;;  %7743 = vmatpush1.bf16.msra.mxu1 %v11345_v5  ;;  %v12017_v32 = vld [vmem:[#allocation62_spill] sm:$0xff]  ;;  %v12018_v5 = vld [vmem:[#allocation63_spill] sm:$0xff] }
 0xa19   :  { %7703 = vmatprep.subr.bf16.mxu0 %v11347_v43  ;;  %7744 = vmatprep.subr.bf16.mxu1 %v11349_v61  ;;  %v12019_v43 = vld [vmem:[#allocation27_spill] sm:$0xff]  ;;  %v12020_v61 = vld [vmem:[#allocation28_spill] sm:$0xff] }
 0xa1a   :  { %7733 = vmatprep.mubr.bf16.mxu0 %v11735_v48  ;;  %7774 = vmatprep.mubr.bf16.mxu1 %v11735_v48  ;;  %v12016_v48 = vld [vmem:[#allocation61_spill] sm:$0xff] }
 0xa1c   :  { %7704 = vmatpush1.bf16.msra.mxu0 %v11353_v33  ;;  %7745 = vmatpush1.bf16.msra.mxu1 %v11355_v40  ;;  %v12021_v33 = vld [vmem:[#allocation23_spill] sm:$0xff]  ;;  %v12022_v40 = vld [vmem:[#allocation24_spill] sm:$0xff] }
 0xa1d   :  { %7705 = vmatprep.subr.bf16.mxu0 %v11359_v9  ;;  %7746 = vmatprep.subr.bf16.mxu1 %v11361_v23  ;;  %v12023_v9 = vld [vmem:[#allocation21_spill] sm:$0xff]  ;;  %v6918_v23 = vld [vmem:[#allocation4] sm:$0xf] }
 0xa20   :  { %7706 = vmatpush1.bf16.msra.mxu0 %v11367_v56  ;;  %7747 = vmatpush1.bf16.msra.mxu1 %v11369_v60 }
 0xa21   :  { %7707 = vmatprep.subr.bf16.mxu0 %v11373_v50  ;;  %7748 = vmatprep.subr.bf16.mxu1 %v11375_v27 }
 0xa24   :  { %7708 = vmatpush1.bf16.msra.mxu0 %v11379_v63  ;;  %7749 = vmatpush1.bf16.msra.mxu1 %v12015_v30 }
 0xa25   :  { %7709 = vmatprep.subr.bf16.mxu0 %v12016_v48  ;;  %7750 = vmatprep.subr.bf16.mxu1 %v12017_v32 }
 0xa28   :  { %7710 = vmatpush1.bf16.msra.mxu0 %v12018_v5  ;;  %7751 = vmatpush1.bf16.msra.mxu1 %v12019_v43 }
 0xa29   :  { %7711 = vmatprep.subr.bf16.mxu0 %v12020_v61  ;;  %7752 = vmatprep.subr.bf16.mxu1 %v12021_v33 }
 0xa2c   :  { %7712 = vmatpush1.bf16.msra.mxu0 %v12022_v40  ;;  %7753 = vmatpush1.bf16.msra.mxu1 %v11405_v31 }
 0xa2d   :  { %7713 = vmatprep.subr.bf16.mxu0 %v11409_v54  ;;  %7754 = vmatprep.subr.bf16.mxu1 %v12023_v9 }
 0xa30   :  { %7714 = vmatpush1.bf16.msra.mxu0 %v11415_v41  ;;  %7755 = vmatpush1.bf16.msra.mxu1 %v11417_v11 }
 0xa31   :  { %7715 = vmatprep.subr.bf16.mxu0 %v11421_v34  ;;  %7756 = vmatprep.subr.bf16.mxu1 %v11423_v28 }
 0xa34   :  { %7716 = vmatpush1.bf16.msra.mxu0 %v11427_v1  ;;  %7757 = vmatpush1.bf16.msra.mxu1 %v11429_v20 }
 0xa37   :  { %7734 = vmatmul.mubr.bf16.vlgmr.msra.gmra.mxu0 %v6918_v23  ;;  %7775 = vmatmul.mubr.bf16.vlgmr.msra.gmra.mxu1 %v6918_v23 }
 0xad7   :  { %v7493_v56 = vpop.f32.mrf.mxu0  ;;  %v7534_v60 = vpop.f32.mrf.mxu1 }
 0xad9   :  { %v7495_v50 = vpop.f32.mrf.mxu0  ;;  %v7536_v27 = vpop.f32.mrf.mxu1 }
 0xadb   :  { %v7497_v63 = vpop.f32.mrf.mxu0  ;;  %v7538_v54 = vpop.f32.mrf.mxu1 }
 0xadd   :  { %v7498_v41 = vpop.f32.mrf.mxu0  ;;  %v7539_v31 = vpop.f32.mrf.mxu1 }
 0xaf7   :  { %v7735_v11 = vpop.f32.mrf.mxu0  ;;  %v7776_v36 = vpop.f32.mrf.mxu1 }
 0xaf8   :  { %v7736_v34 = vadd.f32 %v7735_v11, %v7493_v56  ;;  %v7777_v44 = vadd.f32 %v7776_v36, %v7534_v60 }
 0xaf9   :  { %v7737_v51 = vpop.f32.mrf.mxu0  ;;  %v7778_v28 = vpop.f32.mrf.mxu1 }
 0xafa   :  { %v7783_v1 = vadd.f32 %v7736_v34, %v10208_v17  ;;  %v7738_v58 = vadd.f32 %v7737_v51, %v7495_v50  ;;  %v7779_v53 = vadd.f32 %v7778_v28, %v7536_v27  ;;  %v7785_v62 = vadd.f32 %v7777_v44, %v10223_v39 }
 0xafb   :  { %v7739_v20 = vpop.f32.mrf.mxu0  ;;  %v7780_v52 = vpop.f32.mrf.mxu1 }
 0xafc   :  { %v8708_v45 = vmul.f32 -1.442695, %v7783_v1  ;;  %v7784_v37 = vadd.f32 %v7738_v58, %v10212_v22  ;;  %v7786_v2 = vadd.f32 %v7779_v53, %v10218_v35 }
 0xafd   :  { %v7740_v57 = vpop.f32.mrf.mxu0  ;;  %v7781_v24 = vpop.f32.mrf.mxu1 }
 0xafe   :  { %9606 = vpow2.f32 %v8708_v45  ;;  %v8709_v4 = vmul.f32 -1.442695, %v7784_v37  ;;  %v8710_v6 = vmul.f32 -1.442695, %v7786_v2 }
 0xb00   :  { %9608 = vpow2.f32 %v8709_v4 }
 0xb01   :  { %9610 = vpow2.f32 %v8710_v6 }
 0xb0b   :  { %v9607_v46 = vpop.eup %9606 }
 0xb0c   :  { %v7791_v17 = vadd.f32 1.0, %v9607_v46 }
 0xb0d   :  { %v9609_v42 = vpop.eup %9608 }
 0xb0e   :  { %9612 = vrcp.f32 %v7791_v17  ;;  %v7797_v47 = vadd.f32 1.0, %v9609_v42  ;;  %v9611_v22 = vpop.eup %9610 }
 0xb0f   :  { %9614 = vtanh.f32 %v7785_v62  ;;  %v7804_v12 = vadd.f32 1.0, %v9611_v22 }
 0xb10   :  { %9616 = vrcp.f32 %v7797_v47 }
 0xb11   :  { %9618 = vrcp.f32 %v7804_v12 }
 0xb1b   :  { %v9613_v8 = vpop.eup %9612 }
 0xb1c   :  { %v9615_v10 = vpop.eup %9614 }
 0xb1d   :  { %v9617_v29 = vpop.eup %9616  ;;  %v7808_v13 = vmul.f32 %v9615_v10, %v9613_v8 }
 0xb1e   :  { %v7807_v35 = vmul.f32 %v9617_v29, %v11512_v59  ;;  %v9619_v15 = vpop.eup %9618 }
 0xb20   :  { %v7809_v14 = vadd.f32 %v7808_v13, %v7807_v35 }
 0xb22   :  { %9620 = vtanh.f32 %v7809_v14 }
 0xb2f   :  { %v9621_v39 = vpop.eup %9620 }
 0xb30   :  { %v7811_v16 = vmul.f32 %v9621_v39, %v9619_v15 }
 0xb32   :  { %v7813_v18 = vpack.c.bf16 %v7811_v16, %v7811_v16 }
 0xb34   :  { %7814 = vst [vmem:[#allocation4] sm:$0xf] %v7813_v18  ;;  %7816 = vst [vmem:[#allocation16 + $0x1c] sm:$0xf] %v7813_v18 }
 0xb35   :  { %9765 = shalt.err (!%p9762_p1)
}
 0xb36   :  { %7828 = dma.vmem_to_hbm [thread:$0]  %s7823_s28, 512, %s11568_s7, [#allocation9], %s9787_s15, %s9787_s15, %s9788_s16  }
 0xb37   :  { %9780 = dma.done.wait [#allocation9], 512  }
 0xb38   :  { %9781 = vsyncadd [#allocation9], 4294966784 }
 0xb39   :  { %7832 = vsyncpa [#allocation8], 1 }
 0xb3a   :  { %7833 = vsyncpa [#allocation11], 1 }
 0xb3b   :  { %7834 = vsyncpa [#allocation14], 1 }
 0xb3c   :  { %7835 = vsyncpa [#allocation9], 1 }

</bundles_post_ra>
